<compile_context>
chip_gen: v5e
topology: v5e:2x2
jax: 0.10.0
libtpu: 0.0.40
codegen_flags: <defaults>
</compile_context>

<pallas_src>
import jax
import jax.numpy as jnp
from jax.experimental import pallas as pl
from jax.experimental.pallas import tpu as pltpu

D_IN, D_IN_PAD = 784, 896      # 896 = 7 * 128 (lane-aligned K for fc1)
D_H1, D_H2 = 1024, 512
D_OUT, D_OUT_PAD = 10, 128     # lane-dense output, sliced back to 10 outside
TB_MAX = 256                   # batch tile; sized for v5e's single store slot


def _round_up(a, m):
    return ((a + m - 1) // m) * m


def mlp_kernel(x_ref, w1_ref, b1_ref, w2_ref, b2_ref, w3_ref, b3_ref, o_ref):
    # fc1 + relu (bf16 operands, f32 accumulation, f32 bias add)
    h1 = jnp.dot(x_ref[...], w1_ref[...], preferred_element_type=jnp.float32)
    h1 = jnp.maximum(h1 + b1_ref[...], 0.0).astype(jnp.bfloat16)
    # fc2 + relu
    h2 = jnp.dot(h1, w2_ref[...], preferred_element_type=jnp.float32)
    h2 = jnp.maximum(h2 + b2_ref[...], 0.0).astype(jnp.bfloat16)
    # fc3 (no activation), output N padded to 128 for unmasked full-vreg stores
    h3 = jnp.dot(h2, w3_ref[...], preferred_element_type=jnp.float32)
    o_ref[...] = (h3 + b3_ref[...]).astype(o_ref.dtype)


def mlp_forward(x, packed_params):
    """x: any shape with 784 trailing elements per row after flatten."""
    w1, b1, w2, b2, w3, b3 = packed_params
    x2d = x.reshape(-1, D_IN)
    B = x2d.shape[0]

    # Pad feature dim 784 -> 896 with zeros (zero cols contribute nothing),
    # cast to bf16 for the MXU.
    x2d = jnp.pad(x2d, ((0, 0), (0, D_IN_PAD - D_IN))).astype(jnp.bfloat16)

    # Pad batch to a multiple of the batch tile (zero rows are discarded later).
    b_pad = _round_up(max(B, 16), 16)
    tb = min(TB_MAX, b_pad)
    b_pad = _round_up(b_pad, tb)
    if b_pad != B:
        x2d = jnp.pad(x2d, ((0, b_pad - B), (0, 0)))

    grid = (b_pad // tb,)

    flops = 2 * b_pad * (D_IN_PAD * D_H1 + D_H1 * D_H2 + D_H2 * D_OUT_PAD)
    bytes_accessed = (
        x2d.size * 2
        + (w1.size + w2.size + w3.size) * 2
        + (b1.size + b2.size + b3.size) * 4
        + b_pad * D_OUT_PAD * 4
    )

    out = pl.pallas_call(
        mlp_kernel,
        out_shape=jax.ShapeDtypeStruct((b_pad, D_OUT_PAD), jnp.float32),
        grid=grid,
        in_specs=[
            pl.BlockSpec((tb, D_IN_PAD), lambda i: (i, 0)),        # x tile
            pl.BlockSpec((D_IN_PAD, D_H1), lambda i: (0, 0)),      # w1 (resident)
            pl.BlockSpec((1, D_H1), lambda i: (0, 0)),             # b1
            pl.BlockSpec((D_H1, D_H2), lambda i: (0, 0)),          # w2 (resident)
            pl.BlockSpec((1, D_H2), lambda i: (0, 0)),             # b2
            pl.BlockSpec((D_H2, D_OUT_PAD), lambda i: (0, 0)),     # w3 (padded N)
            pl.BlockSpec((1, D_OUT_PAD), lambda i: (0, 0)),        # b3 (padded N)
        ],
        out_specs=pl.BlockSpec((tb, D_OUT_PAD), lambda i: (i, 0)),
        compiler_params=pltpu.CompilerParams(
            dimension_semantics=("parallel",),
            vmem_limit_bytes=32 << 20,
        ),
        cost_estimate=pl.CostEstimate(
            flops=flops, transcendentals=0, bytes_accessed=bytes_accessed),
    )(x2d, w1, b1, w2, b2, w3, b3)

    # Drop batch/output padding.
    return out[:B, :D_OUT]


def init_params(key):
    """Deterministic init mirroring nn.Linear shapes; weights stored as (in, out), f32."""
    ks = jax.random.split(key, 6)

    def linear(kw, kb, fan_in, fan_out):
        bound = 1.0 / jnp.sqrt(fan_in)
        # PyTorch Linear weight is (out, in); we store the transpose (in, out).
        w = jax.random.uniform(kw, (fan_in, fan_out), jnp.float32, -bound, bound)
        b = jax.random.uniform(kb, (1, fan_out), jnp.float32, -bound, bound)
        return w, b

    w1, b1 = linear(ks[0], ks[1], D_IN, D_H1)
    w2, b2 = linear(ks[2], ks[3], D_H1, D_H2)
    w3, b3 = linear(ks[4], ks[5], D_H2, D_OUT)
    return (w1, b1, w2, b2, w3, b3)


def pack_params(params):
    """One-time prep: pad K (784->896) and output N (10->128), cast weights to bf16."""
    w1, b1, w2, b2, w3, b3 = params
    w1p = jnp.pad(w1, ((0, D_IN_PAD - D_IN), (0, 0))).astype(jnp.bfloat16)
    w2p = w2.astype(jnp.bfloat16)
    w3p = jnp.pad(w3, ((0, 0), (0, D_OUT_PAD - D_OUT))).astype(jnp.bfloat16)
    b3p = jnp.pad(b3, ((0, 0), (0, D_OUT_PAD - D_OUT)))  # f32
    return (w1p, b1, w2p, b2, w3p, b3p)


if __name__ == "__main__":
    key = jax.random.PRNGKey(0)
    pkey, xkey = jax.random.split(key)
    params = init_params(pkey)
    packed = pack_params(params)

    # Small MNIST-like batch: (B, 1, 28, 28) -> view(-1, 784)
    B = 8
    x = jax.random.normal(xkey, (B, 1, 28, 28), jnp.float32)

    out = mlp_forward(x, packed)
    out = jax.block_until_ready(out)

    # Reference in plain JAX using the same bf16 quantization / f32 accumulation
    # (matches the kernel's numerical path; padding columns are zero so they
    # don't change the math).
    w1p, b1, w2p, b2, w3p, b3p = packed
    xq = x.reshape(-1, D_IN).astype(jnp.bfloat16)
    ref = jnp.dot(xq, w1p[:D_IN, :], preferred_element_type=jnp.float32) + b1
    ref = jnp.maximum(ref, 0.0).astype(jnp.bfloat16)
    ref = jnp.dot(ref, w2p, preferred_element_type=jnp.float32) + b2
    ref = jnp.maximum(ref, 0.0).astype(jnp.bfloat16)
    ref = jnp.dot(ref, w3p[:, :D_OUT], preferred_element_type=jnp.float32) + b3p[:, :D_OUT]

    assert out.shape == (B, D_OUT)
    assert jnp.allclose(out, ref, atol=1e-2, rtol=1e-2)

    print("KERNEL_OK")
</pallas_src>

<mosaic_0001>
module attributes {stable_mosaic.version = 11 : i64} {
  func.func @mlp_kernel(%arg0: i32, %arg1: memref<16x896xbf16, #tpu.memory_space<vmem>>, %arg2: memref<896x1024xbf16, #tpu.memory_space<vmem>>, %arg3: memref<1x1024xf32, #tpu.memory_space<vmem>>, %arg4: memref<1024x512xbf16, #tpu.memory_space<vmem>>, %arg5: memref<1x512xf32, #tpu.memory_space<vmem>>, %arg6: memref<512x128xbf16, #tpu.memory_space<vmem>>, %arg7: memref<1x128xf32, #tpu.memory_space<vmem>>, %arg8: memref<16x128xf32, #tpu.memory_space<vmem>>) attributes {dimension_semantics = [#tpu.dimension_semantics<parallel>], iteration_bounds = array<i64: 1>, scalar_prefetch = 0 : i64, scratch_operands = 0 : i64, tpu.core_type = #tpu.core_type<tc>, window_params = [{transform_indices = @transform_0, window_bounds = array<i64: 16, 896>}, {pipeline_mode = #tpu.pipeline_mode<synchronous>, transform_indices = @transform_1, window_bounds = array<i64: 896, 1024>}, {pipeline_mode = #tpu.pipeline_mode<synchronous>, transform_indices = @transform_2, window_bounds = array<i64: 1, 1024>}, {pipeline_mode = #tpu.pipeline_mode<synchronous>, transform_indices = @transform_3, window_bounds = array<i64: 1024, 512>}, {pipeline_mode = #tpu.pipeline_mode<synchronous>, transform_indices = @transform_4, window_bounds = array<i64: 1, 512>}, {pipeline_mode = #tpu.pipeline_mode<synchronous>, transform_indices = @transform_5, window_bounds = array<i64: 512, 128>}, {pipeline_mode = #tpu.pipeline_mode<synchronous>, transform_indices = @transform_6, window_bounds = array<i64: 1, 128>}, {transform_indices = @transform_7, window_bounds = array<i64: 16, 128>}]} {
    %c0 = arith.constant 0 : index
    %c0_0 = arith.constant 0 : index
    %0 = vector.load %arg1[%c0, %c0_0] : memref<16x896xbf16, #tpu.memory_space<vmem>>, vector<16x896xbf16>
    %c0_1 = arith.constant 0 : index
    %c0_2 = arith.constant 0 : index
    %1 = vector.load %arg2[%c0_1, %c0_2] : memref<896x1024xbf16, #tpu.memory_space<vmem>>, vector<896x1024xbf16>
    %cst = arith.constant dense<0.000000e+00> : vector<16x1024xf32>
    %2 = tpu.matmul %0, %1, %cst {dimension_numbers = #tpu.dot_dimension_numbers<[1], [0], [0], [1], [0, 0, 1, 1], [], []>} : vector<16x896xbf16>, vector<896x1024xbf16>, vector<16x1024xf32> -> vector<16x1024xf32>
    %c0_3 = arith.constant 0 : index
    %c0_4 = arith.constant 0 : index
    %3 = vector.load %arg3[%c0_3, %c0_4] : memref<1x1024xf32, #tpu.memory_space<vmem>>, vector<1x1024xf32>
    %4 = vector.broadcast %3 : vector<1x1024xf32> to vector<16x1024xf32>
    %5 = arith.addf %2, %4 : vector<16x1024xf32>
    %cst_5 = arith.constant 0.000000e+00 : f32
    %6 = vector.broadcast %cst_5 : f32 to vector<16x1024xf32>
    %7 = arith.maximumf %5, %6 : vector<16x1024xf32>
    %8 = arith.truncf %7 : vector<16x1024xf32> to vector<16x1024xbf16>
    %c0_6 = arith.constant 0 : index
    %c0_7 = arith.constant 0 : index
    %9 = vector.load %arg4[%c0_6, %c0_7] : memref<1024x512xbf16, #tpu.memory_space<vmem>>, vector<1024x512xbf16>
    %cst_8 = arith.constant dense<0.000000e+00> : vector<16x512xf32>
    %10 = tpu.matmul %8, %9, %cst_8 {dimension_numbers = #tpu.dot_dimension_numbers<[1], [0], [0], [1], [0, 0, 1, 1], [], []>} : vector<16x1024xbf16>, vector<1024x512xbf16>, vector<16x512xf32> -> vector<16x512xf32>
    %c0_9 = arith.constant 0 : index
    %c0_10 = arith.constant 0 : index
    %11 = vector.load %arg5[%c0_9, %c0_10] : memref<1x512xf32, #tpu.memory_space<vmem>>, vector<1x512xf32>
    %12 = vector.broadcast %11 : vector<1x512xf32> to vector<16x512xf32>
    %13 = arith.addf %10, %12 : vector<16x512xf32>
    %cst_11 = arith.constant 0.000000e+00 : f32
    %14 = vector.broadcast %cst_11 : f32 to vector<16x512xf32>
    %15 = arith.maximumf %13, %14 : vector<16x512xf32>
    %16 = arith.truncf %15 : vector<16x512xf32> to vector<16x512xbf16>
    %c0_12 = arith.constant 0 : index
    %c0_13 = arith.constant 0 : index
    %17 = vector.load %arg6[%c0_12, %c0_13] : memref<512x128xbf16, #tpu.memory_space<vmem>>, vector<512x128xbf16>
    %cst_14 = arith.constant dense<0.000000e+00> : vector<16x128xf32>
    %18 = tpu.matmul %16, %17, %cst_14 {dimension_numbers = #tpu.dot_dimension_numbers<[1], [0], [0], [1], [0, 0, 1, 1], [], []>} : vector<16x512xbf16>, vector<512x128xbf16>, vector<16x128xf32> -> vector<16x128xf32>
    %c0_15 = arith.constant 0 : index
    %c0_16 = arith.constant 0 : index
    %19 = vector.load %arg7[%c0_15, %c0_16] : memref<1x128xf32, #tpu.memory_space<vmem>>, vector<1x128xf32>
    %20 = vector.broadcast %19 : vector<1x128xf32> to vector<16x128xf32>
    %21 = arith.addf %18, %20 : vector<16x128xf32>
    %c0_17 = arith.constant 0 : index
    %c0_18 = arith.constant 0 : index
    %22 = vector.load %arg8[%c0_17, %c0_18] : memref<16x128xf32, #tpu.memory_space<vmem>>, vector<16x128xf32>
    tpu.vector_store %arg8[%c0_17, %c0_18], %21 {strides = array<i32>} : memref<16x128xf32, #tpu.memory_space<vmem>>, vector<16x128xf32>,
    return
  }
  func.func @transform_0(%arg0: i32) -> (i32, i32) {
    %c0_i32 = arith.constant 0 : i32
    %c0_i32_0 = arith.constant 0 : i32
    return %arg0, %c0_i32 : i32, i32
  }
  func.func @transform_1(%arg0: i32) -> (i32, i32) {
    %c0_i32 = arith.constant 0 : i32
    %c0_i32_0 = arith.constant 0 : i32
    %c0_i32_1 = arith.constant 0 : i32
    return %c0_i32, %c0_i32_0 : i32, i32
  }
  func.func @transform_2(%arg0: i32) -> (i32, i32) {
    %c0_i32 = arith.constant 0 : i32
    %c0_i32_0 = arith.constant 0 : i32
    %c0_i32_1 = arith.constant 0 : i32
    return %c0_i32, %c0_i32_0 : i32, i32
  }
  func.func @transform_3(%arg0: i32) -> (i32, i32) {
    %c0_i32 = arith.constant 0 : i32
    %c0_i32_0 = arith.constant 0 : i32
    %c0_i32_1 = arith.constant 0 : i32
    return %c0_i32, %c0_i32_0 : i32, i32
  }
  func.func @transform_4(%arg0: i32) -> (i32, i32) {
    %c0_i32 = arith.constant 0 : i32
    %c0_i32_0 = arith.constant 0 : i32
    %c0_i32_1 = arith.constant 0 : i32
    return %c0_i32, %c0_i32_0 : i32, i32
  }
  func.func @transform_5(%arg0: i32) -> (i32, i32) {
    %c0_i32 = arith.constant 0 : i32
    %c0_i32_0 = arith.constant 0 : i32
    %c0_i32_1 = arith.constant 0 : i32
    return %c0_i32, %c0_i32_0 : i32, i32
  }
  func.func @transform_6(%arg0: i32) -> (i32, i32) {
    %c0_i32 = arith.constant 0 : i32
    %c0_i32_0 = arith.constant 0 : i32
    %c0_i32_1 = arith.constant 0 : i32
    return %c0_i32, %c0_i32_0 : i32, i32
  }
  func.func @transform_7(%arg0: i32) -> (i32, i32) {
    %c0_i32 = arith.constant 0 : i32
    %c0_i32_0 = arith.constant 0 : i32
    return %arg0, %c0_i32 : i32, i32
  }
}

</mosaic_0001>

<bundles_post_ra>
// kernel: tpu_custom_call.1
= control target key start
LH: loop header
LB: loop body
LE: loop exit
PB: predicated region body
PF: predicated region fallthrough
CT: control target
= control target key end

     0   :  { %12 = vsyncpa [#allocation3], 0  ;;  %s10399_s0 = inlined_call_operand.hbm [shape: bf16[16,896], index: 0, kind: input, shape index: {}]   ;;  %s10400_s1 = inlined_call_operand.hbm [shape: bf16[896,1024], index: 1, kind: input, shape index: {}]   ;;  %s10401_s2 = inlined_call_operand.hbm [shape: f32[1,1024], index: 2, kind: input, shape index: {}]   ;;  %s10402_s3 = inlined_call_operand.hbm [shape: bf16[1024,512], index: 3, kind: input, shape index: {}]   ;;  %s10403_s4 = inlined_call_operand.hbm [shape: f32[1,512], index: 4, kind: input, shape index: {}]   ;;  %s10404_s5 = inlined_call_operand.hbm [shape: bf16[512,128], index: 5, kind: input, shape index: {}]   ;;  %s10405_s6 = inlined_call_operand.hbm [shape: f32[1,128], index: 6, kind: input, shape index: {}]   ;;  %s10406_s7 = inlined_call_operand.hbm [shape: f32[16,128], index: 7, kind: output, shape index: {}]  }
   0x1   :  { %13 = vsyncpa [#allocation6], 0 }
   0x2   :  { %14 = vsyncpa [#allocation9], 0 }
   0x3   :  { %15 = vsyncpa [#allocation12], 0  ;;  %s34_s26 = sshll.u32 %s10400_s1, 4  ;;  %s35_s26 = int_to_ptr.hbm [resolvable:$true] %s34_s26 }
   0x4   :  { %16 = vsyncpa [#allocation4], 0  ;;  %s9972_s27 = smov [#allocation5]   ;;  %s58_s8 = sshll.u32 %s10402_s3, 4  ;;  %s59_s8 = int_to_ptr.hbm [resolvable:$true] %s58_s8 }
   0x5   :  { %s36_s28 = sshll.u32 %s9972_s27, 4  ;;  %s9973_s9 = smov 512   ;;  %s37_s28 = int_to_ptr.vmem [resolvable:$true] %s36_s28 }
   0x6   :  { %s9974_s10 = smov 32   ;;  %s9975_s11 = smov [#allocation8]  }
   0x7   :  { %42 = dma.hbm_to_vmem [thread:$0]  %s35_s26, 57344, %s37_s28, [#allocation6], %s9973_s9, %s9973_s9, %s9974_s10  }
   0x8   :  { %s60_s12 = sshll.u32 %s9975_s11, 4  ;;  %s9976_s13 = smov 256   ;;  %s61_s12 = int_to_ptr.vmem [resolvable:$true] %s60_s12 }
   0x9   :  { %s9977_s14 = smov 16   ;;  %s82_s16 = sshll.u32 %s10404_s5, 4  ;;  %s83_s16 = int_to_ptr.hbm [resolvable:$true] %s82_s16 }
   0xa   :  { %66 = dma.hbm_to_vmem [thread:$0]  %s59_s8, 32768, %s61_s12, [#allocation9], %s9976_s13, %s9976_s13, %s9977_s14  }
   0xb   :  { %s9978_s17 = smov [#allocation11]   ;;  %s21_s20 = sshll.u32 %s10399_s0, 4  ;;  %s22_s20 = int_to_ptr.hbm [resolvable:$true] %s21_s20 }
   0xc   :  { %s84_s18 = sshll.u32 %s9978_s17, 4  ;;  %s9979_s21 = smov 64   ;;  %s85_s18 = int_to_ptr.vmem [resolvable:$true] %s84_s18 }
   0xd   :  { %s9980_s22 = smov 4   ;;  %s9981_s23 = smov [#allocation2]  }
   0xe   :  { %90 = dma.hbm_to_vmem [thread:$0]  %s83_s16, 4096, %s85_s18, [#allocation12], %s9979_s21, %s9979_s21, %s9980_s22  }
   0xf   :  { %s23_s24 = sshll.u32 %s9981_s23, 4  ;;  %s9982_s25 = smov 448   ;;  %s24_s24 = int_to_ptr.vmem [resolvable:$true] %s23_s24 }
  0x10   :  { %s9983_s26 = smov 28   ;;  %s48_s28 = sshll.u32 %s10401_s2, 4  ;;  %s49_s28 = int_to_ptr.hbm [resolvable:$true] %s48_s28 }
  0x11   :  { %29 = dma.hbm_to_vmem [thread:$0]  %s22_s20, 896, %s24_s24, [#allocation3], %s9982_s25, %s9982_s25, %s9983_s26  }
  0x12   :  { %s9984_s29 = smov [#allocation7]   ;;  %s72_s9 = sshll.u32 %s10403_s4, 4  ;;  %s73_s9 = int_to_ptr.hbm [resolvable:$true] %s72_s9 }
  0x13   :  { %s50_s30 = sshll.u32 %s9984_s29, 4  ;;  %s9985_s10 = smov [#allocation10]   ;;  %s51_s30 = int_to_ptr.vmem [resolvable:$true] %s50_s30 }
  0x14   :  { %53 = dma.hbm_to_vmem [thread:$0]  %s49_s28, 128, %s51_s30, [#allocation6]  }
  0x15   :  { %s74_s11 = sshll.u32 %s9985_s10, 4  ;;  %s96_s14 = sshll.u32 %s10405_s6, 4  ;;  %s75_s11 = int_to_ptr.vmem [resolvable:$true] %s74_s11  ;;  %s97_s14 = int_to_ptr.hbm [resolvable:$true] %s96_s14 }
  0x16   :  { %77 = dma.hbm_to_vmem [thread:$0]  %s73_s9, 64, %s75_s11, [#allocation9]  }
  0x17   :  { %s9986_s2 = smov [#allocation13]  }
  0x18   :  { %s98_s1 = sshll.u32 %s9986_s2, 4  ;;  %s99_s1 = int_to_ptr.vmem [resolvable:$true] %s98_s1 }
  0x19   :  { %101 = dma.hbm_to_vmem [thread:$0]  %s97_s14, 16, %s99_s1, [#allocation12]  }
  0x1a   :  { %9962 = dma.done.wait [#allocation3], 896  }
  0x1b   :  { %9963 = vsyncadd [#allocation3], 4294966400 }
  0x1c   :  { %9964 = dma.done.wait [#allocation6], 57472  }
  0x1d   :  { %9965 = vsyncadd [#allocation6], 4294909824 }
  0x1e   :  { %9966 = dma.done.wait [#allocation9], 32832  }
  0x1f   :  { %9967 = vsyncadd [#allocation9], 4294934464 }
  0x20   :  { %9968 = dma.done.wait [#allocation12], 4112  }
  0x21   :  { %9969 = vsyncadd [#allocation12], 4294963184  ;;  %v6288_v0 = vld [vmem:[#allocation5 + $0x1c0] sm:$0xf]  ;;  %s9987_s4 = smov [#allocation14]   ;;  %s6018_s17 = sshll.u32 %s10406_s7, 4  ;;  %s6019_s17 = int_to_ptr.hbm [resolvable:$true] %s6018_s17 }
  0x22   :  { %v9073_v1 = vld [vmem:[#allocation5 + $0x1dc] sm:$0xf0]  ;;  %s6016_s6 = sshll.u32 %s9987_s4, 4  ;;  %s9988_s18 = smov 128   ;;  %s6017_s6 = int_to_ptr.vmem [resolvable:$true] %s6016_s6 }
  0x23   :  { %v6544_v2 = vld [vmem:[#allocation5 + $0x3c0] sm:$0xf]  ;;  %v6289_v3 = vor.u32 %v9073_v1, %v6288_v0  ;;  %s9989_s19 = smov 8  }
  0x24   :  { %v9137_v4 = vld [vmem:[#allocation5 + $0x3dc] sm:$0xf0] }
  0x25   :  { %v6800_v5 = vld [vmem:[#allocation5 + $0x5c0] sm:$0xf]  ;;  %v6545_v7 = vor.u32 %v9137_v4, %v6544_v2  ;;  %2880 = vmatpush.bf16.msra.mxu0 %v6289_v3 }
  0x26   :  { %v9201_v6 = vld [vmem:[#allocation5 + $0x5dc] sm:$0xf0] }
  0x27   :  { %v6801_v8 = vor.u32 %v9201_v6, %v6800_v5  ;;  %v7056_v9 = vld [vmem:[#allocation5 + $0x7c0] sm:$0xf]  ;;  %2894 = vmatpush.bf16.msra.mxu1 %v6545_v7 }
  0x28   :  { %v9265_v10 = vld [vmem:[#allocation5 + $0x7dc] sm:$0xf0] }
  0x29   :  { %v6256_v11 = vld [vmem:[#allocation5 + $0x180] sm:$0xf]  ;;  %v7057_v12 = vor.u32 %v9265_v10, %v7056_v9  ;;  %2908 = vmatpush.bf16.msra.mxu2 %v6801_v8 }
  0x2a   :  { %v9065_v13 = vld [vmem:[#allocation5 + $0x19c] sm:$0xf0] }
  0x2b   :  { %v6512_v14 = vld [vmem:[#allocation5 + $0x380] sm:$0xf]  ;;  %v6257_v16 = vor.u32 %v9065_v13, %v6256_v11  ;;  %2922 = vmatpush.bf16.msra.mxu3 %v7057_v12 }
  0x2c   :  { %v9129_v15 = vld [vmem:[#allocation5 + $0x39c] sm:$0xf0] }
  0x2d   :  { %v6513_v17 = vor.u32 %v9129_v15, %v6512_v14  ;;  %v6768_v18 = vld [vmem:[#allocation5 + $0x580] sm:$0xf]  ;;  %2881 = vmatpush.bf16.msra.mxu0 %v6257_v16 }
  0x2e   :  { %v9193_v19 = vld [vmem:[#allocation5 + $0x59c] sm:$0xf0] }
  0x2f   :  { %v7024_v20 = vld [vmem:[#allocation5 + $0x780] sm:$0xf]  ;;  %v6769_v21 = vor.u32 %v9193_v19, %v6768_v18  ;;  %2895 = vmatpush.bf16.msra.mxu1 %v6513_v17 }
  0x30   :  { %v9257_v22 = vld [vmem:[#allocation5 + $0x79c] sm:$0xf0] }
  0x31   :  { %v6224_v23 = vld [vmem:[#allocation5 + $0x140] sm:$0xf]  ;;  %v7025_v25 = vor.u32 %v9257_v22, %v7024_v20  ;;  %2909 = vmatpush.bf16.msra.mxu2 %v6769_v21 }
  0x32   :  { %v9057_v24 = vld [vmem:[#allocation5 + $0x15c] sm:$0xf0] }
  0x33   :  { %v6480_v26 = vld [vmem:[#allocation5 + $0x340] sm:$0xf]  ;;  %v6225_v29 = vor.u32 %v9057_v24, %v6224_v23  ;;  %2923 = vmatpush.bf16.msra.mxu3 %v7025_v25 }
  0x34   :  { %v9121_v27 = vld [vmem:[#allocation5 + $0x35c] sm:$0xf0] }
  0x35   :  { %v6736_v28 = vld [vmem:[#allocation5 + $0x540] sm:$0xf]  ;;  %v6481_v33 = vor.u32 %v9121_v27, %v6480_v26  ;;  %2882 = vmatpush.bf16.msra.mxu0 %v6225_v29 }
  0x36   :  { %v9185_v30 = vld [vmem:[#allocation5 + $0x55c] sm:$0xf0] }
  0x37   :  { %v6992_v31 = vld [vmem:[#allocation5 + $0x740] sm:$0xf]  ;;  %v6737_v34 = vor.u32 %v9185_v30, %v6736_v28  ;;  %2896 = vmatpush.bf16.msra.mxu1 %v6481_v33 }
  0x38   :  { %v9249_v32 = vld [vmem:[#allocation5 + $0x75c] sm:$0xf0] }
  0x39   :  { %v6192_v35 = vld [vmem:[#allocation5 + $0x100] sm:$0xf]  ;;  %v6993_v38 = vor.u32 %v9249_v32, %v6992_v31  ;;  %2910 = vmatpush.bf16.msra.mxu2 %v6737_v34 }
  0x3a   :  { %v9049_v36 = vld [vmem:[#allocation5 + $0x11c] sm:$0xf0] }
  0x3b   :  { %v6448_v37 = vld [vmem:[#allocation5 + $0x300] sm:$0xf]  ;;  %v6193_v44 = vor.u32 %v9049_v36, %v6192_v35  ;;  %2924 = vmatpush.bf16.msra.mxu3 %v6993_v38  ;;  %v6290_v38 = vld [vmem:[#allocation5 + $0x1e0] sm:$0xf0] }
  0x3c   :  { %v9113_v39 = vld [vmem:[#allocation5 + $0x31c] sm:$0xf0] }
  0x3d   :  { %v6704_v40 = vld [vmem:[#allocation5 + $0x500] sm:$0xf]  ;;  %v6449_v45 = vor.u32 %v9113_v39, %v6448_v37  ;;  %2883 = vmatpush.bf16.msra.mxu0 %v6193_v44  ;;  %v9069_v37 = vld [vmem:[#allocation5 + $0x1c4] sm:$0xf] }
  0x3e   :  { %v9177_v41 = vld [vmem:[#allocation5 + $0x51c] sm:$0xf0] }
  0x3f   :  { %v6960_v42 = vld [vmem:[#allocation5 + $0x700] sm:$0xf]  ;;  %v6705_v46 = vor.u32 %v9177_v41, %v6704_v40  ;;  %2897 = vmatpush.bf16.msra.mxu1 %v6449_v45 }
  0x40   :  { %v9241_v43 = vld [vmem:[#allocation5 + $0x71c] sm:$0xf0] }
  0x41   :  { %v6160_v47 = vld [vmem:[#allocation5 + $0xc0] sm:$0xf]  ;;  %v6961_v50 = vor.u32 %v9241_v43, %v6960_v42  ;;  %2911 = vmatpush.bf16.msra.mxu2 %v6705_v46 }
  0x42   :  { %v9041_v48 = vld [vmem:[#allocation5 + $0xdc] sm:$0xf0] }
  0x43   :  { %v6416_v49 = vld [vmem:[#allocation5 + $0x2c0] sm:$0xf]  ;;  %v6161_v56 = vor.u32 %v9041_v48, %v6160_v47  ;;  %2925 = vmatpush.bf16.msra.mxu3 %v6961_v50  ;;  %v6293_v48 = vor.u32 %v9069_v37, %v6290_v38  ;;  %v9061_v50 = vld [vmem:[#allocation5 + $0x184] sm:$0xf] }
  0x44   :  { %v9105_v51 = vld [vmem:[#allocation5 + $0x2dc] sm:$0xf0] }
  0x45   :  { %v6672_v52 = vld [vmem:[#allocation5 + $0x4c0] sm:$0xf]  ;;  %v6417_v57 = vor.u32 %v9105_v51, %v6416_v49  ;;  %2884 = vmatpush.bf16.msra.mxu0 %v6161_v56  ;;  %v6258_v51 = vld [vmem:[#allocation5 + $0x1a0] sm:$0xf0] }
  0x46   :  { %v9169_v53 = vld [vmem:[#allocation5 + $0x4dc] sm:$0xf0] }
  0x47   :  { %v6928_v54 = vld [vmem:[#allocation5 + $0x6c0] sm:$0xf]  ;;  %v6673_v58 = vor.u32 %v9169_v53, %v6672_v52  ;;  %2898 = vmatpush.bf16.msra.mxu1 %v6417_v57  ;;  %v6036_v52 = vld [vmem:[#allocation2] sm:$0xf]  ;;  %v9009_v53 = vld [vmem:[#allocation2 + $0x18] sm:$0xf0] }
  0x48   :  { %v9233_v55 = vld [vmem:[#allocation5 + $0x6dc] sm:$0xf0]  ;;  %v10051_v57 = vor.u32 %v9009_v53, %v6036_v52 }
  0x49   :  { %v6128_v59 = vld [vmem:[#allocation5 + $0x80] sm:$0xf]  ;;  %v6929_v62 = vor.u32 %v9233_v55, %v6928_v54  ;;  %2912 = vmatpush.bf16.msra.mxu2 %v6673_v58  ;;  %v6044_v54 = vld [vmem:[#allocation2 + $0x8] sm:$0xf]  ;;  %v9010_v58 = vld [vmem:[#allocation2 + $0x20] sm:$0xf0] }
  0x4a   :  { %v9033_v60 = vld [vmem:[#allocation5 + $0x9c] sm:$0xf0] }
  0x4b   :  { %v6384_v61 = vld [vmem:[#allocation5 + $0x280] sm:$0xf]  ;;  %v6129_v4 = vor.u32 %v9033_v60, %v6128_v59  ;;  %2926 = vmatpush.bf16.msra.mxu3 %v6929_v62 }
  0x4c   :  { %v9097_v63 = vld [vmem:[#allocation5 + $0x29c] sm:$0xf0] }
  0x4d   :  { %v6640_v0 = vld [vmem:[#allocation5 + $0x480] sm:$0xf]  ;;  %v6385_v5 = vor.u32 %v9097_v63, %v6384_v61  ;;  %2885 = vmatpush.bf16.msra.mxu0 %v6129_v4  ;;  %v9053_v4 = vld [vmem:[#allocation5 + $0x144] sm:$0xf] }
  0x4e   :  { %v9161_v1 = vld [vmem:[#allocation5 + $0x49c] sm:$0xf0] }
  0x4f   :  { %v6896_v2 = vld [vmem:[#allocation5 + $0x680] sm:$0xf]  ;;  %v6641_v6 = vor.u32 %v9161_v1, %v6640_v0  ;;  %2899 = vmatpush.bf16.msra.mxu1 %v6385_v5  ;;  %v10053_v0 = vor.u32 %v9010_v58, %v6044_v54  ;;  %v6261_v1 = vor.u32 %v9061_v50, %v6258_v51  ;;  %v6226_v5 = vld [vmem:[#allocation5 + $0x160] sm:$0xf0] }
  0x50   :  { %v9225_v3 = vld [vmem:[#allocation5 + $0x69c] sm:$0xf0] }
  0x51   :  { %v6096_v7 = vld [vmem:[#allocation5 + $0x40] sm:$0xf]  ;;  %v6897_v10 = vor.u32 %v9225_v3, %v6896_v2  ;;  %2913 = vmatpush.bf16.msra.mxu2 %v6641_v6  ;;  %v9006_v6 = vld [vmem:[#allocation2 + $0x4] sm:$0xf] }
  0x52   :  { %v9025_v8 = vld [vmem:[#allocation5 + $0x5c] sm:$0xf0] }
  0x53   :  { %v6352_v9 = vld [vmem:[#allocation5 + $0x240] sm:$0xf]  ;;  %v6097_v16 = vor.u32 %v9025_v8, %v6096_v7  ;;  %2927 = vmatpush.bf16.msra.mxu3 %v6897_v10  ;;  %v6038_v7 = vld [vmem:[#allocation2 + $0x1c] sm:$0xf0] }
  0x54   :  { %v9089_v11 = vld [vmem:[#allocation5 + $0x25c] sm:$0xf0] }
  0x55   :  { %v6608_v12 = vld [vmem:[#allocation5 + $0x440] sm:$0xf]  ;;  %v6353_v19 = vor.u32 %v9089_v11, %v6352_v9  ;;  %2886 = vmatpush.bf16.msra.mxu0 %v6097_v16  ;;  %v10057_v11 = vor.u32 %v9006_v6, %v6038_v7  ;;  %v9013_v7 = vld [vmem:[#allocation5 + $0x4] sm:$0xf] }
  0x56   :  { %v9153_v13 = vld [vmem:[#allocation5 + $0x45c] sm:$0xf0] }
  0x57   :  { %v6864_v14 = vld [vmem:[#allocation5 + $0x640] sm:$0xf]  ;;  %v6609_v20 = vor.u32 %v9153_v13, %v6608_v12  ;;  %2900 = vmatpush.bf16.msra.mxu1 %v6353_v19  ;;  %v9007_v19 = vld [vmem:[#allocation2 + $0xc] sm:$0xf] }
  0x58   :  { %v9217_v15 = vld [vmem:[#allocation5 + $0x65c] sm:$0xf0] }
  0x59   :  { %v6064_v17 = vld [vmem:[#allocation5] sm:$0xf]  ;;  %v6865_v24 = vor.u32 %v9217_v15, %v6864_v14  ;;  %2914 = vmatpush.bf16.msra.mxu2 %v6609_v20  ;;  %v6046_v20 = vld [vmem:[#allocation2 + $0x24] sm:$0xf0] }
  0x5a   :  { %v9017_v18 = vld [vmem:[#allocation5 + $0x1c] sm:$0xf0] }
  0x5b   :  { %v6320_v21 = vld [vmem:[#allocation5 + $0x200] sm:$0xf]  ;;  %v6065_v31 = vor.u32 %v9017_v18, %v6064_v17  ;;  %2928 = vmatpush.bf16.msra.mxu3 %v6865_v24  ;;  %v6229_v17 = vor.u32 %v9053_v4, %v6226_v5 }
  0x5c   :  { %v9081_v22 = vld [vmem:[#allocation5 + $0x21c] sm:$0xf0] }
  0x5d   :  { %v6576_v23 = vld [vmem:[#allocation5 + $0x400] sm:$0xf]  ;;  %v6321_v35 = vor.u32 %v9081_v22, %v6320_v21  ;;  %2887 = vmatpush.bf16.msra.mxu0 %v6065_v31  ;;  %v9045_v21 = vld [vmem:[#allocation5 + $0x104] sm:$0xf] }
  0x5e   :  { %v9145_v25 = vld [vmem:[#allocation5 + $0x41c] sm:$0xf0]  ;;  %v6194_v22 = vld [vmem:[#allocation5 + $0x120] sm:$0xf0] }
  0x5f   :  { %v6832_v26 = vld [vmem:[#allocation5 + $0x600] sm:$0xf]  ;;  %v6577_v36 = vor.u32 %v9145_v25, %v6576_v23  ;;  %2901 = vmatpush.bf16.msra.mxu1 %v6321_v35  ;;  %v10060_v23 = vor.u32 %v9007_v19, %v6046_v20  ;;  %v6162_v35 = vld [vmem:[#allocation5 + $0xe0] sm:$0xf0] }
  0x60   :  { %v9209_v27 = vld [vmem:[#allocation5 + $0x61c] sm:$0xf0]  ;;  %2888 = vmatmul.bf16.vlgmr.msra.gmra.mxu0 %v10051_v57  ;;  %v7314_v19 = vld [vmem:[#allocation5 + $0x9e0] sm:$0xf0] }
  0x61   :  { %v7312_v28 = vld [vmem:[#allocation5 + $0x9c0] sm:$0xf]  ;;  %v6833_v39 = vor.u32 %v9209_v27, %v6832_v26  ;;  %2915 = vmatpush.bf16.msra.mxu2 %v6577_v36 }
  0x62   :  { %v9329_v29 = vld [vmem:[#allocation5 + $0x9dc] sm:$0xf0]  ;;  %2902 = vmatmul.bf16.vlgmr.msra.gmra.mxu1 %v10057_v11 }
  0x63   :  { %v7568_v30 = vld [vmem:[#allocation5 + $0xbc0] sm:$0xf]  ;;  %v7313_v40 = vor.u32 %v9329_v29, %v7312_v28  ;;  %2929 = vmatpush.bf16.msra.mxu3 %v6833_v39 }
  0x64   :  { %v9393_v32 = vld [vmem:[#allocation5 + $0xbdc] sm:$0xf0]  ;;  %2916 = vmatmul.bf16.vlgmr.msra.gmra.mxu2 %v10053_v0 }
  0x65   :  { %v7824_v33 = vld [vmem:[#allocation5 + $0xdc0] sm:$0xf]  ;;  %v7569_v43 = vor.u32 %v9393_v32, %v7568_v30  ;;  %2936 = vmatpush.bf16.msrb.mxu0 %v7313_v40  ;;  %v6197_v30 = vor.u32 %v9045_v21, %v6194_v22  ;;  %v6052_v22 = vld [vmem:[#allocation2 + $0x10] sm:$0xf] }
  0x66   :  { %v9457_v34 = vld [vmem:[#allocation5 + $0xddc] sm:$0xf0]  ;;  %2930 = vmatmul.bf16.vlgmr.msra.gmra.mxu3 %v10060_v23 }
  0x67   :  { %v7280_v41 = vld [vmem:[#allocation5 + $0x980] sm:$0xf]  ;;  %v7825_v44 = vor.u32 %v9457_v34, %v7824_v33  ;;  %2950 = vmatpush.bf16.msrb.mxu1 %v7569_v43  ;;  %2978 = vmatpush.bf16.msrb.mxu3 %v6293_v48  ;;  %v9037_v34 = vld [vmem:[#allocation5 + $0xc4] sm:$0xf] }
  0x68   :  { %v9321_v42 = vld [vmem:[#allocation5 + $0x99c] sm:$0xf0] }
  0x69   :  { %v7536_v45 = vld [vmem:[#allocation5 + $0xb80] sm:$0xf]  ;;  %v7281_v55 = vor.u32 %v9321_v42, %v7280_v41  ;;  %2964 = vmatpush.bf16.msrb.mxu2 %v7825_v44  ;;  %v6165_v42 = vor.u32 %v9037_v34, %v6162_v35  ;;  %v6514_v34 = vld [vmem:[#allocation5 + $0x3a0] sm:$0xf0] }
  0x6a   :  { %v9385_v46 = vld [vmem:[#allocation5 + $0xb9c] sm:$0xf0]  ;;  %v9189_v35 = vld [vmem:[#allocation5 + $0x584] sm:$0xf] }
  0x6b   :  { %v7792_v47 = vld [vmem:[#allocation5 + $0xd80] sm:$0xf]  ;;  %v7537_v59 = vor.u32 %v9385_v46, %v7536_v45  ;;  %2937 = vmatpush.bf16.msrb.mxu0 %v7281_v55  ;;  %2979 = vmatpush.bf16.msrb.mxu3 %v6261_v1  ;;  %v9029_v46 = vld [vmem:[#allocation5 + $0x84] sm:$0xf] }
  0x6c   :  { %v9449_v49 = vld [vmem:[#allocation5 + $0xd9c] sm:$0xf0] }
  0x6d   :  { %v7248_v56 = vld [vmem:[#allocation5 + $0x940] sm:$0xf]  ;;  %v7793_v60 = vor.u32 %v9449_v49, %v7792_v47  ;;  %2951 = vmatpush.bf16.msrb.mxu1 %v7537_v59  ;;  %v6130_v47 = vld [vmem:[#allocation5 + $0xa0] sm:$0xf0] }
  0x6e   :  { %v9313_v61 = vld [vmem:[#allocation5 + $0x95c] sm:$0xf0]  ;;  %v6133_v54 = vor.u32 %v9029_v46, %v6130_v47  ;;  %v9021_v59 = vld [vmem:[#allocation5 + $0x44] sm:$0xf] }
  0x6f   :  { %v7504_v62 = vld [vmem:[#allocation5 + $0xb40] sm:$0xf]  ;;  %v7249_v8 = vor.u32 %v9313_v61, %v7248_v56  ;;  %2965 = vmatpush.bf16.msrb.mxu2 %v7793_v60  ;;  %2980 = vmatpush.bf16.msrb.mxu3 %v6229_v17  ;;  %v6098_v60 = vld [vmem:[#allocation5 + $0x60] sm:$0xf0] }
  0x70   :  { %v9377_v63 = vld [vmem:[#allocation5 + $0xb5c] sm:$0xf0]  ;;  %v7058_v17 = vld [vmem:[#allocation5 + $0x7e0] sm:$0xf0] }
  0x71   :  { %v7760_v2 = vld [vmem:[#allocation5 + $0xd40] sm:$0xf]  ;;  %v7505_v12 = vor.u32 %v9377_v63, %v7504_v62  ;;  %2938 = vmatpush.bf16.msrb.mxu0 %v7249_v8  ;;  %v6101_v8 = vor.u32 %v9021_v59, %v6098_v60 }
  0x72   :  { %v9441_v3 = vld [vmem:[#allocation5 + $0xd5c] sm:$0xf0] }
  0x73   :  { %v7216_v9 = vld [vmem:[#allocation5 + $0x900] sm:$0xf]  ;;  %v7761_v13 = vor.u32 %v9441_v3, %v7760_v2  ;;  %2952 = vmatpush.bf16.msrb.mxu1 %v7505_v12  ;;  %2981 = vmatpush.bf16.msrb.mxu3 %v6197_v30  ;;  %v6546_v12 = vld [vmem:[#allocation5 + $0x3e0] sm:$0xf0]  ;;  %v6054_v30 = vld [vmem:[#allocation2 + $0x2c] sm:$0xf0] }
  0x74   :  { %v9305_v10 = vld [vmem:[#allocation5 + $0x91c] sm:$0xf0] }
  0x75   :  { %v7472_v14 = vld [vmem:[#allocation5 + $0xb00] sm:$0xf]  ;;  %v7217_v24 = vor.u32 %v9305_v10, %v7216_v9  ;;  %2966 = vmatpush.bf16.msrb.mxu2 %v7761_v13  ;;  %v6066_v9 = vld [vmem:[#allocation5 + $0x20] sm:$0xf0] }
  0x76   :  { %v9369_v15 = vld [vmem:[#allocation5 + $0xb1c] sm:$0xf0]  ;;  %v9133_v10 = vld [vmem:[#allocation5 + $0x3c4] sm:$0xf] }
  0x77   :  { %v7728_v16 = vld [vmem:[#allocation5 + $0xd00] sm:$0xf]  ;;  %v7473_v25 = vor.u32 %v9369_v15, %v7472_v14  ;;  %2939 = vmatpush.bf16.msrb.mxu0 %v7217_v24  ;;  %2982 = vmatpush.bf16.msrb.mxu3 %v6165_v42  ;;  %v9197_v13 = vld [vmem:[#allocation5 + $0x5c4] sm:$0xf]  ;;  %v9011_v24 = vld [vmem:[#allocation2 + $0x28] sm:$0xf0] }
  0x78   :  { %v9433_v18 = vld [vmem:[#allocation5 + $0xd1c] sm:$0xf0]  ;;  %v6802_v14 = vld [vmem:[#allocation5 + $0x5e0] sm:$0xf0] }
  0x79   :  { %v7729_v26 = vor.u32 %v9433_v18, %v7728_v16  ;;  %v7184_v27 = vld [vmem:[#allocation5 + $0x8c0] sm:$0xf]  ;;  %2953 = vmatpush.bf16.msrb.mxu1 %v7473_v25  ;;  %v9261_v15 = vld [vmem:[#allocation5 + $0x7c4] sm:$0xf] }
  0x7a   :  { %v9297_v28 = vld [vmem:[#allocation5 + $0x8dc] sm:$0xf0]  ;;  %v9325_v18 = vld [vmem:[#allocation5 + $0x9c4] sm:$0xf] }
  0x7b   :  { %v7440_v29 = vld [vmem:[#allocation5 + $0xac0] sm:$0xf]  ;;  %v7185_v36 = vor.u32 %v9297_v28, %v7184_v27  ;;  %2967 = vmatpush.bf16.msrb.mxu2 %v7729_v26  ;;  %2983 = vmatpush.bf16.msrb.mxu3 %v6133_v54  ;;  %v6069_v26 = vor.u32 %v9013_v7, %v6066_v9  ;;  %v6549_v27 = vor.u32 %v9133_v10, %v6546_v12  ;;  %v9012_v28 = vld [vmem:[#allocation2 + $0x30] sm:$0xf0]  ;;  %v6994_v54 = vld [vmem:[#allocation5 + $0x760] sm:$0xf0] }
  0x7c   :  { %v9361_v31 = vld [vmem:[#allocation5 + $0xadc] sm:$0xf0]  ;;  %v9101_v10 = vld [vmem:[#allocation5 + $0x2c4] sm:$0xf] }
  0x7d   :  { %v7696_v32 = vld [vmem:[#allocation5 + $0xcc0] sm:$0xf]  ;;  %v7441_v37 = vor.u32 %v9361_v31, %v7440_v29  ;;  %2940 = vmatpush.bf16.msrb.mxu0 %v7185_v36  ;;  %v9008_v29 = vld [vmem:[#allocation2 + $0x14] sm:$0xf]  ;;  %v6805_v31 = vor.u32 %v9197_v13, %v6802_v14  ;;  %v7317_v36 = vor.u32 %v9325_v18, %v7314_v19  ;;  %v6418_v12 = vld [vmem:[#allocation5 + $0x2e0] sm:$0xf0] }
  0x7e   :  { %v9425_v33 = vld [vmem:[#allocation5 + $0xcdc] sm:$0xf0]  ;;  %v10067_v42 = vor.u32 %v9008_v29, %v6054_v30  ;;  %v9165_v13 = vld [vmem:[#allocation5 + $0x4c4] sm:$0xf] }
  0x7f   :  { %v7697_v38 = vor.u32 %v9425_v33, %v7696_v32  ;;  %v7152_v39 = vld [vmem:[#allocation5 + $0x880] sm:$0xf]  ;;  %2954 = vmatpush.bf16.msrb.mxu1 %v7441_v37  ;;  %2984 = vmatpush.bf16.msrb.mxu3 %v6101_v8  ;;  %v7061_v32 = vor.u32 %v9261_v15, %v7058_v17  ;;  %v9125_v33 = vld [vmem:[#allocation5 + $0x384] sm:$0xf]  ;;  %v10063_v37 = vor.u32 %v9011_v24, %v6052_v22 }
  0x80   :  { %v9289_v40 = vld [vmem:[#allocation5 + $0x89c] sm:$0xf0]  ;;  %v6674_v15 = vld [vmem:[#allocation5 + $0x4e0] sm:$0xf0] }
  0x81   :  { %v7408_v41 = vld [vmem:[#allocation5 + $0xa80] sm:$0xf]  ;;  %v7153_v48 = vor.u32 %v9289_v40, %v7152_v39  ;;  %2968 = vmatpush.bf16.msrb.mxu2 %v7697_v38  ;;  %v6770_v38 = vld [vmem:[#allocation5 + $0x5a0] sm:$0xf0] }
  0x82   :  { %v9353_v43 = vld [vmem:[#allocation5 + $0xa9c] sm:$0xf0]  ;;  %v9253_v39 = vld [vmem:[#allocation5 + $0x784] sm:$0xf]  ;;  %v6773_v46 = vor.u32 %v9189_v35, %v6770_v38 }
  0x83   :  { %v7664_v44 = vld [vmem:[#allocation5 + $0xc80] sm:$0xf]  ;;  %v7409_v49 = vor.u32 %v9353_v43, %v7408_v41  ;;  %2941 = vmatpush.bf16.msrb.mxu0 %v7153_v48  ;;  %v7026_v40 = vld [vmem:[#allocation5 + $0x7a0] sm:$0xf0]  ;;  %2985 = vmatpush.bf16.msrb.mxu3 %v6069_v26 }
  0x84   :  { %v9417_v45 = vld [vmem:[#allocation5 + $0xc9c] sm:$0xf0]  ;;  %v9317_v43 = vld [vmem:[#allocation5 + $0x984] sm:$0xf]  ;;  %v7029_v47 = vor.u32 %v9253_v39, %v7026_v40 }
  0x85   :  { %v7665_v50 = vor.u32 %v9417_v45, %v7664_v44  ;;  %v7120_v51 = vld [vmem:[#allocation5 + $0x840] sm:$0xf]  ;;  %2955 = vmatpush.bf16.msrb.mxu1 %v7409_v49  ;;  %v7282_v44 = vld [vmem:[#allocation5 + $0x9a0] sm:$0xf0]  ;;  %v6517_v45 = vor.u32 %v9125_v33, %v6514_v34 }
  0x86   :  { %v9281_v52 = vld [vmem:[#allocation5 + $0x85c] sm:$0xf0]  ;;  %v9117_v48 = vld [vmem:[#allocation5 + $0x344] sm:$0xf]  ;;  %2986 = vmatmul.bf16.vlgmr.msrb.gmra.mxu3 %v10051_v57 }
  0x87   :  { %v7376_v53 = vld [vmem:[#allocation5 + $0xa40] sm:$0xf]  ;;  %v7121_v62 = vor.u32 %v9281_v52, %v7120_v51  ;;  %2969 = vmatpush.bf16.msrb.mxu2 %v7665_v50  ;;  %v6482_v49 = vld [vmem:[#allocation5 + $0x360] sm:$0xf0]  ;;  %3034 = vmatpush.bf16.msra.mxu3 %v7317_v36  ;;  %v7285_v51 = vor.u32 %v9317_v43, %v7282_v44 }
  0x88   :  { %v9345_v55 = vld [vmem:[#allocation5 + $0xa5c] sm:$0xf0]  ;;  %v9181_v50 = vld [vmem:[#allocation5 + $0x544] sm:$0xf] }
  0x89   :  { %v7632_v56 = vld [vmem:[#allocation5 + $0xc40] sm:$0xf]  ;;  %v7377_v3 = vor.u32 %v9345_v55, %v7376_v53  ;;  %2942 = vmatpush.bf16.msrb.mxu0 %v7121_v62  ;;  %v6738_v52 = vld [vmem:[#allocation5 + $0x560] sm:$0xf0] }
  0x8a   :  { %v9409_v58 = vld [vmem:[#allocation5 + $0xc5c] sm:$0xf0]  ;;  %v9245_v53 = vld [vmem:[#allocation5 + $0x744] sm:$0xf]  ;;  %v6741_v59 = vor.u32 %v9181_v50, %v6738_v52 }
  0x8b   :  { %v7088_v61 = vld [vmem:[#allocation5 + $0x800] sm:$0xf]  ;;  %v7633_v4 = vor.u32 %v9409_v58, %v7632_v56  ;;  %2956 = vmatpush.bf16.msrb.mxu1 %v7377_v3  ;;  %v9309_v55 = vld [vmem:[#allocation5 + $0x944] sm:$0xf]  ;;  %v6485_v58 = vor.u32 %v9117_v48, %v6482_v49  ;;  %v6997_v60 = vor.u32 %v9245_v53, %v6994_v54  ;;  %3035 = vmatpush.bf16.msra.mxu3 %v7285_v51 }
  0x8c   :  { %v9273_v63 = vld [vmem:[#allocation5 + $0x81c] sm:$0xf0]  ;;  %v7250_v56 = vld [vmem:[#allocation5 + $0x960] sm:$0xf0] }
  0x8d   :  { %v7344_v1 = vld [vmem:[#allocation5 + $0xa00] sm:$0xf]  ;;  %v7089_v16 = vor.u32 %v9273_v63, %v7088_v61  ;;  %2970 = vmatpush.bf16.msrb.mxu2 %v7633_v4  ;;  %v9109_v61 = vld [vmem:[#allocation5 + $0x304] sm:$0xf] }
  0x8e   :  { %v9337_v2 = vld [vmem:[#allocation5 + $0xa1c] sm:$0xf0]  ;;  %v6450_v62 = vld [vmem:[#allocation5 + $0x320] sm:$0xf0] }
  0x8f   :  { %v7600_v5 = vld [vmem:[#allocation5 + $0xc00] sm:$0xf]  ;;  %v7345_v20 = vor.u32 %v9337_v2, %v7344_v1  ;;  %2943 = vmatpush.bf16.msrb.mxu0 %v7089_v16  ;;  %v9173_v63 = vld [vmem:[#allocation5 + $0x504] sm:$0xf]  ;;  %v7253_v1 = vor.u32 %v9309_v55, %v7250_v56  ;;  %v6453_v7 = vor.u32 %v9109_v61, %v6450_v62 }
  0x90   :  { %v9401_v6 = vld [vmem:[#allocation5 + $0xc1c] sm:$0xf0]  ;;  %v6706_v2 = vld [vmem:[#allocation5 + $0x520] sm:$0xf0] }
  0x91   :  { %v7601_v21 = vor.u32 %v9401_v6, %v7600_v5  ;;  %v6060_v25 = vld [vmem:[#allocation2 + $0x18] sm:$0xf]  ;;  %2957 = vmatpush.bf16.msrb.mxu1 %v7345_v20  ;;  %v9237_v3 = vld [vmem:[#allocation5 + $0x704] sm:$0xf]  ;;  %v6709_v8 = vor.u32 %v9173_v63, %v6706_v2  ;;  %3036 = vmatpush.bf16.msra.mxu3 %v7253_v1  ;;  %v6421_v20 = vor.u32 %v9101_v10, %v6418_v12 }
  0x92   :  { %v10065_v41 = vor.u32 %v9012_v28, %v6060_v25  ;;  %2944 = vmatmul.bf16.vlgmr.msrb.gmra.mxu0 %v10063_v37  ;;  %v6962_v4 = vld [vmem:[#allocation5 + $0x720] sm:$0xf0] }
  0x93   :  { %2971 = vmatpush.bf16.msrb.mxu2 %v7601_v21  ;;  %2992 = vmatpush.bf16.msra.mxu0 %v6549_v27  ;;  %v9301_v5 = vld [vmem:[#allocation5 + $0x904] sm:$0xf]  ;;  %v6965_v9 = vor.u32 %v9237_v3, %v6962_v4  ;;  %v6677_v21 = vor.u32 %v9165_v13, %v6674_v15  ;;  %v6296_v3 = vld [vmem:[#allocation5 + $0x1c8] sm:$0xf] }
  0x94   :  { %2958 = vmatmul.bf16.vlgmr.msrb.gmra.mxu1 %v10067_v42  ;;  %v7218_v6 = vld [vmem:[#allocation5 + $0x920] sm:$0xf0]  ;;  %v9074_v4 = vld [vmem:[#allocation5 + $0x1e4] sm:$0xf0] }
  0x95   :  { %3006 = vmatpush.bf16.msra.mxu1 %v6805_v31  ;;  %v7221_v14 = vor.u32 %v9301_v5, %v7218_v6  ;;  %v9229_v16 = vld [vmem:[#allocation5 + $0x6c4] sm:$0xf]  ;;  %v6297_v13 = vor.u32 %v9074_v4, %v6296_v3 }
  0x96   :  { %2972 = vmatmul.bf16.vlgmr.msrb.gmra.mxu2 %v10065_v41  ;;  %v6930_v17 = vld [vmem:[#allocation5 + $0x6e0] sm:$0xf0] }
  0x97   :  { %3020 = vmatpush.bf16.msra.mxu2 %v7061_v32  ;;  %2993 = vmatpush.bf16.msra.mxu0 %v6517_v45  ;;  %v9293_v18 = vld [vmem:[#allocation5 + $0x8c4] sm:$0xf]  ;;  %v6933_v22 = vor.u32 %v9229_v16, %v6930_v17 }
  0x98   :  { %v7186_v19 = vld [vmem:[#allocation5 + $0x8e0] sm:$0xf0]  ;;  %3037 = vmatpush.bf16.msra.mxu3 %v7221_v14 }
  0x99   :  { %3007 = vmatpush.bf16.msra.mxu1 %v6773_v46  ;;  %v9093_v24 = vld [vmem:[#allocation5 + $0x284] sm:$0xf]  ;;  %v7189_v27 = vor.u32 %v9293_v18, %v7186_v19  ;;  %v6264_v19 = vld [vmem:[#allocation5 + $0x188] sm:$0xf] }
  0x9a   :  { %v6386_v25 = vld [vmem:[#allocation5 + $0x2a0] sm:$0xf0] }
  0x9b   :  { %3021 = vmatpush.bf16.msra.mxu2 %v7029_v47  ;;  %2994 = vmatpush.bf16.msra.mxu0 %v6485_v58  ;;  %v9157_v26 = vld [vmem:[#allocation5 + $0x484] sm:$0xf]  ;;  %v6389_v33 = vor.u32 %v9093_v24, %v6386_v25 }
  0x9c   :  { %v6642_v28 = vld [vmem:[#allocation5 + $0x4a0] sm:$0xf0]  ;;  %3038 = vmatpush.bf16.msra.mxu3 %v7189_v27 }
  0x9d   :  { %3008 = vmatpush.bf16.msra.mxu1 %v6741_v59  ;;  %v9221_v29 = vld [vmem:[#allocation5 + $0x684] sm:$0xf]  ;;  %v6645_v34 = vor.u32 %v9157_v26, %v6642_v28 }
  0x9e   :  { %v6898_v30 = vld [vmem:[#allocation5 + $0x6a0] sm:$0xf0] }
  0x9f   :  { %3022 = vmatpush.bf16.msra.mxu2 %v6997_v60  ;;  %2995 = vmatpush.bf16.msra.mxu0 %v6453_v7  ;;  %v9285_v31 = vld [vmem:[#allocation5 + $0x884] sm:$0xf]  ;;  %v6901_v35 = vor.u32 %v9221_v29, %v6898_v30  ;;  %v6552_v7 = vld [vmem:[#allocation5 + $0x3c8] sm:$0xf] }
  0xa0   :  { %v7154_v32 = vld [vmem:[#allocation5 + $0x8a0] sm:$0xf0] }
  0xa1   :  { %3009 = vmatpush.bf16.msra.mxu1 %v6709_v8  ;;  %v9085_v36 = vld [vmem:[#allocation5 + $0x244] sm:$0xf]  ;;  %v7157_v40 = vor.u32 %v9285_v31, %v7154_v32  ;;  %v9138_v8 = vld [vmem:[#allocation5 + $0x3e4] sm:$0xf0] }
  0xa2   :  { %v6354_v38 = vld [vmem:[#allocation5 + $0x260] sm:$0xf0]  ;;  %v6553_v17 = vor.u32 %v9138_v8, %v6552_v7  ;;  %v6232_v32 = vld [vmem:[#allocation5 + $0x148] sm:$0xf] }
  0xa3   :  { %3023 = vmatpush.bf16.msra.mxu2 %v6965_v9  ;;  %2996 = vmatpush.bf16.msra.mxu0 %v6421_v20  ;;  %v9149_v39 = vld [vmem:[#allocation5 + $0x444] sm:$0xf]  ;;  %v6357_v48 = vor.u32 %v9085_v36, %v6354_v38  ;;  %v9066_v20 = vld [vmem:[#allocation5 + $0x1a4] sm:$0xf0] }
  0xa4   :  { %v6610_v43 = vld [vmem:[#allocation5 + $0x460] sm:$0xf0]  ;;  %3039 = vmatpush.bf16.msra.mxu3 %v7157_v40  ;;  %v6265_v26 = vor.u32 %v9066_v20, %v6264_v19 }
  0xa5   :  { %3010 = vmatpush.bf16.msra.mxu1 %v6677_v21  ;;  %v9213_v44 = vld [vmem:[#allocation5 + $0x644] sm:$0xf]  ;;  %v6613_v51 = vor.u32 %v9149_v39, %v6610_v43  ;;  %v6520_v21 = vld [vmem:[#allocation5 + $0x388] sm:$0xf] }
  0xa6   :  { %v6866_v45 = vld [vmem:[#allocation5 + $0x660] sm:$0xf0] }
  0xa7   :  { %3024 = vmatpush.bf16.msra.mxu2 %v6933_v22  ;;  %v9277_v46 = vld [vmem:[#allocation5 + $0x844] sm:$0xf]  ;;  %2997 = vmatpush.bf16.msra.mxu0 %v6389_v33  ;;  %v6869_v52 = vor.u32 %v9213_v44, %v6866_v45  ;;  %v9130_v22 = vld [vmem:[#allocation5 + $0x3a4] sm:$0xf0] }
  0xa8   :  { %v7122_v47 = vld [vmem:[#allocation5 + $0x860] sm:$0xf0]  ;;  %v6521_v30 = vor.u32 %v9130_v22, %v6520_v21  ;;  %v9058_v33 = vld [vmem:[#allocation5 + $0x164] sm:$0xf0] }
  0xa9   :  { %v9077_v49 = vld [vmem:[#allocation5 + $0x204] sm:$0xf]  ;;  %3011 = vmatpush.bf16.msra.mxu1 %v6645_v34  ;;  %v7125_v56 = vor.u32 %v9277_v46, %v7122_v47  ;;  %v6488_v34 = vld [vmem:[#allocation5 + $0x348] sm:$0xf]  ;;  %v6233_v39 = vor.u32 %v9058_v33, %v6232_v32 }
  0xaa   :  { %v6322_v50 = vld [vmem:[#allocation5 + $0x220] sm:$0xf0]  ;;  %v6200_v47 = vld [vmem:[#allocation5 + $0x108] sm:$0xf] }
  0xab   :  { %3025 = vmatpush.bf16.msra.mxu2 %v6901_v35  ;;  %v9141_v53 = vld [vmem:[#allocation5 + $0x404] sm:$0xf]  ;;  %2998 = vmatpush.bf16.msra.mxu0 %v6357_v48  ;;  %v6325_v1 = vor.u32 %v9077_v49, %v6322_v50  ;;  %v9122_v35 = vld [vmem:[#allocation5 + $0x364] sm:$0xf0] }
  0xac   :  { %v6578_v54 = vld [vmem:[#allocation5 + $0x420] sm:$0xf0]  ;;  %3040 = vmatpush.bf16.msra.mxu3 %v7125_v56  ;;  %v6489_v45 = vor.u32 %v9122_v35, %v6488_v34  ;;  %v9050_v48 = vld [vmem:[#allocation5 + $0x124] sm:$0xf0] }
  0xad   :  { %v9205_v55 = vld [vmem:[#allocation5 + $0x604] sm:$0xf]  ;;  %3012 = vmatpush.bf16.msra.mxu1 %v6613_v51  ;;  %v6581_v5 = vor.u32 %v9141_v53, %v6578_v54  ;;  %v6456_v49 = vld [vmem:[#allocation5 + $0x308] sm:$0xf]  ;;  %v6201_v53 = vor.u32 %v9050_v48, %v6200_v47 }
  0xae   :  { %v6834_v58 = vld [vmem:[#allocation5 + $0x620] sm:$0xf0]  ;;  %v9114_v50 = vld [vmem:[#allocation5 + $0x324] sm:$0xf0] }
  0xaf   :  { %v9269_v59 = vld [vmem:[#allocation5 + $0x804] sm:$0xf]  ;;  %3026 = vmatpush.bf16.msra.mxu2 %v6869_v52  ;;  %v6837_v6 = vor.u32 %v9205_v55, %v6834_v58  ;;  %2999 = vmatpush.bf16.msra.mxu0 %v6325_v1  ;;  %v6457_v58 = vor.u32 %v9114_v50, %v6456_v49  ;;  %v6104_v22 = vld [vmem:[#allocation5 + $0x48] sm:$0xf] }
  0xb0   :  { %v7090_v60 = vld [vmem:[#allocation5 + $0x820] sm:$0xf0]  ;;  %v6072_v34 = vld [vmem:[#allocation5 + $0x8] sm:$0xf] }
  0xb1   :  { %v9389_v61 = vld [vmem:[#allocation5 + $0xbc4] sm:$0xf]  ;;  %v7093_v9 = vor.u32 %v9269_v59, %v7090_v60  ;;  %3013 = vmatpush.bf16.msra.mxu1 %v6581_v5  ;;  %v6168_v60 = vld [vmem:[#allocation5 + $0xc8] sm:$0xf] }
  0xb2   :  { %v7570_v62 = vld [vmem:[#allocation5 + $0xbe0] sm:$0xf0]  ;;  %3000 = vmatmul.bf16.vlgmr.msra.gmra.mxu0 %v10057_v11  ;;  %v7320_v47 = vld [vmem:[#allocation5 + $0x9c8] sm:$0xf] }
  0xb3   :  { %v9453_v63 = vld [vmem:[#allocation5 + $0xdc4] sm:$0xf]  ;;  %v7573_v10 = vor.u32 %v9389_v61, %v7570_v62  ;;  %3027 = vmatpush.bf16.msra.mxu2 %v6837_v6  ;;  %3041 = vmatpush.bf16.msra.mxu3 %v7093_v9  ;;  %v9042_v61 = vld [vmem:[#allocation5 + $0xe4] sm:$0xf0] }
  0xb4   :  { %v7826_v2 = vld [vmem:[#allocation5 + $0xde0] sm:$0xf0]  ;;  %3014 = vmatmul.bf16.vlgmr.msra.gmra.mxu1 %v10053_v0  ;;  %v6424_v62 = vld [vmem:[#allocation5 + $0x2c8] sm:$0xf]  ;;  %v6169_v3 = vor.u32 %v9042_v61, %v6168_v60 }
  0xb5   :  { %v7829_v12 = vor.u32 %v9453_v63, %v7826_v2  ;;  %v9381_v14 = vld [vmem:[#allocation5 + $0xb84] sm:$0xf]  ;;  %3048 = vmatpush.bf16.msrb.mxu0 %v7573_v10  ;;  %v9106_v63 = vld [vmem:[#allocation5 + $0x2e4] sm:$0xf0] }
  0xb6   :  { %v7538_v15 = vld [vmem:[#allocation5 + $0xba0] sm:$0xf0]  ;;  %3028 = vmatmul.bf16.vlgmr.msra.gmra.mxu2 %v10060_v23  ;;  %3042 = vmatmul.bf16.vlgmr.msra.gmra.mxu3 %v10063_v37  ;;  %v6425_v7 = vor.u32 %v9106_v63, %v6424_v62  ;;  %v6136_v9 = vld [vmem:[#allocation5 + $0x88] sm:$0xf] }
  0xb7   :  { %v9445_v16 = vld [vmem:[#allocation5 + $0xd84] sm:$0xf]  ;;  %v7541_v24 = vor.u32 %v9381_v14, %v7538_v15  ;;  %3062 = vmatpush.bf16.msrb.mxu1 %v7829_v12  ;;  %3076 = vmatpush.bf16.msrb.mxu2 %v6297_v13  ;;  %v9034_v10 = vld [vmem:[#allocation5 + $0xa4] sm:$0xf0] }
  0xb8   :  { %v7794_v18 = vld [vmem:[#allocation5 + $0xda0] sm:$0xf0]  ;;  %3090 = vmatpush.bf16.msrb.mxu3 %v6553_v17  ;;  %v6392_v12 = vld [vmem:[#allocation5 + $0x288] sm:$0xf] }
  0xb9   :  { %v7797_v25 = vor.u32 %v9445_v16, %v7794_v18  ;;  %v9373_v27 = vld [vmem:[#allocation5 + $0xb44] sm:$0xf]  ;;  %3049 = vmatpush.bf16.msrb.mxu0 %v7541_v24  ;;  %v9098_v13 = vld [vmem:[#allocation5 + $0x2a4] sm:$0xf0]  ;;  %v6137_v16 = vor.u32 %v9034_v10, %v6136_v9 }
  0xba   :  { %v7506_v28 = vld [vmem:[#allocation5 + $0xb60] sm:$0xf0]  ;;  %v6393_v20 = vor.u32 %v9098_v13, %v6392_v12  ;;  %v9026_v24 = vld [vmem:[#allocation5 + $0x64] sm:$0xf0] }
  0xbb   :  { %v9437_v29 = vld [vmem:[#allocation5 + $0xd44] sm:$0xf]  ;;  %v7509_v36 = vor.u32 %v9373_v27, %v7506_v28  ;;  %3063 = vmatpush.bf16.msrb.mxu1 %v7797_v25  ;;  %3077 = vmatpush.bf16.msrb.mxu2 %v6265_v26  ;;  %v6360_v25 = vld [vmem:[#allocation5 + $0x248] sm:$0xf] }
  0xbc   :  { %v7762_v31 = vld [vmem:[#allocation5 + $0xd60] sm:$0xf0]  ;;  %3091 = vmatpush.bf16.msrb.mxu3 %v6521_v30  ;;  %v9090_v26 = vld [vmem:[#allocation5 + $0x264] sm:$0xf0] }
  0xbd   :  { %v7765_v38 = vor.u32 %v9437_v29, %v7762_v31  ;;  %v9365_v40 = vld [vmem:[#allocation5 + $0xb04] sm:$0xf]  ;;  %3050 = vmatpush.bf16.msrb.mxu0 %v7509_v36  ;;  %v6105_v31 = vor.u32 %v9026_v24, %v6104_v22  ;;  %v6361_v35 = vor.u32 %v9090_v26, %v6360_v25  ;;  %v9018_v36 = vld [vmem:[#allocation5 + $0x24] sm:$0xf0] }
  0xbe   :  { %v7474_v43 = vld [vmem:[#allocation5 + $0xb20] sm:$0xf0]  ;;  %v9330_v48 = vld [vmem:[#allocation5 + $0x9e4] sm:$0xf0]  ;;  %v6073_v50 = vor.u32 %v9018_v36, %v6072_v34 }
  0xbf   :  { %v9429_v44 = vld [vmem:[#allocation5 + $0xd04] sm:$0xf]  ;;  %v7477_v51 = vor.u32 %v9365_v40, %v7474_v43  ;;  %3064 = vmatpush.bf16.msrb.mxu1 %v7765_v38  ;;  %3078 = vmatpush.bf16.msrb.mxu2 %v6233_v39  ;;  %v6328_v38 = vld [vmem:[#allocation5 + $0x208] sm:$0xf] }
  0xc0   :  { %v7730_v46 = vld [vmem:[#allocation5 + $0xd20] sm:$0xf0]  ;;  %3092 = vmatpush.bf16.msrb.mxu3 %v6489_v45  ;;  %v9082_v39 = vld [vmem:[#allocation5 + $0x224] sm:$0xf0] }
  0xc1   :  { %v7733_v52 = vor.u32 %v9429_v44, %v7730_v46  ;;  %v9357_v54 = vld [vmem:[#allocation5 + $0xac4] sm:$0xf]  ;;  %3051 = vmatpush.bf16.msrb.mxu0 %v7477_v51  ;;  %v6808_v40 = vld [vmem:[#allocation5 + $0x5c8] sm:$0xf] }
  0xc2   :  { %v7442_v55 = vld [vmem:[#allocation5 + $0xae0] sm:$0xf0]  ;;  %v9202_v43 = vld [vmem:[#allocation5 + $0x5e4] sm:$0xf0] }
  0xc3   :  { %v9421_v56 = vld [vmem:[#allocation5 + $0xcc4] sm:$0xf]  ;;  %v7445_v1 = vor.u32 %v9357_v54, %v7442_v55  ;;  %3065 = vmatpush.bf16.msrb.mxu1 %v7733_v52  ;;  %3079 = vmatpush.bf16.msrb.mxu2 %v6201_v53  ;;  %v7064_v44 = vld [vmem:[#allocation5 + $0x7c8] sm:$0xf]  ;;  %v6329_v53 = vor.u32 %v9082_v39, %v6328_v38  ;;  %v6809_v54 = vor.u32 %v9202_v43, %v6808_v40 }
  0xc4   :  { %v7698_v59 = vld [vmem:[#allocation5 + $0xce0] sm:$0xf0]  ;;  %3093 = vmatpush.bf16.msrb.mxu3 %v6457_v58  ;;  %v9266_v46 = vld [vmem:[#allocation5 + $0x7e4] sm:$0xf0] }
  0xc5   :  { %v7701_v2 = vor.u32 %v9421_v56, %v7698_v59  ;;  %v9349_v4 = vld [vmem:[#allocation5 + $0xa84] sm:$0xf]  ;;  %3052 = vmatpush.bf16.msrb.mxu0 %v7445_v1  ;;  %v7576_v51 = vld [vmem:[#allocation5 + $0xbc8] sm:$0xf]  ;;  %v7065_v55 = vor.u32 %v9266_v46, %v7064_v44  ;;  %v7321_v56 = vor.u32 %v9330_v48, %v7320_v47 }
  0xc6   :  { %v7410_v5 = vld [vmem:[#allocation5 + $0xaa0] sm:$0xf0]  ;;  %v9394_v52 = vld [vmem:[#allocation5 + $0xbe4] sm:$0xf0] }
  0xc7   :  { %v9413_v6 = vld [vmem:[#allocation5 + $0xc84] sm:$0xf]  ;;  %v7413_v14 = vor.u32 %v9349_v4, %v7410_v5  ;;  %3066 = vmatpush.bf16.msrb.mxu1 %v7701_v2  ;;  %3080 = vmatpush.bf16.msrb.mxu2 %v6169_v3  ;;  %v6776_v58 = vld [vmem:[#allocation5 + $0x588] sm:$0xf]  ;;  %v7577_v61 = vor.u32 %v9394_v52, %v7576_v51 }
  0xc8   :  { %v7666_v8 = vld [vmem:[#allocation5 + $0xca0] sm:$0xf0]  ;;  %3094 = vmatpush.bf16.msrb.mxu3 %v6425_v7  ;;  %v9194_v59 = vld [vmem:[#allocation5 + $0x5a4] sm:$0xf0] }
  0xc9   :  { %v7669_v15 = vor.u32 %v9413_v6, %v7666_v8  ;;  %v9341_v17 = vld [vmem:[#allocation5 + $0xa44] sm:$0xf]  ;;  %3053 = vmatpush.bf16.msrb.mxu0 %v7413_v14  ;;  %v7032_v60 = vld [vmem:[#allocation5 + $0x788] sm:$0xf]  ;;  %v6777_v4 = vor.u32 %v9194_v59, %v6776_v58 }
  0xca   :  { %v7378_v18 = vld [vmem:[#allocation5 + $0xa60] sm:$0xf0]  ;;  %v9258_v62 = vld [vmem:[#allocation5 + $0x7a4] sm:$0xf0] }
  0xcb   :  { %v9405_v19 = vld [vmem:[#allocation5 + $0xc44] sm:$0xf]  ;;  %v7381_v27 = vor.u32 %v9341_v17, %v7378_v18  ;;  %3067 = vmatpush.bf16.msrb.mxu1 %v7669_v15  ;;  %3081 = vmatpush.bf16.msrb.mxu2 %v6137_v16  ;;  %v7288_v63 = vld [vmem:[#allocation5 + $0x988] sm:$0xf]  ;;  %v7033_v5 = vor.u32 %v9258_v62, %v7032_v60 }
  0xcc   :  { %v7634_v21 = vld [vmem:[#allocation5 + $0xc60] sm:$0xf0]  ;;  %3095 = vmatpush.bf16.msrb.mxu3 %v6393_v20  ;;  %v9322_v1 = vld [vmem:[#allocation5 + $0x9a4] sm:$0xf0] }
  0xcd   :  { %v9333_v28 = vld [vmem:[#allocation5 + $0xa04] sm:$0xf]  ;;  %v7637_v30 = vor.u32 %v9405_v19, %v7634_v21  ;;  %3054 = vmatpush.bf16.msrb.mxu0 %v7381_v27  ;;  %v7544_v2 = vld [vmem:[#allocation5 + $0xb88] sm:$0xf]  ;;  %v7289_v6 = vor.u32 %v9322_v1, %v7288_v63 }
  0xce   :  { %v7346_v29 = vld [vmem:[#allocation5 + $0xa20] sm:$0xf0]  ;;  %v9386_v3 = vld [vmem:[#allocation5 + $0xba4] sm:$0xf0] }
  0xcf   :  { %v9397_v32 = vld [vmem:[#allocation5 + $0xc04] sm:$0xf]  ;;  %v7349_v45 = vor.u32 %v9333_v28, %v7346_v29  ;;  %3068 = vmatpush.bf16.msrb.mxu1 %v7637_v30  ;;  %3082 = vmatpush.bf16.msrb.mxu2 %v6105_v31  ;;  %v6744_v7 = vld [vmem:[#allocation5 + $0x548] sm:$0xf]  ;;  %v7545_v10 = vor.u32 %v9386_v3, %v7544_v2 }
  0xd0   :  { %v7602_v33 = vld [vmem:[#allocation5 + $0xc20] sm:$0xf0]  ;;  %3096 = vmatpush.bf16.msrb.mxu3 %v6361_v35  ;;  %v9186_v8 = vld [vmem:[#allocation5 + $0x564] sm:$0xf0] }
  0xd1   :  { %v7605_v49 = vor.u32 %v9397_v32, %v7602_v33  ;;  %3055 = vmatpush.bf16.msrb.mxu0 %v7349_v45  ;;  %v7000_v9 = vld [vmem:[#allocation5 + $0x748] sm:$0xf]  ;;  %v6745_v17 = vor.u32 %v9186_v8, %v6744_v7 }
  0xd2   :  { %v9250_v12 = vld [vmem:[#allocation5 + $0x764] sm:$0xf0] }
  0xd3   :  { %3069 = vmatpush.bf16.msrb.mxu1 %v7605_v49  ;;  %3083 = vmatpush.bf16.msrb.mxu2 %v6073_v50  ;;  %v7256_v13 = vld [vmem:[#allocation5 + $0x948] sm:$0xf]  ;;  %v7001_v18 = vor.u32 %v9250_v12, %v7000_v9 }
  0xd4   :  { %3097 = vmatpush.bf16.msrb.mxu3 %v6329_v53  ;;  %3056 = vmatmul.bf16.vlgmr.msrb.gmra.mxu0 %v10067_v42  ;;  %v9314_v14 = vld [vmem:[#allocation5 + $0x964] sm:$0xf0] }
  0xd5   :  { %3104 = vmatpush.bf16.msra.mxu0 %v6809_v54  ;;  %v7512_v15 = vld [vmem:[#allocation5 + $0xb48] sm:$0xf]  ;;  %v7257_v19 = vor.u32 %v9314_v14, %v7256_v13 }
  0xd6   :  { %3070 = vmatmul.bf16.vlgmr.msrb.gmra.mxu1 %v10065_v41  ;;  %v9378_v16 = vld [vmem:[#allocation5 + $0xb64] sm:$0xf0]  ;;  %3084 = vmatmul.bf16.vlgmr.msrb.gmra.mxu2 %v10051_v57 }
  0xd7   :  { %3118 = vmatpush.bf16.msra.mxu1 %v7065_v55  ;;  %3132 = vmatpush.bf16.msra.mxu2 %v7321_v56  ;;  %v6712_v20 = vld [vmem:[#allocation5 + $0x508] sm:$0xf]  ;;  %v7513_v24 = vor.u32 %v9378_v16, %v7512_v15 }
  0xd8   :  { %3146 = vmatpush.bf16.msra.mxu3 %v7577_v61  ;;  %v9178_v21 = vld [vmem:[#allocation5 + $0x524] sm:$0xf0] }
  0xd9   :  { %3105 = vmatpush.bf16.msra.mxu0 %v6777_v4  ;;  %3098 = vmatmul.bf16.vlgmr.msrb.gmra.mxu3 %v10057_v11  ;;  %v6968_v22 = vld [vmem:[#allocation5 + $0x708] sm:$0xf]  ;;  %v6713_v30 = vor.u32 %v9178_v21, %v6712_v20 }
  0xda   :  { %v9242_v25 = vld [vmem:[#allocation5 + $0x724] sm:$0xf0] }
  0xdb   :  { %3119 = vmatpush.bf16.msra.mxu1 %v7033_v5  ;;  %3133 = vmatpush.bf16.msra.mxu2 %v7289_v6  ;;  %v7224_v26 = vld [vmem:[#allocation5 + $0x908] sm:$0xf]  ;;  %v6969_v31 = vor.u32 %v9242_v25, %v6968_v22  ;;  %v9070_v22 = vld [vmem:[#allocation5 + $0x1cc] sm:$0xf] }
  0xdc   :  { %3147 = vmatpush.bf16.msra.mxu3 %v7545_v10  ;;  %v9306_v27 = vld [vmem:[#allocation5 + $0x924] sm:$0xf0]  ;;  %v6298_v25 = vld [vmem:[#allocation5 + $0x1e8] sm:$0xf0] }
  0xdd   :  { %v7480_v28 = vld [vmem:[#allocation5 + $0xb08] sm:$0xf]  ;;  %3106 = vmatpush.bf16.msra.mxu0 %v6745_v17  ;;  %v7225_v32 = vor.u32 %v9306_v27, %v7224_v26  ;;  %v9134_v26 = vld [vmem:[#allocation5 + $0x3cc] sm:$0xf] }
  0xde   :  { %v9370_v29 = vld [vmem:[#allocation5 + $0xb24] sm:$0xf0]  ;;  %v6554_v27 = vld [vmem:[#allocation5 + $0x3e8] sm:$0xf0] }
  0xdf   :  { %3120 = vmatpush.bf16.msra.mxu1 %v7001_v18  ;;  %3134 = vmatpush.bf16.msra.mxu2 %v7257_v19  ;;  %v6680_v33 = vld [vmem:[#allocation5 + $0x4c8] sm:$0xf]  ;;  %v7481_v36 = vor.u32 %v9370_v29, %v7480_v28 }
  0xe0   :  { %v9170_v34 = vld [vmem:[#allocation5 + $0x4e4] sm:$0xf0]  ;;  %3148 = vmatpush.bf16.msra.mxu3 %v7513_v24 }
  0xe1   :  { %v6936_v35 = vld [vmem:[#allocation5 + $0x6c8] sm:$0xf]  ;;  %3107 = vmatpush.bf16.msra.mxu0 %v6713_v30  ;;  %v6681_v45 = vor.u32 %v9170_v34, %v6680_v33  ;;  %v9198_v30 = vld [vmem:[#allocation5 + $0x5cc] sm:$0xf]  ;;  %v6301_v34 = vor.u32 %v9070_v22, %v6298_v25 }
  0xe2   :  { %v9234_v38 = vld [vmem:[#allocation5 + $0x6e4] sm:$0xf0]  ;;  %v6170_v22 = vld [vmem:[#allocation5 + $0xe8] sm:$0xf0] }
  0xe3   :  { %v7192_v39 = vld [vmem:[#allocation5 + $0x8c8] sm:$0xf]  ;;  %3121 = vmatpush.bf16.msra.mxu1 %v6969_v31  ;;  %3135 = vmatpush.bf16.msra.mxu2 %v7225_v32  ;;  %v6937_v46 = vor.u32 %v9234_v38, %v6936_v35  ;;  %v6810_v31 = vld [vmem:[#allocation5 + $0x5e8] sm:$0xf0]  ;;  %v6557_v35 = vor.u32 %v9134_v26, %v6554_v27 }
  0xe4   :  { %v9298_v40 = vld [vmem:[#allocation5 + $0x8e4] sm:$0xf0]  ;;  %3149 = vmatpush.bf16.msra.mxu3 %v7481_v36  ;;  %v6426_v25 = vld [vmem:[#allocation5 + $0x2e8] sm:$0xf0] }
  0xe5   :  { %v7448_v43 = vld [vmem:[#allocation5 + $0xac8] sm:$0xf]  ;;  %v7193_v47 = vor.u32 %v9298_v40, %v7192_v39  ;;  %3108 = vmatpush.bf16.msra.mxu0 %v6681_v45  ;;  %v9062_v39 = vld [vmem:[#allocation5 + $0x18c] sm:$0xf]  ;;  %v6813_v40 = vor.u32 %v9198_v30, %v6810_v31 }
  0xe6   :  { %v9362_v44 = vld [vmem:[#allocation5 + $0xae4] sm:$0xf0]  ;;  %v6522_v45 = vld [vmem:[#allocation5 + $0x3a8] sm:$0xf0] }
  0xe7   :  { %v6648_v48 = vld [vmem:[#allocation5 + $0x488] sm:$0xf]  ;;  %v7449_v51 = vor.u32 %v9362_v44, %v7448_v43  ;;  %3122 = vmatpush.bf16.msra.mxu1 %v6937_v46  ;;  %3136 = vmatpush.bf16.msra.mxu2 %v7193_v47  ;;  %v6266_v43 = vld [vmem:[#allocation5 + $0x1a8] sm:$0xf0] }
  0xe8   :  { %v9162_v49 = vld [vmem:[#allocation5 + $0x4a4] sm:$0xf0]  ;;  %v9126_v44 = vld [vmem:[#allocation5 + $0x38c] sm:$0xf] }
  0xe9   :  { %v6904_v50 = vld [vmem:[#allocation5 + $0x688] sm:$0xf]  ;;  %v6649_v58 = vor.u32 %v9162_v49, %v6648_v48  ;;  %3150 = vmatpush.bf16.msra.mxu3 %v7449_v51  ;;  %v9190_v46 = vld [vmem:[#allocation5 + $0x58c] sm:$0xf]  ;;  %v6525_v51 = vor.u32 %v9126_v44, %v6522_v45 }
  0xea   :  { %v9226_v52 = vld [vmem:[#allocation5 + $0x6a4] sm:$0xf0]  ;;  %v6778_v47 = vld [vmem:[#allocation5 + $0x5a8] sm:$0xf0] }
  0xeb   :  { %v7160_v53 = vld [vmem:[#allocation5 + $0x888] sm:$0xf]  ;;  %v6905_v59 = vor.u32 %v9226_v52, %v6904_v50  ;;  %3109 = vmatpush.bf16.msra.mxu0 %v6649_v58  ;;  %v6269_v50 = vor.u32 %v9062_v39, %v6266_v43  ;;  %v9118_v58 = vld [vmem:[#allocation5 + $0x34c] sm:$0xf]  ;;  %v2917_v43 = vpop.f32.mrf.mxu2 }
  0xec   :  { %v9290_v54 = vld [vmem:[#allocation5 + $0x8a4] sm:$0xf0]  ;;  %v9166_v26 = vld [vmem:[#allocation5 + $0x4cc] sm:$0xf] }
  0xed   :  { %v7416_v55 = vld [vmem:[#allocation5 + $0xa88] sm:$0xf]  ;;  %v7161_v60 = vor.u32 %v9290_v54, %v7160_v53  ;;  %3123 = vmatpush.bf16.msra.mxu1 %v6905_v59  ;;  %v9054_v53 = vld [vmem:[#allocation5 + $0x14c] sm:$0xf]  ;;  %v10081_v54 = vld [vmem:[#allocation7] sm:$0xff] }
  0xee   :  { %v9354_v56 = vld [vmem:[#allocation5 + $0xaa4] sm:$0xf0]  ;;  %v6490_v59 = vld [vmem:[#allocation5 + $0x368] sm:$0xf0] }
  0xef   :  { %v6616_v61 = vld [vmem:[#allocation5 + $0x448] sm:$0xf]  ;;  %v7417_v1 = vor.u32 %v9354_v56, %v7416_v55  ;;  %3137 = vmatpush.bf16.msra.mxu2 %v7161_v60  ;;  %v6781_v55 = vor.u32 %v9190_v46, %v6778_v47  ;;  %v6234_v56 = vld [vmem:[#allocation5 + $0x168] sm:$0xf0] }
  0xf0   :  { %v9154_v62 = vld [vmem:[#allocation5 + $0x464] sm:$0xf0]  ;;  %v9182_v60 = vld [vmem:[#allocation5 + $0x54c] sm:$0xf] }
  0xf1   :  { %v6872_v63 = vld [vmem:[#allocation5 + $0x648] sm:$0xf]  ;;  %v6617_v7 = vor.u32 %v9154_v62, %v6616_v61  ;;  %3151 = vmatpush.bf16.msra.mxu3 %v7417_v1  ;;  %v6746_v61 = vld [vmem:[#allocation5 + $0x568] sm:$0xf0]  ;;  %v6237_v1 = vor.u32 %v9054_v53, %v6234_v56 }
  0xf2   :  { %v9218_v2 = vld [vmem:[#allocation5 + $0x664] sm:$0xf0]  ;;  %v6682_v27 = vld [vmem:[#allocation5 + $0x4e8] sm:$0xf0] }
  0xf3   :  { %v7128_v3 = vld [vmem:[#allocation5 + $0x848] sm:$0xf]  ;;  %v6873_v10 = vor.u32 %v9218_v2, %v6872_v63  ;;  %3110 = vmatpush.bf16.msra.mxu0 %v6617_v7  ;;  %v10409_v63 = vperm.slane %v10081_v54, 0  ;;  %v6493_v2 = vor.u32 %v9118_v58, %v6490_v59  ;;  %v6202_v7 = vld [vmem:[#allocation5 + $0x128] sm:$0xf0] }
  0xf4   :  { %v9282_v4 = vld [vmem:[#allocation5 + $0x864] sm:$0xf0]  ;;  %v9094_v39 = vld [vmem:[#allocation5 + $0x28c] sm:$0xf] }
  0xf5   :  { %v7384_v5 = vld [vmem:[#allocation5 + $0xa48] sm:$0xf]  ;;  %v7129_v12 = vor.u32 %v9282_v4, %v7128_v3  ;;  %3124 = vmatpush.bf16.msra.mxu1 %v6873_v10  ;;  %v9174_v10 = vld [vmem:[#allocation5 + $0x50c] sm:$0xf] }
  0xf6   :  { %v9346_v6 = vld [vmem:[#allocation5 + $0xa64] sm:$0xf0]  ;;  %v9158_v44 = vld [vmem:[#allocation5 + $0x48c] sm:$0xf] }
  0xf7   :  { %v6584_v8 = vld [vmem:[#allocation5 + $0x408] sm:$0xf]  ;;  %v7385_v16 = vor.u32 %v9346_v6, %v7384_v5  ;;  %3138 = vmatpush.bf16.msra.mxu2 %v7129_v12  ;;  %v9046_v5 = vld [vmem:[#allocation5 + $0x10c] sm:$0xf]  ;;  %v6749_v6 = vor.u32 %v9182_v60, %v6746_v61 }
  0xf8   :  { %v9146_v9 = vld [vmem:[#allocation5 + $0x424] sm:$0xf0]  ;;  %v6714_v12 = vld [vmem:[#allocation5 + $0x528] sm:$0xf0] }
  0xf9   :  { %v6840_v13 = vld [vmem:[#allocation5 + $0x608] sm:$0xf]  ;;  %v6585_v24 = vor.u32 %v9146_v9, %v6584_v8  ;;  %3152 = vmatpush.bf16.msra.mxu3 %v7385_v16  ;;  %v9110_v8 = vld [vmem:[#allocation5 + $0x30c] sm:$0xf]  ;;  %v6205_v16 = vor.u32 %v9046_v5, %v6202_v7 }
  0xfa   :  { %v9210_v14 = vld [vmem:[#allocation5 + $0x624] sm:$0xf0]  ;;  %v6458_v9 = vld [vmem:[#allocation5 + $0x328] sm:$0xf0] }
  0xfb   :  { %v7096_v15 = vld [vmem:[#allocation5 + $0x808] sm:$0xf]  ;;  %v6841_v28 = vor.u32 %v9210_v14, %v6840_v13  ;;  %3111 = vmatpush.bf16.msra.mxu0 %v6585_v24  ;;  %v2889_v13 = vpop.f32.mrf.mxu0  ;;  %v9102_v24 = vld [vmem:[#allocation5 + $0x2cc] sm:$0xf] }
  0xfc   :  { %v9274_v17 = vld [vmem:[#allocation5 + $0x824] sm:$0xf0]  ;;  %v6650_v45 = vld [vmem:[#allocation5 + $0x4a8] sm:$0xf0] }
  0xfd   :  { %v7352_v18 = vld [vmem:[#allocation5 + $0xa08] sm:$0xf]  ;;  %v7097_v29 = vor.u32 %v9274_v17, %v7096_v15  ;;  %3125 = vmatpush.bf16.msra.mxu1 %v6841_v28  ;;  %v2890_v15 = vadd.f32 %v2889_v13, %v10409_v63  ;;  %v6461_v17 = vor.u32 %v9110_v8, %v6458_v9  ;;  %v2903_v28 = vpop.f32.mrf.mxu1  ;;  %v6653_v53 = vor.u32 %v9158_v44, %v6650_v45  ;;  %v9086_v56 = vld [vmem:[#allocation5 + $0x24c] sm:$0xf] }
  0xfe   :  { %v9338_v19 = vld [vmem:[#allocation5 + $0xa24] sm:$0xf0]  ;;  %3112 = vmatmul.bf16.vlgmr.msra.gmra.mxu0 %v10053_v0  ;;  %v6362_v58 = vld [vmem:[#allocation5 + $0x268] sm:$0xf0] }
  0xff   :  { %v7832_v20 = vld [vmem:[#allocation5 + $0xdc8] sm:$0xf]  ;;  %v7353_v32 = vor.u32 %v9338_v19, %v7352_v18  ;;  %3139 = vmatpush.bf16.msra.mxu2 %v7097_v29  ;;  %v2904_v30 = vadd.f32 %v2903_v28, %v2890_v15  ;;  %v9150_v59 = vld [vmem:[#allocation5 + $0x44c] sm:$0xf] }
 0x100   :  { %v9458_v21 = vld [vmem:[#allocation5 + $0xde4] sm:$0xf0]  ;;  %3126 = vmatmul.bf16.vlgmr.msra.gmra.mxu1 %v10060_v23  ;;  %v6618_v60 = vld [vmem:[#allocation5 + $0x468] sm:$0xf0] }
 0x101   :  { %v7833_v33 = vor.u32 %v9458_v21, %v7832_v20  ;;  %v7800_v36 = vld [vmem:[#allocation5 + $0xd88] sm:$0xf]  ;;  %3153 = vmatpush.bf16.msra.mxu3 %v7353_v32  ;;  %3174 = vmatpush.bf16.msrb.mxu1 %v6301_v34  ;;  %v9038_v20 = vld [vmem:[#allocation5 + $0xcc] sm:$0xf]  ;;  %v6717_v21 = vor.u32 %v9174_v10, %v6714_v12  ;;  %v6429_v32 = vor.u32 %v9102_v24, %v6426_v25  ;;  %v2931_v12 = vpop.f32.mrf.mxu3 }
 0x102   :  { %v9450_v38 = vld [vmem:[#allocation5 + $0xda4] sm:$0xf0]  ;;  %3140 = vmatmul.bf16.vlgmr.msra.gmra.mxu2 %v10063_v37  ;;  %v6173_v31 = vor.u32 %v9038_v20, %v6170_v22  ;;  %v2918_v46 = vadd.f32 %v2917_v43, %v2904_v30  ;;  %v6074_v5 = vld [vmem:[#allocation5 + $0x28] sm:$0xf0]  ;;  %v6621_v7 = vor.u32 %v9150_v59, %v6618_v60  ;;  %v10099_v59 = vpop.f32.mrf.mxu2 }
 0x103   :  { %3160 = vmatpush.bf16.msrb.mxu0 %v7833_v33  ;;  %v7801_v48 = vor.u32 %v9450_v38, %v7800_v36  ;;  %v7768_v49 = vld [vmem:[#allocation5 + $0xd48] sm:$0xf]  ;;  %3188 = vmatpush.bf16.msrb.mxu2 %v6557_v35  ;;  %v9030_v35 = vld [vmem:[#allocation5 + $0x8c] sm:$0xf]  ;;  %v6685_v36 = vor.u32 %v9166_v26, %v6682_v27  ;;  %v10092_v30 = vpop.f32.mrf.mxu0 }
 0x104   :  { %v9442_v52 = vld [vmem:[#allocation5 + $0xd64] sm:$0xf0]  ;;  %3154 = vmatmul.bf16.vlgmr.msra.gmra.mxu3 %v10067_v42  ;;  %v6138_v38 = vld [vmem:[#allocation5 + $0xa8] sm:$0xf0] }
 0x105   :  { %3202 = vmatpush.bf16.msrb.mxu3 %v6813_v40  ;;  %v7769_v62 = vor.u32 %v9442_v52, %v7768_v49  ;;  %3175 = vmatpush.bf16.msrb.mxu1 %v6269_v50  ;;  %v7736_v3 = vld [vmem:[#allocation5 + $0xd08] sm:$0xf]  ;;  %v6394_v40 = vld [vmem:[#allocation5 + $0x2a8] sm:$0xf0]  ;;  %v10094_v43 = vpop.f32.mrf.mxu1 }
 0x106   :  { %v9434_v4 = vld [vmem:[#allocation5 + $0xd24] sm:$0xf0]  ;;  %v6397_v49 = vor.u32 %v9094_v39, %v6394_v40  ;;  %v9022_v52 = vld [vmem:[#allocation5 + $0x4c] sm:$0xf] }
 0x107   :  { %3161 = vmatpush.bf16.msrb.mxu0 %v7801_v48  ;;  %3189 = vmatpush.bf16.msrb.mxu2 %v6525_v51  ;;  %v7737_v14 = vor.u32 %v9434_v4, %v7736_v3  ;;  %v7704_v18 = vld [vmem:[#allocation5 + $0xcc8] sm:$0xf]  ;;  %v6141_v48 = vor.u32 %v9030_v35, %v6138_v38  ;;  %v6365_v3 = vor.u32 %v9086_v56, %v6362_v58  ;;  %v9014_v4 = vld [vmem:[#allocation5 + $0xc] sm:$0xf] }
 0x108   :  { %v9426_v19 = vld [vmem:[#allocation5 + $0xce4] sm:$0xf0]  ;;  %v6330_v8 = vld [vmem:[#allocation5 + $0x228] sm:$0xf0] }
 0x109   :  { %3203 = vmatpush.bf16.msrb.mxu3 %v6781_v55  ;;  %3176 = vmatpush.bf16.msrb.mxu1 %v6237_v1  ;;  %v7705_v29 = vor.u32 %v9426_v19, %v7704_v18  ;;  %v7672_v33 = vld [vmem:[#allocation5 + $0xc88] sm:$0xf]  ;;  %v6106_v55 = vld [vmem:[#allocation5 + $0x68] sm:$0xf0] }
 0x10a   :  { %v9418_v34 = vld [vmem:[#allocation5 + $0xca4] sm:$0xf0]  ;;  %v9142_v9 = vld [vmem:[#allocation5 + $0x40c] sm:$0xf] }
 0x10b   :  { %3162 = vmatpush.bf16.msrb.mxu0 %v7769_v62  ;;  %3190 = vmatpush.bf16.msrb.mxu2 %v6493_v2  ;;  %v7673_v47 = vor.u32 %v9418_v34, %v7672_v33  ;;  %v7640_v50 = vld [vmem:[#allocation5 + $0xc48] sm:$0xf]  ;;  %v6109_v2 = vor.u32 %v9022_v52, %v6106_v55  ;;  %v6586_v10 = vld [vmem:[#allocation5 + $0x428] sm:$0xf0] }
 0x10c   :  { %v9410_v51 = vld [vmem:[#allocation5 + $0xc64] sm:$0xf0]  ;;  %v9262_v13 = vld [vmem:[#allocation5 + $0x7cc] sm:$0xf]  ;;  %v6589_v26 = vor.u32 %v9142_v9, %v6586_v10 }
 0x10d   :  { %3204 = vmatpush.bf16.msrb.mxu3 %v6749_v6  ;;  %3177 = vmatpush.bf16.msrb.mxu1 %v6205_v16  ;;  %v7641_v61 = vor.u32 %v9410_v51, %v7640_v50  ;;  %v7608_v62 = vld [vmem:[#allocation5 + $0xc08] sm:$0xf]  ;;  %v9078_v6 = vld [vmem:[#allocation5 + $0x20c] sm:$0xf]  ;;  %v10090_v16 = vadd.f32 %v2931_v12, %v2918_v46 }
 0x10e   :  { %v9402_v1 = vld [vmem:[#allocation5 + $0xc24] sm:$0xf0]  ;;  %v9326_v15 = vld [vmem:[#allocation5 + $0x9cc] sm:$0xf]  ;;  %v6333_v22 = vor.u32 %v9078_v6, %v6330_v8 }
 0x10f   :  { %3163 = vmatpush.bf16.msrb.mxu0 %v7737_v14  ;;  %3191 = vmatpush.bf16.msrb.mxu2 %v6461_v17  ;;  %v7066_v14 = vld [vmem:[#allocation5 + $0x7e8] sm:$0xf0]  ;;  %v7609_v17 = vor.u32 %v9402_v1, %v7608_v62 }
 0x110   :  { %v7322_v18 = vld [vmem:[#allocation5 + $0x9e8] sm:$0xf0]  ;;  %v7069_v27 = vor.u32 %v9262_v13, %v7066_v14 }
 0x111   :  { %3205 = vmatpush.bf16.msrb.mxu3 %v6717_v21  ;;  %3178 = vmatpush.bf16.msrb.mxu1 %v6173_v31  ;;  %v9390_v19 = vld [vmem:[#allocation5 + $0xbcc] sm:$0xf]  ;;  %v6077_v21 = vor.u32 %v9014_v4, %v6074_v5  ;;  %v7325_v28 = vor.u32 %v9326_v15, %v7322_v18  ;;  %v2959_v15 = vpop.f32.mrf.mxu1 }
 0x112   :  { %v7578_v20 = vld [vmem:[#allocation5 + $0xbe8] sm:$0xf0] }
 0x113   :  { %3164 = vmatpush.bf16.msrb.mxu0 %v7705_v29  ;;  %3192 = vmatpush.bf16.msrb.mxu2 %v6429_v32  ;;  %v9454_v24 = vld [vmem:[#allocation5 + $0xdcc] sm:$0xf]  ;;  %v7581_v29 = vor.u32 %v9390_v19, %v7578_v20 }
 0x114   :  { %v7834_v25 = vld [vmem:[#allocation5 + $0xde8] sm:$0xf0] }
 0x115   :  { %3206 = vmatpush.bf16.msrb.mxu3 %v6685_v36  ;;  %3179 = vmatpush.bf16.msrb.mxu1 %v6141_v48  ;;  %v9254_v31 = vld [vmem:[#allocation5 + $0x78c] sm:$0xf]  ;;  %v7837_v34 = vor.u32 %v9454_v24, %v7834_v25 }
 0x116   :  { %v7034_v32 = vld [vmem:[#allocation5 + $0x7a8] sm:$0xf0] }
 0x117   :  { %3165 = vmatpush.bf16.msrb.mxu0 %v7673_v47  ;;  %3193 = vmatpush.bf16.msrb.mxu2 %v6397_v49  ;;  %v9318_v33 = vld [vmem:[#allocation5 + $0x98c] sm:$0xf]  ;;  %v7037_v44 = vor.u32 %v9254_v31, %v7034_v32 }
 0x118   :  { %v7290_v35 = vld [vmem:[#allocation5 + $0x9a8] sm:$0xf0] }
 0x119   :  { %3207 = vmatpush.bf16.msrb.mxu3 %v6653_v53  ;;  %3180 = vmatpush.bf16.msrb.mxu1 %v6109_v2  ;;  %v9382_v36 = vld [vmem:[#allocation5 + $0xb8c] sm:$0xf]  ;;  %v7293_v45 = vor.u32 %v9318_v33, %v7290_v35  ;;  %v2973_v35 = vpop.f32.mrf.mxu2 }
 0x11a   :  { %v7546_v38 = vld [vmem:[#allocation5 + $0xba8] sm:$0xf0] }
 0x11b   :  { %3166 = vmatpush.bf16.msrb.mxu0 %v7641_v61  ;;  %3194 = vmatpush.bf16.msrb.mxu2 %v6365_v3  ;;  %v9446_v39 = vld [vmem:[#allocation5 + $0xd8c] sm:$0xf]  ;;  %v7549_v46 = vor.u32 %v9382_v36, %v7546_v38 }
 0x11c   :  { %v7802_v40 = vld [vmem:[#allocation5 + $0xda8] sm:$0xf0] }
 0x11d   :  { %3208 = vmatpush.bf16.msrb.mxu3 %v6621_v7  ;;  %3181 = vmatpush.bf16.msrb.mxu1 %v6077_v21  ;;  %v9246_v47 = vld [vmem:[#allocation5 + $0x74c] sm:$0xf]  ;;  %v7805_v50 = vor.u32 %v9446_v39, %v7802_v40  ;;  %v2945_v7 = vpop.f32.mrf.mxu0 }
 0x11e   :  { %v7002_v48 = vld [vmem:[#allocation5 + $0x768] sm:$0xf0]  ;;  %v2946_v10 = vadd.f32 %v2945_v7, %v10090_v16 }
 0x11f   :  { %3167 = vmatpush.bf16.msrb.mxu0 %v7609_v17  ;;  %3195 = vmatpush.bf16.msrb.mxu2 %v6333_v22  ;;  %v9310_v49 = vld [vmem:[#allocation5 + $0x94c] sm:$0xf]  ;;  %v7005_v58 = vor.u32 %v9246_v47, %v7002_v48 }
 0x120   :  { %v7258_v51 = vld [vmem:[#allocation5 + $0x968] sm:$0xf0]  ;;  %3182 = vmatmul.bf16.vlgmr.msrb.gmra.mxu1 %v10051_v57  ;;  %v2960_v21 = vadd.f32 %v2959_v15, %v2946_v10  ;;  %v6560_v15 = vld [vmem:[#allocation5 + $0x3d0] sm:$0xf] }
 0x121   :  { %3209 = vmatpush.bf16.msrb.mxu3 %v6589_v26  ;;  %3230 = vmatpush.bf16.msra.mxu1 %v7325_v28  ;;  %v9374_v52 = vld [vmem:[#allocation5 + $0xb4c] sm:$0xf]  ;;  %v7261_v60 = vor.u32 %v9310_v49, %v7258_v51 }
 0x122   :  { %3168 = vmatmul.bf16.vlgmr.msrb.gmra.mxu0 %v10065_v41  ;;  %v7514_v53 = vld [vmem:[#allocation5 + $0xb68] sm:$0xf0]  ;;  %3196 = vmatmul.bf16.vlgmr.msrb.gmra.mxu2 %v10057_v11  ;;  %v10103_v40 = vadd.f32 %v2973_v35, %v2960_v21  ;;  %v9131_v35 = vld [vmem:[#allocation5 + $0x3ac] sm:$0xf0] }
 0x123   :  { %3216 = vmatpush.bf16.msra.mxu0 %v7069_v27  ;;  %3244 = vmatpush.bf16.msra.mxu2 %v7581_v29  ;;  %v9438_v55 = vld [vmem:[#allocation5 + $0xd4c] sm:$0xf]  ;;  %v7517_v61 = vor.u32 %v9374_v52, %v7514_v53  ;;  %v10105_v52 = vpop.f32.mrf.mxu3 }
 0x124   :  { %v7770_v56 = vld [vmem:[#allocation5 + $0xd68] sm:$0xf0]  ;;  %3210 = vmatmul.bf16.vlgmr.msrb.gmra.mxu3 %v10053_v0  ;;  %10410 = vst [vmem:[#allocation20_spill] sm:$0xff] %v10103_v40 }
 0x125   :  { %3258 = vmatpush.bf16.msra.mxu3 %v7837_v34  ;;  %3231 = vmatpush.bf16.msra.mxu1 %v7293_v45  ;;  %v9238_v62 = vld [vmem:[#allocation5 + $0x70c] sm:$0xf]  ;;  %v7773_v3 = vor.u32 %v9438_v55, %v7770_v56 }
 0x126   :  { %v6970_v1 = vld [vmem:[#allocation5 + $0x728] sm:$0xf0] }
 0x127   :  { %3217 = vmatpush.bf16.msra.mxu0 %v7037_v44  ;;  %3245 = vmatpush.bf16.msra.mxu2 %v7549_v46  ;;  %v9302_v2 = vld [vmem:[#allocation5 + $0x90c] sm:$0xf]  ;;  %v6973_v12 = vor.u32 %v9238_v62, %v6970_v1 }
 0x128   :  { %v7226_v4 = vld [vmem:[#allocation5 + $0x928] sm:$0xf0] }
 0x129   :  { %3259 = vmatpush.bf16.msra.mxu3 %v7805_v50  ;;  %v9366_v5 = vld [vmem:[#allocation5 + $0xb0c] sm:$0xf]  ;;  %3232 = vmatpush.bf16.msra.mxu1 %v7261_v60  ;;  %v7229_v13 = vor.u32 %v9302_v2, %v7226_v4 }
 0x12a   :  { %v7482_v6 = vld [vmem:[#allocation5 + $0xb28] sm:$0xf0] }
 0x12b   :  { %v9430_v8 = vld [vmem:[#allocation5 + $0xd0c] sm:$0xf]  ;;  %3218 = vmatpush.bf16.msra.mxu0 %v7005_v58  ;;  %3246 = vmatpush.bf16.msra.mxu2 %v7517_v61  ;;  %v7485_v14 = vor.u32 %v9366_v5, %v7482_v6 }
 0x12c   :  { %v7738_v9 = vld [vmem:[#allocation5 + $0xd28] sm:$0xf0] }
 0x12d   :  { %v9230_v17 = vld [vmem:[#allocation5 + $0x6cc] sm:$0xf]  ;;  %3260 = vmatpush.bf16.msra.mxu3 %v7773_v3  ;;  %v7741_v20 = vor.u32 %v9430_v8, %v7738_v9  ;;  %3233 = vmatpush.bf16.msra.mxu1 %v7229_v13  ;;  %v6304_v13 = vld [vmem:[#allocation5 + $0x1d0] sm:$0xf] }
 0x12e   :  { %v6938_v18 = vld [vmem:[#allocation5 + $0x6e8] sm:$0xf0] }
 0x12f   :  { %v9294_v19 = vld [vmem:[#allocation5 + $0x8cc] sm:$0xf]  ;;  %3219 = vmatpush.bf16.msra.mxu0 %v6973_v12  ;;  %v6941_v28 = vor.u32 %v9230_v17, %v6938_v18  ;;  %3247 = vmatpush.bf16.msra.mxu2 %v7485_v14  ;;  %v9075_v14 = vld [vmem:[#allocation5 + $0x1ec] sm:$0xf0] }
 0x130   :  { %v7194_v22 = vld [vmem:[#allocation5 + $0x8e8] sm:$0xf0]  ;;  %v9139_v18 = vld [vmem:[#allocation5 + $0x3ec] sm:$0xf0] }
 0x131   :  { %v9358_v24 = vld [vmem:[#allocation5 + $0xacc] sm:$0xf]  ;;  %v7197_v16 = vor.u32 %v9294_v19, %v7194_v22  ;;  %3261 = vmatpush.bf16.msra.mxu3 %v7741_v20  ;;  %v6816_v19 = vld [vmem:[#allocation5 + $0x5d0] sm:$0xf] }
 0x132   :  { %v7450_v25 = vld [vmem:[#allocation5 + $0xae8] sm:$0xf0]  ;;  %v9203_v20 = vld [vmem:[#allocation5 + $0x5ec] sm:$0xf0] }
 0x133   :  { %v9422_v26 = vld [vmem:[#allocation5 + $0xccc] sm:$0xf]  ;;  %v7453_v29 = vor.u32 %v9358_v24, %v7450_v25  ;;  %3220 = vmatpush.bf16.msra.mxu0 %v6941_v28  ;;  %3234 = vmatpush.bf16.msra.mxu1 %v7197_v16  ;;  %v7072_v24 = vld [vmem:[#allocation5 + $0x7d0] sm:$0xf]  ;;  %v2987_v28 = vpop.f32.mrf.mxu3  ;;  %v6561_v16 = vor.u32 %v9139_v18, %v6560_v15 }
 0x134   :  { %v7706_v27 = vld [vmem:[#allocation5 + $0xce8] sm:$0xf0]  ;;  %v9267_v25 = vld [vmem:[#allocation5 + $0x7ec] sm:$0xf0] }
 0x135   :  { %v9222_v31 = vld [vmem:[#allocation5 + $0x68c] sm:$0xf]  ;;  %v7709_v34 = vor.u32 %v9422_v26, %v7706_v27  ;;  %3248 = vmatpush.bf16.msra.mxu2 %v7453_v29  ;;  %v6305_v27 = vor.u32 %v9075_v14, %v6304_v13  ;;  %v6817_v29 = vor.u32 %v9203_v20, %v6816_v19  ;;  %v9115_v13 = vld [vmem:[#allocation5 + $0x32c] sm:$0xf0] }
 0x136   :  { %v6906_v32 = vld [vmem:[#allocation5 + $0x6a8] sm:$0xf0]  ;;  %v6720_v14 = vld [vmem:[#allocation5 + $0x510] sm:$0xf] }
 0x137   :  { %v9286_v33 = vld [vmem:[#allocation5 + $0x88c] sm:$0xf]  ;;  %v6909_v46 = vor.u32 %v9222_v31, %v6906_v32  ;;  %3262 = vmatpush.bf16.msra.mxu3 %v7709_v34  ;;  %v6272_v31 = vld [vmem:[#allocation5 + $0x190] sm:$0xf]  ;;  %v7073_v34 = vor.u32 %v9267_v25, %v7072_v24 }
 0x138   :  { %v7162_v36 = vld [vmem:[#allocation5 + $0x8a8] sm:$0xf0]  ;;  %v9067_v32 = vld [vmem:[#allocation5 + $0x1ac] sm:$0xf0] }
 0x139   :  { %v9350_v38 = vld [vmem:[#allocation5 + $0xa8c] sm:$0xf]  ;;  %v7165_v47 = vor.u32 %v9286_v33, %v7162_v36  ;;  %3221 = vmatpush.bf16.msra.mxu0 %v6909_v46  ;;  %v6528_v33 = vld [vmem:[#allocation5 + $0x390] sm:$0xf]  ;;  %v10408_v46 = vperm.slane %v10081_v54, 1 }
 0x13a   :  { %v7418_v39 = vld [vmem:[#allocation5 + $0xaa8] sm:$0xf0]  ;;  %v6784_v36 = vld [vmem:[#allocation5 + $0x590] sm:$0xf] }
 0x13b   :  { %v9414_v44 = vld [vmem:[#allocation5 + $0xc8c] sm:$0xf]  ;;  %v7421_v48 = vor.u32 %v9350_v38, %v7418_v39  ;;  %3235 = vmatpush.bf16.msra.mxu1 %v7165_v47  ;;  %v9195_v38 = vld [vmem:[#allocation5 + $0x5ac] sm:$0xf0]  ;;  %v10107_v39 = vpop.f32.mrf.mxu0  ;;  %v6273_v47 = vor.u32 %v9067_v32, %v6272_v31 }
 0x13c   :  { %v7674_v45 = vld [vmem:[#allocation5 + $0xca8] sm:$0xf0]  ;;  %v9179_v15 = vld [vmem:[#allocation5 + $0x52c] sm:$0xf0] }
 0x13d   :  { %v9214_v49 = vld [vmem:[#allocation5 + $0x64c] sm:$0xf]  ;;  %v7677_v53 = vor.u32 %v9414_v44, %v7674_v45  ;;  %3249 = vmatpush.bf16.msra.mxu2 %v7421_v48  ;;  %v7040_v44 = vld [vmem:[#allocation5 + $0x790] sm:$0xf]  ;;  %v10110_v48 = vpop.f32.mrf.mxu1  ;;  %v6721_v24 = vor.u32 %v9179_v15, %v6720_v14 }
 0x13e   :  { %v6874_v50 = vld [vmem:[#allocation5 + $0x668] sm:$0xf0]  ;;  %v9259_v45 = vld [vmem:[#allocation5 + $0x7ac] sm:$0xf0] }
 0x13f   :  { %v9278_v51 = vld [vmem:[#allocation5 + $0x84c] sm:$0xf]  ;;  %v6877_v62 = vor.u32 %v9214_v49, %v6874_v50  ;;  %3263 = vmatpush.bf16.msra.mxu3 %v7677_v53  ;;  %v6529_v49 = vor.u32 %v9131_v35, %v6528_v33  ;;  %v6785_v50 = vor.u32 %v9195_v38, %v6784_v36  ;;  %v9059_v53 = vld [vmem:[#allocation5 + $0x16c] sm:$0xf0] }
 0x140   :  { %v7130_v55 = vld [vmem:[#allocation5 + $0x868] sm:$0xf0]  ;;  %v6976_v18 = vld [vmem:[#allocation5 + $0x710] sm:$0xf] }
 0x141   :  { %v9342_v56 = vld [vmem:[#allocation5 + $0xa4c] sm:$0xf]  ;;  %v7133_v3 = vor.u32 %v9278_v51, %v7130_v55  ;;  %3222 = vmatpush.bf16.msra.mxu0 %v6877_v62  ;;  %v6240_v51 = vld [vmem:[#allocation5 + $0x150] sm:$0xf] }
 0x142   :  { %v7386_v58 = vld [vmem:[#allocation5 + $0xa68] sm:$0xf0]  ;;  %v6496_v55 = vld [vmem:[#allocation5 + $0x350] sm:$0xf] }
 0x143   :  { %v9406_v60 = vld [vmem:[#allocation5 + $0xc4c] sm:$0xf]  ;;  %v7389_v4 = vor.u32 %v9342_v56, %v7386_v58  ;;  %3236 = vmatpush.bf16.msra.mxu1 %v7133_v3  ;;  %v7041_v56 = vor.u32 %v9259_v45, %v7040_v44  ;;  %v9123_v58 = vld [vmem:[#allocation5 + $0x36c] sm:$0xf0]  ;;  %v6241_v3 = vor.u32 %v9059_v53, %v6240_v51 }
 0x144   :  { %v7642_v61 = vld [vmem:[#allocation5 + $0xc68] sm:$0xf0]  ;;  %v7008_v62 = vld [vmem:[#allocation5 + $0x750] sm:$0xf] }
 0x145   :  { %v9206_v1 = vld [vmem:[#allocation5 + $0x60c] sm:$0xf]  ;;  %v7645_v8 = vor.u32 %v9406_v60, %v7642_v61  ;;  %3250 = vmatpush.bf16.msra.mxu2 %v7389_v4  ;;  %v6752_v60 = vld [vmem:[#allocation5 + $0x550] sm:$0xf]  ;;  %v6497_v4 = vor.u32 %v9123_v58, %v6496_v55  ;;  %v3015_v25 = vpop.f32.mrf.mxu1 }
 0x146   :  { %v6842_v2 = vld [vmem:[#allocation5 + $0x628] sm:$0xf0]  ;;  %v9187_v61 = vld [vmem:[#allocation5 + $0x56c] sm:$0xf0] }
 0x147   :  { %v9270_v5 = vld [vmem:[#allocation5 + $0x80c] sm:$0xf]  ;;  %v6845_v17 = vor.u32 %v9206_v1, %v6842_v2  ;;  %3264 = vmatpush.bf16.msra.mxu3 %v7645_v8  ;;  %v9251_v1 = vld [vmem:[#allocation5 + $0x76c] sm:$0xf0]  ;;  %v2988_v2 = vadd.f32 %v2987_v28, %v10408_v46  ;;  %v6634_v46 = vld [vmem:[#allocation5 + $0x478] sm:$0xf0] }
 0x148   :  { %v7098_v6 = vld [vmem:[#allocation5 + $0x828] sm:$0xf0]  ;;  %v6464_v8 = vld [vmem:[#allocation5 + $0x310] sm:$0xf] }
 0x149   :  { %v9334_v7 = vld [vmem:[#allocation5 + $0xa0c] sm:$0xf]  ;;  %v7101_v21 = vor.u32 %v9270_v5, %v7098_v6  ;;  %3223 = vmatpush.bf16.msra.mxu0 %v6845_v17  ;;  %v6753_v5 = vor.u32 %v9187_v61, %v6752_v60  ;;  %v6208_v6 = vld [vmem:[#allocation5 + $0x110] sm:$0xf]  ;;  %v3001_v17 = vpop.f32.mrf.mxu0 }
 0x14a   :  { %v7354_v9 = vld [vmem:[#allocation5 + $0xa28] sm:$0xf0]  ;;  %v9243_v19 = vld [vmem:[#allocation5 + $0x72c] sm:$0xf0]  ;;  %v3002_v20 = vadd.f32 %v3001_v17, %v2988_v2 }
 0x14b   :  { %v9398_v10 = vld [vmem:[#allocation5 + $0xc0c] sm:$0xf]  ;;  %v7357_v22 = vor.u32 %v9334_v7, %v7354_v9  ;;  %3237 = vmatpush.bf16.msra.mxu1 %v7101_v21  ;;  %v9051_v7 = vld [vmem:[#allocation5 + $0x12c] sm:$0xf0]  ;;  %v10118_v9 = vpop.f32.mrf.mxu2 }
 0x14c   :  { %v7610_v12 = vld [vmem:[#allocation5 + $0xc28] sm:$0xf0]  ;;  %3224 = vmatmul.bf16.vlgmr.msra.gmra.mxu0 %v10060_v23  ;;  %10411 = vst [vmem:[#allocation21_spill] sm:$0xff] %v10118_v9  ;;  %v6209_v21 = vor.u32 %v9051_v7, %v6208_v6  ;;  %v6432_v28 = vld [vmem:[#allocation5 + $0x2d0] sm:$0xf] }
 0x14d   :  { %v7613_v26 = vor.u32 %v9398_v10, %v7610_v12  ;;  %3251 = vmatpush.bf16.msra.mxu2 %v7357_v22  ;;  %3272 = vmatpush.bf16.msrb.mxu0 %v6305_v27  ;;  %v7009_v10 = vor.u32 %v9251_v1, %v7008_v62  ;;  %v10120_v12 = vpop.f32.mrf.mxu3  ;;  %v6465_v22 = vor.u32 %v9115_v13, %v6464_v8  ;;  %v9043_v27 = vld [vmem:[#allocation5 + $0xec] sm:$0xf0]  ;;  %v7306_v9 = vld [vmem:[#allocation5 + $0x9b8] sm:$0xf0] }
 0x14e   :  { %3238 = vmatmul.bf16.vlgmr.msra.gmra.mxu1 %v10063_v37  ;;  %v9107_v31 = vld [vmem:[#allocation5 + $0x2ec] sm:$0xf0] }
 0x14f   :  { %3265 = vmatpush.bf16.msra.mxu3 %v7613_v26  ;;  %3286 = vmatpush.bf16.msrb.mxu1 %v6561_v16  ;;  %v6176_v26 = vld [vmem:[#allocation5 + $0xd0] sm:$0xf]  ;;  %v6977_v16 = vor.u32 %v9243_v19, %v6976_v18  ;;  %v6433_v38 = vor.u32 %v9107_v31, %v6432_v28 }
 0x150   :  { %3252 = vmatmul.bf16.vlgmr.msra.gmra.mxu2 %v10067_v42  ;;  %v6688_v32 = vld [vmem:[#allocation5 + $0x4d0] sm:$0xf]  ;;  %v6177_v36 = vor.u32 %v9043_v27, %v6176_v26 }
 0x151   :  { %3300 = vmatpush.bf16.msrb.mxu2 %v6817_v29  ;;  %3273 = vmatpush.bf16.msrb.mxu0 %v6273_v47  ;;  %v3016_v29 = vadd.f32 %v3015_v25, %v3002_v20  ;;  %v9171_v33 = vld [vmem:[#allocation5 + $0x4ec] sm:$0xf0] }
 0x152   :  { %3266 = vmatmul.bf16.vlgmr.msra.gmra.mxu3 %v10065_v41  ;;  %v9235_v35 = vld [vmem:[#allocation5 + $0x6ec] sm:$0xf0]  ;;  %v6689_v44 = vor.u32 %v9171_v33, %v6688_v32 }
 0x153   :  { %3314 = vmatpush.bf16.msrb.mxu3 %v7073_v34  ;;  %3287 = vmatpush.bf16.msrb.mxu1 %v6529_v49  ;;  %v6944_v34 = vld [vmem:[#allocation5 + $0x6d0] sm:$0xf]  ;;  %v3029_v51 = vpop.f32.mrf.mxu2 }
 0x154   :  { %v6144_v45 = vld [vmem:[#allocation5 + $0x90] sm:$0xf]  ;;  %v3030_v58 = vadd.f32 %v3029_v51, %v3016_v29 }
 0x155   :  { %3301 = vmatpush.bf16.msrb.mxu2 %v6785_v50  ;;  %3274 = vmatpush.bf16.msrb.mxu0 %v6241_v3  ;;  %v9035_v47 = vld [vmem:[#allocation5 + $0xac] sm:$0xf0]  ;;  %v6945_v50 = vor.u32 %v9235_v35, %v6944_v34  ;;  %v3043_v62 = vpop.f32.mrf.mxu3 }
 0x156   :  { %v6400_v49 = vld [vmem:[#allocation5 + $0x290] sm:$0xf]  ;;  %v6145_v1 = vor.u32 %v9035_v47, %v6144_v45  ;;  %v10122_v2 = vadd.f32 %v3043_v62, %v3030_v58  ;;  %v9071_v47 = vld [vmem:[#allocation5 + $0x1d4] sm:$0xf] }
 0x157   :  { %3315 = vmatpush.bf16.msrb.mxu3 %v7041_v56  ;;  %3288 = vmatpush.bf16.msrb.mxu1 %v6497_v4  ;;  %v9099_v53 = vld [vmem:[#allocation5 + $0x2ac] sm:$0xf0] }
 0x158   :  { %v6656_v55 = vld [vmem:[#allocation5 + $0x490] sm:$0xf]  ;;  %v6401_v3 = vor.u32 %v9099_v53, %v6400_v49  ;;  %v6306_v49 = vld [vmem:[#allocation5 + $0x1f0] sm:$0xf0] }
 0x159   :  { %3302 = vmatpush.bf16.msrb.mxu2 %v6753_v5  ;;  %3275 = vmatpush.bf16.msrb.mxu0 %v6209_v21  ;;  %v9163_v56 = vld [vmem:[#allocation5 + $0x4ac] sm:$0xf0] }
 0x15a   :  { %v6912_v60 = vld [vmem:[#allocation5 + $0x690] sm:$0xf]  ;;  %v6657_v4 = vor.u32 %v9163_v56, %v6656_v55 }
 0x15b   :  { %3316 = vmatpush.bf16.msrb.mxu3 %v7009_v10  ;;  %3289 = vmatpush.bf16.msrb.mxu1 %v6465_v22  ;;  %v9227_v61 = vld [vmem:[#allocation5 + $0x6ac] sm:$0xf0] }
 0x15c   :  { %v6112_v5 = vld [vmem:[#allocation5 + $0x50] sm:$0xf]  ;;  %v6913_v8 = vor.u32 %v9227_v61, %v6912_v60  ;;  %v6309_v61 = vor.u32 %v9071_v47, %v6306_v49 }
 0x15d   :  { %3303 = vmatpush.bf16.msrb.mxu2 %v6721_v24  ;;  %3276 = vmatpush.bf16.msrb.mxu0 %v6177_v36  ;;  %v9027_v6 = vld [vmem:[#allocation5 + $0x6c] sm:$0xf0] }
 0x15e   :  { %v6368_v7 = vld [vmem:[#allocation5 + $0x250] sm:$0xf]  ;;  %v6113_v18 = vor.u32 %v9027_v6, %v6112_v5  ;;  %v9063_v5 = vld [vmem:[#allocation5 + $0x194] sm:$0xf] }
 0x15f   :  { %3317 = vmatpush.bf16.msrb.mxu3 %v6977_v16  ;;  %3290 = vmatpush.bf16.msrb.mxu1 %v6433_v38  ;;  %v9091_v10 = vld [vmem:[#allocation5 + $0x26c] sm:$0xf0]  ;;  %v6274_v6 = vld [vmem:[#allocation5 + $0x1b0] sm:$0xf0] }
 0x160   :  { %v6624_v13 = vld [vmem:[#allocation5 + $0x450] sm:$0xf]  ;;  %v6369_v21 = vor.u32 %v9091_v10, %v6368_v7  ;;  %v10126_v7 = vpop.f32.mrf.mxu1 }
 0x161   :  { %3304 = vmatpush.bf16.msrb.mxu2 %v6689_v44  ;;  %v9155_v14 = vld [vmem:[#allocation5 + $0x46c] sm:$0xf0]  ;;  %3277 = vmatpush.bf16.msrb.mxu0 %v6145_v1 }
 0x162   :  { %v6880_v15 = vld [vmem:[#allocation5 + $0x650] sm:$0xf]  ;;  %v6625_v22 = vor.u32 %v9155_v14, %v6624_v13 }
 0x163   :  { %3318 = vmatpush.bf16.msrb.mxu3 %v6945_v50  ;;  %v9219_v17 = vld [vmem:[#allocation5 + $0x66c] sm:$0xf0]  ;;  %3291 = vmatpush.bf16.msrb.mxu1 %v6401_v3 }
 0x164   :  { %v6080_v19 = vld [vmem:[#allocation5 + $0x10] sm:$0xf]  ;;  %v6881_v27 = vor.u32 %v9219_v17, %v6880_v15 }
 0x165   :  { %v9019_v20 = vld [vmem:[#allocation5 + $0x2c] sm:$0xf0]  ;;  %3305 = vmatpush.bf16.msrb.mxu2 %v6657_v4  ;;  %3278 = vmatpush.bf16.msrb.mxu0 %v6113_v18  ;;  %v10124_v4 = vpop.f32.mrf.mxu0  ;;  %v6277_v18 = vor.u32 %v9063_v5, %v6274_v6  ;;  %v9039_v5 = vld [vmem:[#allocation5 + $0xd4] sm:$0xf] }
 0x166   :  { %v6336_v24 = vld [vmem:[#allocation5 + $0x210] sm:$0xf]  ;;  %v6081_v34 = vor.u32 %v9019_v20, %v6080_v19  ;;  %v6178_v6 = vld [vmem:[#allocation5 + $0xf0] sm:$0xf0] }
 0x167   :  { %v9083_v25 = vld [vmem:[#allocation5 + $0x22c] sm:$0xf0]  ;;  %3319 = vmatpush.bf16.msrb.mxu3 %v6913_v8  ;;  %3292 = vmatpush.bf16.msrb.mxu1 %v6369_v21 }
 0x168   :  { %v6592_v26 = vld [vmem:[#allocation5 + $0x410] sm:$0xf]  ;;  %v6337_v44 = vor.u32 %v9083_v25, %v6336_v24  ;;  %v6242_v24 = vld [vmem:[#allocation5 + $0x170] sm:$0xf0] }
 0x169   :  { %v9147_v28 = vld [vmem:[#allocation5 + $0x42c] sm:$0xf0]  ;;  %3306 = vmatpush.bf16.msrb.mxu2 %v6625_v22  ;;  %3279 = vmatpush.bf16.msrb.mxu0 %v6081_v34  ;;  %v9055_v22 = vld [vmem:[#allocation5 + $0x154] sm:$0xf] }
 0x16a   :  { %v6848_v16 = vld [vmem:[#allocation5 + $0x610] sm:$0xf]  ;;  %v6593_v45 = vor.u32 %v9147_v28, %v6592_v26 }
 0x16b   :  { %v9211_v29 = vld [vmem:[#allocation5 + $0x62c] sm:$0xf0]  ;;  %3320 = vmatpush.bf16.msrb.mxu3 %v6881_v27  ;;  %3293 = vmatpush.bf16.msrb.mxu1 %v6337_v44  ;;  %v6210_v44 = vld [vmem:[#allocation5 + $0x130] sm:$0xf0] }
 0x16c   :  { %v7328_v31 = vld [vmem:[#allocation5 + $0x9d0] sm:$0xf]  ;;  %v6849_v50 = vor.u32 %v9211_v29, %v6848_v16  ;;  %3280 = vmatmul.bf16.vlgmr.msrb.gmra.mxu0 %v10051_v57 }
 0x16d   :  { %v9331_v32 = vld [vmem:[#allocation5 + $0x9ec] sm:$0xf0]  ;;  %3307 = vmatpush.bf16.msrb.mxu2 %v6593_v45  ;;  %v10134_v45 = vpop.f32.mrf.mxu3 }
 0x16e   :  { %v7584_v33 = vld [vmem:[#allocation5 + $0xbd0] sm:$0xf]  ;;  %v7329_v51 = vor.u32 %v9331_v32, %v7328_v31  ;;  %3294 = vmatmul.bf16.vlgmr.msrb.gmra.mxu1 %v10057_v11  ;;  %v10132_v31 = vpop.f32.mrf.mxu2  ;;  %v6245_v32 = vor.u32 %v9055_v22, %v6242_v24  ;;  %v9031_v24 = vld [vmem:[#allocation5 + $0x94] sm:$0xf] }
 0x16f   :  { %v9395_v35 = vld [vmem:[#allocation5 + $0xbec] sm:$0xf0]  ;;  %3321 = vmatpush.bf16.msrb.mxu3 %v6849_v50  ;;  %v3071_v50 = vpop.f32.mrf.mxu1 }
 0x170   :  { %v7840_v36 = vld [vmem:[#allocation5 + $0xdd0] sm:$0xf]  ;;  %v7585_v53 = vor.u32 %v9395_v35, %v7584_v33  ;;  %3328 = vmatpush.bf16.msra.mxu0 %v7329_v51  ;;  %3308 = vmatmul.bf16.vlgmr.msrb.gmra.mxu2 %v10053_v0 }
 0x171   :  { %v9459_v38 = vld [vmem:[#allocation5 + $0xdec] sm:$0xf0] }
 0x172   :  { %v7841_v55 = vor.u32 %v9459_v38, %v7840_v36  ;;  %v7296_v56 = vld [vmem:[#allocation5 + $0x990] sm:$0xf]  ;;  %3342 = vmatpush.bf16.msra.mxu1 %v7585_v53  ;;  %3322 = vmatmul.bf16.vlgmr.msrb.gmra.mxu3 %v10060_v23  ;;  %v3057_v36 = vpop.f32.mrf.mxu0  ;;  %v9047_v38 = vld [vmem:[#allocation5 + $0x114] sm:$0xf] }
 0x173   :  { %v9323_v58 = vld [vmem:[#allocation5 + $0x9ac] sm:$0xf0]  ;;  %3370 = vmatpush.bf16.msra.mxu3 %v6309_v61  ;;  %v3058_v47 = vadd.f32 %v3057_v36, %v10122_v2  ;;  %v10407_v2 = vperm.slane %v10081_v54, 2 }
 0x174   :  { %v7552_v60 = vld [vmem:[#allocation5 + $0xb90] sm:$0xf]  ;;  %v7297_v8 = vor.u32 %v9323_v58, %v7296_v56  ;;  %3356 = vmatpush.bf16.msra.mxu2 %v7841_v55 }
 0x175   :  { %v9387_v62 = vld [vmem:[#allocation5 + $0xbac] sm:$0xf0]  ;;  %v10137_v61 = vadd.f32 %v3071_v50, %v3058_v47  ;;  %v6114_v50 = vld [vmem:[#allocation5 + $0x70] sm:$0xf0] }
 0x176   :  { %v7808_v1 = vld [vmem:[#allocation5 + $0xd90] sm:$0xf]  ;;  %v7553_v10 = vor.u32 %v9387_v62, %v7552_v60  ;;  %3329 = vmatpush.bf16.msra.mxu0 %v7297_v8  ;;  %v6213_v60 = vor.u32 %v9047_v38, %v6210_v44  ;;  %v3085_v22 = vpop.f32.mrf.mxu2 }
 0x177   :  { %v9451_v3 = vld [vmem:[#allocation5 + $0xdac] sm:$0xf0]  ;;  %3371 = vmatpush.bf16.msra.mxu3 %v6277_v18  ;;  %10412 = vst [vmem:[#allocation22_spill] sm:$0xff] %v10137_v61  ;;  %v6181_v18 = vor.u32 %v9039_v5, %v6178_v6  ;;  %v9015_v6 = vld [vmem:[#allocation5 + $0x14] sm:$0xf] }
 0x178   :  { %v7809_v13 = vor.u32 %v9451_v3, %v7808_v1  ;;  %v7264_v14 = vld [vmem:[#allocation5 + $0x950] sm:$0xf]  ;;  %3343 = vmatpush.bf16.msra.mxu1 %v7553_v10 }
 0x179   :  { %v9315_v15 = vld [vmem:[#allocation5 + $0x96c] sm:$0xf0] }
 0x17a   :  { %v7520_v17 = vld [vmem:[#allocation5 + $0xb50] sm:$0xf]  ;;  %v7265_v25 = vor.u32 %v9315_v15, %v7264_v14  ;;  %3357 = vmatpush.bf16.msra.mxu2 %v7809_v13 }
 0x17b   :  { %v9379_v19 = vld [vmem:[#allocation5 + $0xb6c] sm:$0xf0]  ;;  %3372 = vmatpush.bf16.msra.mxu3 %v6245_v32 }
 0x17c   :  { %v7776_v20 = vld [vmem:[#allocation5 + $0xd50] sm:$0xf]  ;;  %v7521_v26 = vor.u32 %v9379_v19, %v7520_v17  ;;  %3330 = vmatpush.bf16.msra.mxu0 %v7265_v25  ;;  %v6146_v25 = vld [vmem:[#allocation5 + $0xb0] sm:$0xf0] }
 0x17d   :  { %v9443_v21 = vld [vmem:[#allocation5 + $0xd6c] sm:$0xf0]  ;;  %v6149_v36 = vor.u32 %v9031_v24, %v6146_v25  ;;  %v7330_v24 = vld [vmem:[#allocation5 + $0x9f0] sm:$0xf0] }
 0x17e   :  { %v7777_v27 = vor.u32 %v9443_v21, %v7776_v20  ;;  %v7232_v28 = vld [vmem:[#allocation5 + $0x910] sm:$0xf]  ;;  %3344 = vmatpush.bf16.msra.mxu1 %v7521_v26  ;;  %v3086_v26 = vadd.f32 %v3085_v22, %v10407_v2  ;;  %v9327_v22 = vld [vmem:[#allocation5 + $0x9d4] sm:$0xf]  ;;  %v9152_v2 = vld [vmem:[#allocation5 + $0x45c] sm:$0xf] }
 0x17f   :  { %v9307_v16 = vld [vmem:[#allocation5 + $0x92c] sm:$0xf0]  ;;  %3373 = vmatpush.bf16.msra.mxu3 %v6213_v60 }
 0x180   :  { %v7488_v29 = vld [vmem:[#allocation5 + $0xb10] sm:$0xf]  ;;  %v7233_v49 = vor.u32 %v9307_v16, %v7232_v28  ;;  %3358 = vmatpush.bf16.msra.mxu2 %v7777_v27  ;;  %v3099_v28 = vpop.f32.mrf.mxu3 }
 0x181   :  { %v9371_v33 = vld [vmem:[#allocation5 + $0xb2c] sm:$0xf0] }
 0x182   :  { %v7744_v34 = vld [vmem:[#allocation5 + $0xd10] sm:$0xf]  ;;  %v7489_v51 = vor.u32 %v9371_v33, %v7488_v29  ;;  %3331 = vmatpush.bf16.msra.mxu0 %v7233_v49  ;;  %v9023_v49 = vld [vmem:[#allocation5 + $0x54] sm:$0xf] }
 0x183   :  { %v9435_v35 = vld [vmem:[#allocation5 + $0xd2c] sm:$0xf0]  ;;  %3374 = vmatpush.bf16.msra.mxu3 %v6181_v18  ;;  %v9263_v18 = vld [vmem:[#allocation5 + $0x7d4] sm:$0xf] }
 0x184   :  { %v7745_v53 = vor.u32 %v9435_v35, %v7744_v34  ;;  %v7200_v55 = vld [vmem:[#allocation5 + $0x8d0] sm:$0xf]  ;;  %3345 = vmatpush.bf16.msra.mxu1 %v7489_v51  ;;  %v10142_v35 = vadd.f32 %v3099_v28, %v3086_v26 }
 0x185   :  { %v9299_v56 = vld [vmem:[#allocation5 + $0x8ec] sm:$0xf0] }
 0x186   :  { %v7456_v58 = vld [vmem:[#allocation5 + $0xad0] sm:$0xf]  ;;  %v7201_v8 = vor.u32 %v9299_v56, %v7200_v55  ;;  %3359 = vmatpush.bf16.msra.mxu2 %v7745_v53 }
 0x187   :  { %v9363_v62 = vld [vmem:[#allocation5 + $0xaec] sm:$0xf0]  ;;  %3375 = vmatpush.bf16.msra.mxu3 %v6149_v36  ;;  %v9255_v36 = vld [vmem:[#allocation5 + $0x794] sm:$0xf] }
 0x188   :  { %v7712_v1 = vld [vmem:[#allocation5 + $0xcd0] sm:$0xf]  ;;  %v7457_v10 = vor.u32 %v9363_v62, %v7456_v58  ;;  %3332 = vmatpush.bf16.msra.mxu0 %v7201_v8  ;;  %v6082_v8 = vld [vmem:[#allocation5 + $0x30] sm:$0xf0] }
 0x189   :  { %v9427_v3 = vld [vmem:[#allocation5 + $0xcec] sm:$0xf0]  ;;  %v6085_v25 = vor.u32 %v9015_v6, %v6082_v8  ;;  %v9311_v6 = vld [vmem:[#allocation5 + $0x954] sm:$0xf] }
 0x18a   :  { %v7713_v13 = vor.u32 %v9427_v3, %v7712_v1  ;;  %v7168_v14 = vld [vmem:[#allocation5 + $0x890] sm:$0xf]  ;;  %3346 = vmatpush.bf16.msra.mxu1 %v7457_v10  ;;  %v6117_v3 = vor.u32 %v9023_v49, %v6114_v50  ;;  %v9135_v10 = vld [vmem:[#allocation5 + $0x3d4] sm:$0xf] }
 0x18b   :  { %v9291_v15 = vld [vmem:[#allocation5 + $0x8ac] sm:$0xf0]  ;;  %v7298_v49 = vld [vmem:[#allocation5 + $0x9b0] sm:$0xf0] }
 0x18c   :  { %v7424_v17 = vld [vmem:[#allocation5 + $0xa90] sm:$0xf]  ;;  %v7169_v27 = vor.u32 %v9291_v15, %v7168_v14  ;;  %3360 = vmatpush.bf16.msra.mxu2 %v7713_v13  ;;  %v6562_v13 = vld [vmem:[#allocation5 + $0x3f0] sm:$0xf0]  ;;  %3376 = vmatpush.bf16.msra.mxu3 %v6117_v3 }
 0x18d   :  { %v9355_v19 = vld [vmem:[#allocation5 + $0xaac] sm:$0xf0]  ;;  %v9199_v14 = vld [vmem:[#allocation5 + $0x5d4] sm:$0xf]  ;;  %v6565_v26 = vor.u32 %v9135_v10, %v6562_v13 }
 0x18e   :  { %v7680_v20 = vld [vmem:[#allocation5 + $0xc90] sm:$0xf]  ;;  %v7425_v16 = vor.u32 %v9355_v19, %v7424_v17  ;;  %3333 = vmatpush.bf16.msra.mxu0 %v7169_v27  ;;  %v6818_v17 = vld [vmem:[#allocation5 + $0x5f0] sm:$0xf0] }
 0x18f   :  { %v9419_v21 = vld [vmem:[#allocation5 + $0xcac] sm:$0xf0]  ;;  %v7074_v19 = vld [vmem:[#allocation5 + $0x7f0] sm:$0xf0]  ;;  %v6821_v27 = vor.u32 %v9199_v14, %v6818_v17 }
 0x190   :  { %v7681_v29 = vor.u32 %v9419_v21, %v7680_v20  ;;  %v7136_v32 = vld [vmem:[#allocation5 + $0x850] sm:$0xf]  ;;  %3347 = vmatpush.bf16.msra.mxu1 %v7425_v16  ;;  %v7077_v28 = vor.u32 %v9263_v18, %v7074_v19  ;;  %v9127_v16 = vld [vmem:[#allocation5 + $0x394] sm:$0xf]  ;;  %3377 = vmatpush.bf16.msra.mxu3 %v6085_v25 }
 0x191   :  { %v9283_v33 = vld [vmem:[#allocation5 + $0x86c] sm:$0xf0]  ;;  %v9247_v3 = vld [vmem:[#allocation5 + $0x754] sm:$0xf] }
 0x192   :  { %v7392_v34 = vld [vmem:[#allocation5 + $0xa50] sm:$0xf]  ;;  %v7137_v51 = vor.u32 %v9283_v33, %v7136_v32  ;;  %3361 = vmatpush.bf16.msra.mxu2 %v7681_v29  ;;  %v6530_v29 = vld [vmem:[#allocation5 + $0x3b0] sm:$0xf0]  ;;  %v7333_v33 = vor.u32 %v9327_v22, %v7330_v24 }
 0x193   :  { %v9347_v38 = vld [vmem:[#allocation5 + $0xa6c] sm:$0xf0]  ;;  %v9191_v32 = vld [vmem:[#allocation5 + $0x594] sm:$0xf]  ;;  %v6533_v50 = vor.u32 %v9127_v16, %v6530_v29  ;;  %3378 = vmatmul.bf16.vlgmr.msra.gmra.mxu3 %v10051_v57 }
 0x194   :  { %v7648_v44 = vld [vmem:[#allocation5 + $0xc50] sm:$0xf]  ;;  %v7393_v56 = vor.u32 %v9347_v38, %v7392_v34  ;;  %3334 = vmatpush.bf16.msra.mxu0 %v7137_v51  ;;  %v6786_v34 = vld [vmem:[#allocation5 + $0x5b0] sm:$0xf0]  ;;  %v10146_v51 = vpop.f32.mrf.mxu1  ;;  %3426 = vmatpush.bf16.msrb.mxu3 %v7333_v33 }
 0x195   :  { %v9411_v47 = vld [vmem:[#allocation5 + $0xc6c] sm:$0xf0]  ;;  %v7042_v38 = vld [vmem:[#allocation5 + $0x7b0] sm:$0xf0]  ;;  %10413 = vst [vmem:[#allocation23_spill] sm:$0xff] %v10146_v51 }
 0x196   :  { %v7104_v53 = vld [vmem:[#allocation5 + $0x810] sm:$0xf]  ;;  %v7649_v58 = vor.u32 %v9411_v47, %v7648_v44  ;;  %3348 = vmatpush.bf16.msra.mxu1 %v7393_v56  ;;  %v10144_v44 = vpop.f32.mrf.mxu0  ;;  %v9319_v47 = vld [vmem:[#allocation5 + $0x994] sm:$0xf] }
 0x197   :  { %v9275_v55 = vld [vmem:[#allocation5 + $0x82c] sm:$0xf0]  ;;  %v9119_v56 = vld [vmem:[#allocation5 + $0x354] sm:$0xf] }
 0x198   :  { %v7360_v60 = vld [vmem:[#allocation5 + $0xa10] sm:$0xf]  ;;  %v7105_v15 = vor.u32 %v9275_v55, %v7104_v53  ;;  %3362 = vmatpush.bf16.msra.mxu2 %v7649_v58  ;;  %v6789_v53 = vor.u32 %v9191_v32, %v6786_v34  ;;  %v7045_v55 = vor.u32 %v9255_v36, %v7042_v38  ;;  %v6498_v58 = vld [vmem:[#allocation5 + $0x370] sm:$0xf0] }
 0x199   :  { %v9339_v62 = vld [vmem:[#allocation5 + $0xa2c] sm:$0xf0]  ;;  %v7266_v8 = vld [vmem:[#allocation5 + $0x970] sm:$0xf0]  ;;  %v6501_v10 = vor.u32 %v9119_v56, %v6498_v58 }
 0x19a   :  { %v7616_v1 = vld [vmem:[#allocation5 + $0xc10] sm:$0xf]  ;;  %v7361_v20 = vor.u32 %v9339_v62, %v7360_v60  ;;  %3335 = vmatpush.bf16.msra.mxu0 %v7105_v15  ;;  %v9183_v60 = vld [vmem:[#allocation5 + $0x554] sm:$0xf]  ;;  %v7301_v62 = vor.u32 %v9319_v47, %v7298_v49  ;;  %v7269_v19 = vor.u32 %v9311_v6, %v7266_v8 }
 0x19b   :  { %v9403_v5 = vld [vmem:[#allocation5 + $0xc2c] sm:$0xf0]  ;;  %v9111_v15 = vld [vmem:[#allocation5 + $0x314] sm:$0xf] }
 0x19c   :  { %v7617_v21 = vor.u32 %v9403_v5, %v7616_v1  ;;  %3349 = vmatpush.bf16.msra.mxu1 %v7361_v20  ;;  %v6754_v1 = vld [vmem:[#allocation5 + $0x570] sm:$0xf0]  ;;  %3427 = vmatpush.bf16.msrb.mxu3 %v7301_v62  ;;  %v3127_v32 = vpop.f32.mrf.mxu1 }
 0x19d   :  { %3336 = vmatmul.bf16.vlgmr.msra.gmra.mxu0 %v10063_v37  ;;  %v7010_v5 = vld [vmem:[#allocation5 + $0x770] sm:$0xf0]  ;;  %v6757_v13 = vor.u32 %v9183_v60, %v6754_v1 }
 0x19e   :  { %3363 = vmatpush.bf16.msra.mxu2 %v7617_v21  ;;  %3384 = vmatpush.bf16.msrb.mxu0 %v6565_v26  ;;  %v7013_v14 = vor.u32 %v9247_v3, %v7010_v5  ;;  %v6466_v17 = vld [vmem:[#allocation5 + $0x330] sm:$0xf0]  ;;  %v3113_v24 = vpop.f32.mrf.mxu0 }
 0x19f   :  { %3350 = vmatmul.bf16.vlgmr.msra.gmra.mxu1 %v10067_v42  ;;  %v9175_v18 = vld [vmem:[#allocation5 + $0x514] sm:$0xf] }
 0x1a0   :  { %3398 = vmatpush.bf16.msrb.mxu1 %v6821_v27  ;;  %v6722_v20 = vld [vmem:[#allocation5 + $0x530] sm:$0xf0]  ;;  %v3114_v27 = vadd.f32 %v3113_v24, %v10142_v35  ;;  %3428 = vmatpush.bf16.msrb.mxu3 %v7269_v19 }
 0x1a1   :  { %3364 = vmatmul.bf16.vlgmr.msra.gmra.mxu2 %v10065_v41  ;;  %v9239_v21 = vld [vmem:[#allocation5 + $0x714] sm:$0xf]  ;;  %v6725_v16 = vor.u32 %v9175_v18, %v6722_v20 }
 0x1a2   :  { %3412 = vmatpush.bf16.msrb.mxu2 %v7077_v28  ;;  %3385 = vmatpush.bf16.msrb.mxu0 %v6533_v50  ;;  %v6978_v22 = vld [vmem:[#allocation5 + $0x730] sm:$0xf0]  ;;  %v6469_v28 = vor.u32 %v9111_v15, %v6466_v17  ;;  %v10153_v47 = vadd.f32 %v3127_v32, %v3114_v27 }
 0x1a3   :  { %v9303_v25 = vld [vmem:[#allocation5 + $0x914] sm:$0xf]  ;;  %v6981_v29 = vor.u32 %v9239_v21, %v6978_v22 }
 0x1a4   :  { %3399 = vmatpush.bf16.msrb.mxu1 %v6789_v53  ;;  %v7234_v26 = vld [vmem:[#allocation5 + $0x930] sm:$0xf0] }
 0x1a5   :  { %v9103_v33 = vld [vmem:[#allocation5 + $0x2d4] sm:$0xf]  ;;  %v7237_v38 = vor.u32 %v9303_v25, %v7234_v26 }
 0x1a6   :  { %3413 = vmatpush.bf16.msrb.mxu2 %v7045_v55  ;;  %3386 = vmatpush.bf16.msrb.mxu0 %v6501_v10  ;;  %v6434_v34 = vld [vmem:[#allocation5 + $0x2f0] sm:$0xf0] }
 0x1a7   :  { %v9167_v36 = vld [vmem:[#allocation5 + $0x4d4] sm:$0xf]  ;;  %v6437_v35 = vor.u32 %v9103_v33, %v6434_v34  ;;  %3429 = vmatpush.bf16.msrb.mxu3 %v7237_v38 }
 0x1a8   :  { %3400 = vmatpush.bf16.msrb.mxu1 %v6757_v13  ;;  %v6690_v49 = vld [vmem:[#allocation5 + $0x4f0] sm:$0xf0] }
 0x1a9   :  { %v9231_v50 = vld [vmem:[#allocation5 + $0x6d4] sm:$0xf]  ;;  %v6693_v58 = vor.u32 %v9167_v36, %v6690_v49 }
 0x1aa   :  { %3414 = vmatpush.bf16.msrb.mxu2 %v7013_v14  ;;  %v6946_v53 = vld [vmem:[#allocation5 + $0x6f0] sm:$0xf0]  ;;  %3387 = vmatpush.bf16.msrb.mxu0 %v6469_v28 }
 0x1ab   :  { %v9295_v55 = vld [vmem:[#allocation5 + $0x8d4] sm:$0xf]  ;;  %v6949_v60 = vor.u32 %v9231_v50, %v6946_v53 }
 0x1ac   :  { %v7202_v56 = vld [vmem:[#allocation5 + $0x8f0] sm:$0xf0]  ;;  %3401 = vmatpush.bf16.msrb.mxu1 %v6725_v16 }
 0x1ad   :  { %v9095_v62 = vld [vmem:[#allocation5 + $0x294] sm:$0xf]  ;;  %v7205_v5 = vor.u32 %v9295_v55, %v7202_v56 }
 0x1ae   :  { %3415 = vmatpush.bf16.msrb.mxu2 %v6981_v29  ;;  %v6402_v1 = vld [vmem:[#allocation5 + $0x2b0] sm:$0xf0]  ;;  %3388 = vmatpush.bf16.msrb.mxu0 %v6437_v35 }
 0x1af   :  { %v9159_v3 = vld [vmem:[#allocation5 + $0x494] sm:$0xf]  ;;  %v6405_v15 = vor.u32 %v9095_v62, %v6402_v1  ;;  %3430 = vmatpush.bf16.msrb.mxu3 %v7205_v5  ;;  %v9076_v5 = vld [vmem:[#allocation5 + $0x1f4] sm:$0xf0] }
 0x1b0   :  { %v6658_v6 = vld [vmem:[#allocation5 + $0x4b0] sm:$0xf0]  ;;  %3402 = vmatpush.bf16.msrb.mxu1 %v6693_v58 }
 0x1b1   :  { %v9223_v8 = vld [vmem:[#allocation5 + $0x694] sm:$0xf]  ;;  %v6661_v17 = vor.u32 %v9159_v3, %v6658_v6  ;;  %v6312_v3 = vld [vmem:[#allocation5 + $0x1d8] sm:$0xf] }
 0x1b2   :  { %v6914_v10 = vld [vmem:[#allocation5 + $0x6b0] sm:$0xf0]  ;;  %3416 = vmatpush.bf16.msrb.mxu2 %v6949_v60  ;;  %3389 = vmatpush.bf16.msrb.mxu0 %v6405_v15 }
 0x1b3   :  { %v9287_v13 = vld [vmem:[#allocation5 + $0x894] sm:$0xf]  ;;  %v6917_v18 = vor.u32 %v9223_v8, %v6914_v10  ;;  %v6568_v10 = vld [vmem:[#allocation5 + $0x3d8] sm:$0xf] }
 0x1b4   :  { %v7170_v14 = vld [vmem:[#allocation5 + $0x8b0] sm:$0xf0]  ;;  %3403 = vmatpush.bf16.msrb.mxu1 %v6661_v17 }
 0x1b5   :  { %v9087_v19 = vld [vmem:[#allocation5 + $0x254] sm:$0xf]  ;;  %v7173_v22 = vor.u32 %v9287_v13, %v7170_v14  ;;  %v9140_v13 = vld [vmem:[#allocation5 + $0x3f4] sm:$0xf0] }
 0x1b6   :  { %v6370_v20 = vld [vmem:[#allocation5 + $0x270] sm:$0xf0]  ;;  %3417 = vmatpush.bf16.msrb.mxu2 %v6917_v18  ;;  %v6313_v18 = vor.u32 %v9076_v5, %v6312_v3 }
 0x1b7   :  { %v9151_v21 = vld [vmem:[#allocation5 + $0x454] sm:$0xf]  ;;  %v6373_v16 = vor.u32 %v9087_v19, %v6370_v20  ;;  %3431 = vmatpush.bf16.msrb.mxu3 %v7173_v22  ;;  %v6569_v22 = vor.u32 %v9140_v13, %v6568_v10  ;;  %v9052_v10 = vld [vmem:[#allocation5 + $0x134] sm:$0xf0] }
 0x1b8   :  { %v6626_v24 = vld [vmem:[#allocation5 + $0x470] sm:$0xf0]  ;;  %v6472_v13 = vld [vmem:[#allocation5 + $0x318] sm:$0xf] }
 0x1b9   :  { %v9215_v25 = vld [vmem:[#allocation5 + $0x654] sm:$0xf]  ;;  %v6629_v33 = vor.u32 %v9151_v21, %v6626_v24  ;;  %3390 = vmatpush.bf16.msrb.mxu0 %v6373_v16 }
 0x1ba   :  { %v6882_v26 = vld [vmem:[#allocation5 + $0x670] sm:$0xf0] }
 0x1bb   :  { %v9279_v27 = vld [vmem:[#allocation5 + $0x854] sm:$0xf]  ;;  %v6885_v34 = vor.u32 %v9215_v25, %v6882_v26  ;;  %3404 = vmatpush.bf16.msrb.mxu1 %v6629_v33  ;;  %v6280_v25 = vld [vmem:[#allocation5 + $0x198] sm:$0xf] }
 0x1bc   :  { %v7138_v28 = vld [vmem:[#allocation5 + $0x870] sm:$0xf0]  ;;  %v9068_v26 = vld [vmem:[#allocation5 + $0x1b4] sm:$0xf0] }
 0x1bd   :  { %v9079_v29 = vld [vmem:[#allocation5 + $0x214] sm:$0xf]  ;;  %v7141_v50 = vor.u32 %v9279_v27, %v7138_v28  ;;  %3418 = vmatpush.bf16.msrb.mxu2 %v6885_v34  ;;  %v6536_v27 = vld [vmem:[#allocation5 + $0x398] sm:$0xf] }
 0x1be   :  { %v6338_v32 = vld [vmem:[#allocation5 + $0x230] sm:$0xf0]  ;;  %v9132_v28 = vld [vmem:[#allocation5 + $0x3b4] sm:$0xf0] }
 0x1bf   :  { %v9143_v36 = vld [vmem:[#allocation5 + $0x414] sm:$0xf]  ;;  %v6341_v62 = vor.u32 %v9079_v29, %v6338_v32  ;;  %3432 = vmatpush.bf16.msrb.mxu3 %v7141_v50  ;;  %v6281_v32 = vor.u32 %v9068_v26, %v6280_v25  ;;  %v6248_v50 = vld [vmem:[#allocation5 + $0x158] sm:$0xf] }
 0x1c0   :  { %v6594_v38 = vld [vmem:[#allocation5 + $0x430] sm:$0xf0]  ;;  %v6184_v25 = vld [vmem:[#allocation5 + $0xd8] sm:$0xf] }
 0x1c1   :  { %v9207_v49 = vld [vmem:[#allocation5 + $0x614] sm:$0xf]  ;;  %v6597_v6 = vor.u32 %v9143_v36, %v6594_v38  ;;  %3391 = vmatpush.bf16.msrb.mxu0 %v6341_v62  ;;  %v6537_v38 = vor.u32 %v9132_v28, %v6536_v27  ;;  %v9044_v26 = vld [vmem:[#allocation5 + $0xf4] sm:$0xf0] }
 0x1c2   :  { %v6850_v53 = vld [vmem:[#allocation5 + $0x630] sm:$0xf0]  ;;  %v6440_v27 = vld [vmem:[#allocation5 + $0x2d8] sm:$0xf] }
 0x1c3   :  { %v9271_v55 = vld [vmem:[#allocation5 + $0x814] sm:$0xf]  ;;  %v6853_v8 = vor.u32 %v9207_v49, %v6850_v53  ;;  %3405 = vmatpush.bf16.msrb.mxu1 %v6597_v6  ;;  %v9060_v53 = vld [vmem:[#allocation5 + $0x174] sm:$0xf0] }
 0x1c4   :  { %v7106_v56 = vld [vmem:[#allocation5 + $0x830] sm:$0xf0]  ;;  %3392 = vmatmul.bf16.vlgmr.msrb.gmra.mxu0 %v10057_v11  ;;  %v9108_v28 = vld [vmem:[#allocation5 + $0x2f4] sm:$0xf0] }
 0x1c5   :  { %v9391_v35 = vld [vmem:[#allocation5 + $0xbd4] sm:$0xf]  ;;  %v7109_v14 = vor.u32 %v9271_v55, %v7106_v56  ;;  %3419 = vmatpush.bf16.msrb.mxu2 %v6853_v8  ;;  %v6504_v55 = vld [vmem:[#allocation5 + $0x358] sm:$0xf] }
 0x1c6   :  { %v7586_v58 = vld [vmem:[#allocation5 + $0xbf0] sm:$0xf0]  ;;  %3406 = vmatmul.bf16.vlgmr.msrb.gmra.mxu1 %v10053_v0  ;;  %v9124_v56 = vld [vmem:[#allocation5 + $0x374] sm:$0xf0] }
 0x1c7   :  { %v9455_v60 = vld [vmem:[#allocation5 + $0xdd4] sm:$0xf]  ;;  %v7589_v15 = vor.u32 %v9391_v35, %v7586_v58  ;;  %3433 = vmatpush.bf16.msrb.mxu3 %v7109_v14  ;;  %v6505_v5 = vor.u32 %v9124_v56, %v6504_v55  ;;  %v6216_v8 = vld [vmem:[#allocation5 + $0x118] sm:$0xf] }
 0x1c8   :  { %v7842_v1 = vld [vmem:[#allocation5 + $0xdf0] sm:$0xf0]  ;;  %3420 = vmatmul.bf16.vlgmr.msrb.gmra.mxu2 %v10060_v23  ;;  %v9116_v14 = vld [vmem:[#allocation5 + $0x334] sm:$0xf0] }
 0x1c9   :  { %v7845_v17 = vor.u32 %v9455_v60, %v7842_v1  ;;  %v9383_v19 = vld [vmem:[#allocation5 + $0xb94] sm:$0xf]  ;;  %3440 = vmatpush.bf16.msra.mxu0 %v7589_v15  ;;  %3468 = vmatpush.bf16.msra.mxu2 %v6313_v18  ;;  %v6249_v60 = vor.u32 %v9060_v53, %v6248_v50  ;;  %v6217_v18 = vor.u32 %v9052_v10, %v6216_v8  ;;  %v6152_v50 = vld [vmem:[#allocation5 + $0x98] sm:$0xf] }
 0x1ca   :  { %v7554_v20 = vld [vmem:[#allocation5 + $0xbb0] sm:$0xf0]  ;;  %3434 = vmatmul.bf16.vlgmr.msrb.gmra.mxu3 %v10063_v37  ;;  %v9036_v53 = vld [vmem:[#allocation5 + $0xb4] sm:$0xf0] }
 0x1cb   :  { %v9447_v21 = vld [vmem:[#allocation5 + $0xd94] sm:$0xf]  ;;  %v7557_v16 = vor.u32 %v9383_v19, %v7554_v20  ;;  %3454 = vmatpush.bf16.msra.mxu1 %v7845_v17  ;;  %3482 = vmatpush.bf16.msra.mxu3 %v6569_v22  ;;  %v6473_v22 = vor.u32 %v9116_v14, %v6472_v13  ;;  %v6408_v55 = vld [vmem:[#allocation5 + $0x298] sm:$0xf] }
 0x1cc   :  { %v7810_v24 = vld [vmem:[#allocation5 + $0xdb0] sm:$0xf0]  ;;  %v9100_v56 = vld [vmem:[#allocation5 + $0x2b4] sm:$0xf0] }
 0x1cd   :  { %v7813_v29 = vor.u32 %v9447_v21, %v7810_v24  ;;  %v9375_v33 = vld [vmem:[#allocation5 + $0xb54] sm:$0xf]  ;;  %3441 = vmatpush.bf16.msra.mxu0 %v7557_v16  ;;  %3469 = vmatpush.bf16.msra.mxu2 %v6281_v32  ;;  %v6185_v32 = vor.u32 %v9044_v26, %v6184_v25  ;;  %v6120_v8 = vld [vmem:[#allocation5 + $0x58] sm:$0xf] }
 0x1ce   :  { %v7522_v34 = vld [vmem:[#allocation5 + $0xb70] sm:$0xf0]  ;;  %v9028_v10 = vld [vmem:[#allocation5 + $0x74] sm:$0xf0] }
 0x1cf   :  { %v9439_v36 = vld [vmem:[#allocation5 + $0xd54] sm:$0xf]  ;;  %v7525_v35 = vor.u32 %v9375_v33, %v7522_v34  ;;  %3455 = vmatpush.bf16.msra.mxu1 %v7813_v29  ;;  %3483 = vmatpush.bf16.msra.mxu3 %v6537_v38  ;;  %v6441_v38 = vor.u32 %v9108_v28, %v6440_v27  ;;  %v6376_v13 = vld [vmem:[#allocation5 + $0x258] sm:$0xf] }
 0x1d0   :  { %v7778_v49 = vld [vmem:[#allocation5 + $0xd70] sm:$0xf0]  ;;  %v9092_v14 = vld [vmem:[#allocation5 + $0x274] sm:$0xf0] }
 0x1d1   :  { %v7781_v58 = vor.u32 %v9439_v36, %v7778_v49  ;;  %v9367_v62 = vld [vmem:[#allocation5 + $0xb14] sm:$0xf]  ;;  %3442 = vmatpush.bf16.msra.mxu0 %v7525_v35  ;;  %3470 = vmatpush.bf16.msra.mxu2 %v6249_v60  ;;  %v6153_v60 = vor.u32 %v9036_v53, %v6152_v50  ;;  %v6377_v25 = vor.u32 %v9092_v14, %v6376_v13  ;;  %v9020_v26 = vld [vmem:[#allocation5 + $0x34] sm:$0xf0] }
 0x1d2   :  { %v7490_v1 = vld [vmem:[#allocation5 + $0xb30] sm:$0xf0]  ;;  %v6344_v27 = vld [vmem:[#allocation5 + $0x218] sm:$0xf] }
 0x1d3   :  { %v9431_v3 = vld [vmem:[#allocation5 + $0xd14] sm:$0xf]  ;;  %v7493_v15 = vor.u32 %v9367_v62, %v7490_v1  ;;  %3456 = vmatpush.bf16.msra.mxu1 %v7781_v58  ;;  %3484 = vmatpush.bf16.msra.mxu3 %v6505_v5  ;;  %v6409_v5 = vor.u32 %v9100_v56, %v6408_v55  ;;  %v9084_v28 = vld [vmem:[#allocation5 + $0x234] sm:$0xf0] }
 0x1d4   :  { %v7746_v6 = vld [vmem:[#allocation5 + $0xd30] sm:$0xf0]  ;;  %v7592_v53 = vld [vmem:[#allocation5 + $0xbd8] sm:$0xf]  ;;  %v6345_v56 = vor.u32 %v9084_v28, %v6344_v27 }
 0x1d5   :  { %v7749_v17 = vor.u32 %v9431_v3, %v7746_v6  ;;  %v9359_v19 = vld [vmem:[#allocation5 + $0xad4] sm:$0xf]  ;;  %3443 = vmatpush.bf16.msra.mxu0 %v7493_v15  ;;  %3471 = vmatpush.bf16.msra.mxu2 %v6217_v18  ;;  %v9396_v55 = vld [vmem:[#allocation5 + $0xbf4] sm:$0xf0] }
 0x1d6   :  { %v7458_v20 = vld [vmem:[#allocation5 + $0xaf0] sm:$0xf0]  ;;  %v7560_v13 = vld [vmem:[#allocation5 + $0xb98] sm:$0xf] }
 0x1d7   :  { %v9423_v21 = vld [vmem:[#allocation5 + $0xcd4] sm:$0xf]  ;;  %v7461_v16 = vor.u32 %v9359_v19, %v7458_v20  ;;  %3457 = vmatpush.bf16.msra.mxu1 %v7749_v17  ;;  %3485 = vmatpush.bf16.msra.mxu3 %v6473_v22  ;;  %v6121_v20 = vor.u32 %v9028_v10, %v6120_v8  ;;  %v7304_v8 = vld [vmem:[#allocation5 + $0x998] sm:$0xf] }
 0x1d8   :  { %v7714_v24 = vld [vmem:[#allocation5 + $0xcf0] sm:$0xf0]  ;;  %v9324_v10 = vld [vmem:[#allocation5 + $0x9b4] sm:$0xf0] }
 0x1d9   :  { %v7717_v29 = vor.u32 %v9423_v21, %v7714_v24  ;;  %v9351_v33 = vld [vmem:[#allocation5 + $0xa94] sm:$0xf]  ;;  %3444 = vmatpush.bf16.msra.mxu0 %v7461_v16  ;;  %3472 = vmatpush.bf16.msra.mxu2 %v6185_v32  ;;  %v6088_v24 = vld [vmem:[#allocation5 + $0x18] sm:$0xf] }
 0x1da   :  { %v7426_v34 = vld [vmem:[#allocation5 + $0xab0] sm:$0xf0]  ;;  %v6824_v16 = vld [vmem:[#allocation5 + $0x5d8] sm:$0xf]  ;;  %v6089_v50 = vor.u32 %v9020_v26, %v6088_v24 }
 0x1db   :  { %v9415_v36 = vld [vmem:[#allocation5 + $0xc94] sm:$0xf]  ;;  %v7429_v35 = vor.u32 %v9351_v33, %v7426_v34  ;;  %3458 = vmatpush.bf16.msra.mxu1 %v7717_v29  ;;  %3486 = vmatpush.bf16.msra.mxu3 %v6441_v38  ;;  %v9204_v29 = vld [vmem:[#allocation5 + $0x5f4] sm:$0xf0] }
 0x1dc   :  { %v7682_v49 = vld [vmem:[#allocation5 + $0xcb0] sm:$0xf0]  ;;  %v7080_v32 = vld [vmem:[#allocation5 + $0x7d8] sm:$0xf] }
 0x1dd   :  { %v7685_v58 = vor.u32 %v9415_v36, %v7682_v49  ;;  %v9343_v62 = vld [vmem:[#allocation5 + $0xa54] sm:$0xf]  ;;  %3445 = vmatpush.bf16.msra.mxu0 %v7429_v35  ;;  %3473 = vmatpush.bf16.msra.mxu2 %v6153_v60  ;;  %v9268_v34 = vld [vmem:[#allocation5 + $0x7f4] sm:$0xf0]  ;;  %v6825_v35 = vor.u32 %v9204_v29, %v6824_v16 }
 0x1de   :  { %v7394_v1 = vld [vmem:[#allocation5 + $0xa70] sm:$0xf0]  ;;  %v7336_v36 = vld [vmem:[#allocation5 + $0x9d8] sm:$0xf] }
 0x1df   :  { %v9407_v3 = vld [vmem:[#allocation5 + $0xc54] sm:$0xf]  ;;  %v7397_v15 = vor.u32 %v9343_v62, %v7394_v1  ;;  %3459 = vmatpush.bf16.msra.mxu1 %v7685_v58  ;;  %3487 = vmatpush.bf16.msra.mxu3 %v6409_v5  ;;  %v9332_v38 = vld [vmem:[#allocation5 + $0x9f4] sm:$0xf0]  ;;  %v7081_v58 = vor.u32 %v9268_v34, %v7080_v32  ;;  %v7593_v5 = vor.u32 %v9396_v55, %v7592_v53 }
 0x1e0   :  { %v7650_v6 = vld [vmem:[#allocation5 + $0xc70] sm:$0xf0]  ;;  %v7337_v60 = vor.u32 %v9332_v38, %v7336_v36  ;;  %v6792_v62 = vld [vmem:[#allocation5 + $0x598] sm:$0xf] }
 0x1e1   :  { %v9335_v17 = vld [vmem:[#allocation5 + $0xa14] sm:$0xf]  ;;  %v7653_v19 = vor.u32 %v9407_v3, %v7650_v6  ;;  %3446 = vmatpush.bf16.msra.mxu0 %v7397_v15  ;;  %3474 = vmatpush.bf16.msra.mxu2 %v6121_v20  ;;  %v9196_v1 = vld [vmem:[#allocation5 + $0x5b4] sm:$0xf0] }
 0x1e2   :  { %v7362_v18 = vld [vmem:[#allocation5 + $0xa30] sm:$0xf0]  ;;  %v7048_v3 = vld [vmem:[#allocation5 + $0x798] sm:$0xf]  ;;  %v6793_v15 = vor.u32 %v9196_v1, %v6792_v62 }
 0x1e3   :  { %v9399_v21 = vld [vmem:[#allocation5 + $0xc14] sm:$0xf]  ;;  %v7365_v33 = vor.u32 %v9335_v17, %v7362_v18  ;;  %3460 = vmatpush.bf16.msra.mxu1 %v7653_v19  ;;  %3488 = vmatpush.bf16.msra.mxu3 %v6377_v25  ;;  %v9260_v6 = vld [vmem:[#allocation5 + $0x7b4] sm:$0xf0]  ;;  %v7305_v18 = vor.u32 %v9324_v10, %v7304_v8 }
 0x1e4   :  { %v7618_v22 = vld [vmem:[#allocation5 + $0xc30] sm:$0xf0]  ;;  %v9388_v14 = vld [vmem:[#allocation5 + $0xbb4] sm:$0xf0]  ;;  %v7049_v17 = vor.u32 %v9260_v6, %v7048_v3 }
 0x1e5   :  { %v7621_v49 = vor.u32 %v9399_v21, %v7618_v22  ;;  %3447 = vmatpush.bf16.msra.mxu0 %v7365_v33  ;;  %3475 = vmatpush.bf16.msra.mxu2 %v6089_v50  ;;  %v6760_v19 = vld [vmem:[#allocation5 + $0x558] sm:$0xf]  ;;  %v7561_v22 = vor.u32 %v9388_v14, %v7560_v13 }
 0x1e6   :  { %v9188_v20 = vld [vmem:[#allocation5 + $0x574] sm:$0xf0] }
 0x1e7   :  { %3461 = vmatpush.bf16.msra.mxu1 %v7621_v49  ;;  %3489 = vmatpush.bf16.msra.mxu3 %v6345_v56  ;;  %v7016_v21 = vld [vmem:[#allocation5 + $0x758] sm:$0xf]  ;;  %v6761_v16 = vor.u32 %v9188_v20, %v6760_v19 }
 0x1e8   :  { %3448 = vmatmul.bf16.vlgmr.msra.gmra.mxu0 %v10067_v42  ;;  %v9252_v24 = vld [vmem:[#allocation5 + $0x774] sm:$0xf0]  ;;  %3476 = vmatmul.bf16.vlgmr.msra.gmra.mxu2 %v10051_v57 }
 0x1e9   :  { %3496 = vmatpush.bf16.msrb.mxu0 %v6825_v35  ;;  %3524 = vmatpush.bf16.msrb.mxu2 %v7337_v60  ;;  %v7272_v25 = vld [vmem:[#allocation5 + $0x958] sm:$0xf]  ;;  %v7017_v29 = vor.u32 %v9252_v24, %v7016_v21 }
 0x1ea   :  { %v9316_v26 = vld [vmem:[#allocation5 + $0x974] sm:$0xf0]  ;;  %3462 = vmatmul.bf16.vlgmr.msra.gmra.mxu1 %v10065_v41  ;;  %3490 = vmatmul.bf16.vlgmr.msra.gmra.mxu3 %v10057_v11 }
 0x1eb   :  { %3510 = vmatpush.bf16.msrb.mxu1 %v7081_v58  ;;  %3538 = vmatpush.bf16.msrb.mxu3 %v7593_v5  ;;  %v7528_v27 = vld [vmem:[#allocation5 + $0xb58] sm:$0xf]  ;;  %v7273_v32 = vor.u32 %v9316_v26, %v7272_v25 }
 0x1ec   :  { %v9380_v28 = vld [vmem:[#allocation5 + $0xb74] sm:$0xf0] }
 0x1ed   :  { %3497 = vmatpush.bf16.msrb.mxu0 %v6793_v15  ;;  %3525 = vmatpush.bf16.msrb.mxu2 %v7305_v18  ;;  %v6728_v33 = vld [vmem:[#allocation5 + $0x518] sm:$0xf]  ;;  %v7529_v38 = vor.u32 %v9380_v28, %v7528_v27 }
 0x1ee   :  { %v9180_v34 = vld [vmem:[#allocation5 + $0x534] sm:$0xf0] }
 0x1ef   :  { %3511 = vmatpush.bf16.msrb.mxu1 %v7049_v17  ;;  %v6984_v36 = vld [vmem:[#allocation5 + $0x718] sm:$0xf]  ;;  %3539 = vmatpush.bf16.msrb.mxu3 %v7561_v22  ;;  %v6729_v35 = vor.u32 %v9180_v34, %v6728_v33  ;;  %v10163_v22 = vpop.f32.mrf.mxu2 }
 0x1f0   :  { %v9244_v49 = vld [vmem:[#allocation5 + $0x734] sm:$0xf0] }
 0x1f1   :  { %v7240_v50 = vld [vmem:[#allocation5 + $0x918] sm:$0xf]  ;;  %3498 = vmatpush.bf16.msrb.mxu0 %v6761_v16  ;;  %3526 = vmatpush.bf16.msrb.mxu2 %v7273_v32  ;;  %v6985_v58 = vor.u32 %v9244_v49, %v6984_v36 }
 0x1f2   :  { %v9308_v53 = vld [vmem:[#allocation5 + $0x934] sm:$0xf0] }
 0x1f3   :  { %v7496_v55 = vld [vmem:[#allocation5 + $0xb18] sm:$0xf]  ;;  %3512 = vmatpush.bf16.msrb.mxu1 %v7017_v29  ;;  %v7241_v60 = vor.u32 %v9308_v53, %v7240_v50  ;;  %3540 = vmatpush.bf16.msrb.mxu3 %v7529_v38 }
 0x1f4   :  { %v9372_v56 = vld [vmem:[#allocation5 + $0xb34] sm:$0xf0] }
 0x1f5   :  { %v6696_v62 = vld [vmem:[#allocation5 + $0x4d8] sm:$0xf]  ;;  %v7497_v5 = vor.u32 %v9372_v56, %v7496_v55  ;;  %3499 = vmatpush.bf16.msrb.mxu0 %v6729_v35  ;;  %3527 = vmatpush.bf16.msrb.mxu2 %v7241_v60  ;;  %v10165_v56 = vpop.f32.mrf.mxu3 }
 0x1f6   :  { %v9172_v1 = vld [vmem:[#allocation5 + $0x4f4] sm:$0xf0] }
 0x1f7   :  { %v6952_v3 = vld [vmem:[#allocation5 + $0x6d8] sm:$0xf]  ;;  %v6697_v15 = vor.u32 %v9172_v1, %v6696_v62  ;;  %3513 = vmatpush.bf16.msrb.mxu1 %v6985_v58  ;;  %3541 = vmatpush.bf16.msrb.mxu3 %v7497_v5 }
 0x1f8   :  { %v9236_v6 = vld [vmem:[#allocation5 + $0x6f4] sm:$0xf0] }
 0x1f9   :  { %v7208_v8 = vld [vmem:[#allocation5 + $0x8d8] sm:$0xf]  ;;  %v6953_v17 = vor.u32 %v9236_v6, %v6952_v3  ;;  %3500 = vmatpush.bf16.msrb.mxu0 %v6697_v15 }
 0x1fa   :  { %v9300_v10 = vld [vmem:[#allocation5 + $0x8f4] sm:$0xf0] }
 0x1fb   :  { %v7464_v13 = vld [vmem:[#allocation5 + $0xad8] sm:$0xf]  ;;  %v7209_v18 = vor.u32 %v9300_v10, %v7208_v8  ;;  %3514 = vmatpush.bf16.msrb.mxu1 %v6953_v17 }
 0x1fc   :  { %v9364_v14 = vld [vmem:[#allocation5 + $0xaf4] sm:$0xf0] }
 0x1fd   :  { %v6664_v19 = vld [vmem:[#allocation5 + $0x498] sm:$0xf]  ;;  %v7465_v24 = vor.u32 %v9364_v14, %v7464_v13  ;;  %3528 = vmatpush.bf16.msrb.mxu2 %v7209_v18 }
 0x1fe   :  { %v9164_v20 = vld [vmem:[#allocation5 + $0x4b4] sm:$0xf0] }
 0x1ff   :  { %v6920_v21 = vld [vmem:[#allocation5 + $0x698] sm:$0xf]  ;;  %v6665_v29 = vor.u32 %v9164_v20, %v6664_v19  ;;  %3542 = vmatpush.bf16.msrb.mxu3 %v7465_v24  ;;  %v9072_v20 = vld [vmem:[#allocation5 + $0x1dc] sm:$0xf] }
 0x200   :  { %v9228_v25 = vld [vmem:[#allocation5 + $0x6b4] sm:$0xf0] }
 0x201   :  { %v7176_v26 = vld [vmem:[#allocation5 + $0x898] sm:$0xf]  ;;  %v6921_v32 = vor.u32 %v9228_v25, %v6920_v21  ;;  %3501 = vmatpush.bf16.msrb.mxu0 %v6665_v29  ;;  %v10167_v21 = vpop.f32.mrf.mxu2  ;;  %v6314_v25 = vld [vmem:[#allocation5 + $0x1f8] sm:$0xf0] }
 0x202   :  { %v9292_v27 = vld [vmem:[#allocation5 + $0x8b4] sm:$0xf0]  ;;  %10414 = vst [vmem:[#allocation24_spill] sm:$0xff] %v10167_v21  ;;  %v9200_v29 = vld [vmem:[#allocation5 + $0x5dc] sm:$0xf] }
 0x203   :  { %v7432_v28 = vld [vmem:[#allocation5 + $0xa98] sm:$0xf]  ;;  %v7177_v33 = vor.u32 %v9292_v27, %v7176_v26  ;;  %3515 = vmatpush.bf16.msrb.mxu1 %v6921_v32  ;;  %v9136_v26 = vld [vmem:[#allocation5 + $0x3dc] sm:$0xf] }
 0x204   :  { %v9356_v16 = vld [vmem:[#allocation5 + $0xab4] sm:$0xf0]  ;;  %v6570_v27 = vld [vmem:[#allocation5 + $0x3f8] sm:$0xf0] }
 0x205   :  { %v6632_v34 = vld [vmem:[#allocation5 + $0x458] sm:$0xf]  ;;  %v7433_v49 = vor.u32 %v9356_v16, %v7432_v28  ;;  %3529 = vmatpush.bf16.msrb.mxu2 %v7177_v33  ;;  %v6826_v32 = vld [vmem:[#allocation5 + $0x5f8] sm:$0xf0] }
 0x206   :  { %v9156_v36 = vld [vmem:[#allocation5 + $0x474] sm:$0xf0]  ;;  %v9384_v21 = vld [vmem:[#allocation5 + $0xb9c] sm:$0xf] }
 0x207   :  { %v6888_v38 = vld [vmem:[#allocation5 + $0x658] sm:$0xf]  ;;  %v6633_v60 = vor.u32 %v9156_v36, %v6632_v34  ;;  %3543 = vmatpush.bf16.msrb.mxu3 %v7433_v49  ;;  %v10169_v36 = vpop.f32.mrf.mxu0  ;;  %v6317_v49 = vor.u32 %v9072_v20, %v6314_v25  ;;  %v9120_v20 = vld [vmem:[#allocation5 + $0x35c] sm:$0xf] }
 0x208   :  { %v9220_v50 = vld [vmem:[#allocation5 + $0x674] sm:$0xf0]  ;;  %v9184_v25 = vld [vmem:[#allocation5 + $0x55c] sm:$0xf] }
 0x209   :  { %v7144_v53 = vld [vmem:[#allocation5 + $0x858] sm:$0xf]  ;;  %v6889_v3 = vor.u32 %v9220_v50, %v6888_v38  ;;  %3502 = vmatpush.bf16.msrb.mxu0 %v6633_v60  ;;  %v10171_v38 = vpop.f32.mrf.mxu1  ;;  %v6573_v50 = vor.u32 %v9136_v26, %v6570_v27  ;;  %v6282_v60 = vld [vmem:[#allocation5 + $0x1b8] sm:$0xf0]  ;;  %v10178_v27 = vpop.f32.mrf.mxu2 }
 0x20a   :  { %v9284_v55 = vld [vmem:[#allocation5 + $0x874] sm:$0xf0]  ;;  %v6762_v26 = vld [vmem:[#allocation5 + $0x578] sm:$0xf0] }
 0x20b   :  { %v7400_v35 = vld [vmem:[#allocation5 + $0xa58] sm:$0xf]  ;;  %v7145_v5 = vor.u32 %v9284_v55, %v7144_v53  ;;  %3516 = vmatpush.bf16.msrb.mxu1 %v6889_v3  ;;  %v10173_v3 = vpop.f32.mrf.mxu3 }
 0x20c   :  { %v9348_v58 = vld [vmem:[#allocation5 + $0xa74] sm:$0xf0]  ;;  %10415 = vst [vmem:[#allocation25_spill] sm:$0xff] %v10173_v3 }
 0x20d   :  { %v6600_v62 = vld [vmem:[#allocation5 + $0x418] sm:$0xf]  ;;  %v7401_v13 = vor.u32 %v9348_v58, %v7400_v35  ;;  %3530 = vmatpush.bf16.msrb.mxu2 %v7145_v5  ;;  %v9064_v35 = vld [vmem:[#allocation5 + $0x19c] sm:$0xf]  ;;  %v6829_v58 = vor.u32 %v9200_v29, %v6826_v32 }
 0x20e   :  { %v9148_v1 = vld [vmem:[#allocation5 + $0x434] sm:$0xf0]  ;;  %v9192_v5 = vld [vmem:[#allocation5 + $0x59c] sm:$0xf] }
 0x20f   :  { %v6856_v6 = vld [vmem:[#allocation5 + $0x618] sm:$0xf]  ;;  %v6601_v24 = vor.u32 %v9148_v1, %v6600_v62  ;;  %3544 = vmatpush.bf16.msrb.mxu3 %v7401_v13  ;;  %v9128_v62 = vld [vmem:[#allocation5 + $0x39c] sm:$0xf] }
 0x210   :  { %v9212_v8 = vld [vmem:[#allocation5 + $0x634] sm:$0xf0]  ;;  %v6538_v1 = vld [vmem:[#allocation5 + $0x3b8] sm:$0xf0] }
 0x211   :  { %v7112_v10 = vld [vmem:[#allocation5 + $0x818] sm:$0xf]  ;;  %v6857_v28 = vor.u32 %v9212_v8, %v6856_v6  ;;  %3503 = vmatpush.bf16.msrb.mxu0 %v6601_v24  ;;  %v6794_v6 = vld [vmem:[#allocation5 + $0x5b8] sm:$0xf0]  ;;  %v6541_v13 = vor.u32 %v9128_v62, %v6538_v1  ;;  %v10183_v29 = vpop.f32.mrf.mxu1 }
 0x212   :  { %v9276_v14 = vld [vmem:[#allocation5 + $0x834] sm:$0xf0]  ;;  %v6506_v24 = vld [vmem:[#allocation5 + $0x378] sm:$0xf0] }
 0x213   :  { %v7368_v15 = vld [vmem:[#allocation5 + $0xa18] sm:$0xf]  ;;  %v7113_v16 = vor.u32 %v9276_v14, %v7112_v10  ;;  %3517 = vmatpush.bf16.msrb.mxu1 %v6857_v28  ;;  %v6285_v10 = vor.u32 %v9064_v35, %v6282_v60  ;;  %v9112_v35 = vld [vmem:[#allocation5 + $0x31c] sm:$0xf] }
 0x214   :  { %v9340_v17 = vld [vmem:[#allocation5 + $0xa34] sm:$0xf0]  ;;  %3504 = vmatmul.bf16.vlgmr.msrb.gmra.mxu0 %v10053_v0  ;;  %v9176_v60 = vld [vmem:[#allocation5 + $0x51c] sm:$0xf] }
 0x215   :  { %v7848_v18 = vld [vmem:[#allocation5 + $0xdd8] sm:$0xf]  ;;  %v7369_v33 = vor.u32 %v9340_v17, %v7368_v15  ;;  %3531 = vmatpush.bf16.msrb.mxu2 %v7113_v16  ;;  %v9056_v17 = vld [vmem:[#allocation5 + $0x15c] sm:$0xf]  ;;  %v10181_v16 = vpop.f32.mrf.mxu0 }
 0x216   :  { %v9460_v19 = vld [vmem:[#allocation5 + $0xdf4] sm:$0xf0]  ;;  %3518 = vmatmul.bf16.vlgmr.msrb.gmra.mxu1 %v10060_v23  ;;  %10416 = vst [vmem:[#allocation26_spill] sm:$0xff] %v10181_v16  ;;  %v6730_v62 = vld [vmem:[#allocation5 + $0x538] sm:$0xf0] }
 0x217   :  { %v7849_v34 = vor.u32 %v9460_v19, %v7848_v18  ;;  %v7816_v53 = vld [vmem:[#allocation5 + $0xd98] sm:$0xf]  ;;  %3545 = vmatpush.bf16.msrb.mxu3 %v7369_v33  ;;  %3566 = vmatpush.bf16.msra.mxu1 %v6317_v49  ;;  %v6797_v18 = vor.u32 %v9192_v5, %v6794_v6  ;;  %v6250_v19 = vld [vmem:[#allocation5 + $0x178] sm:$0xf0]  ;;  %v6509_v33 = vor.u32 %v9120_v20, %v6506_v24  ;;  %v10185_v5 = vpop.f32.mrf.mxu3 }
 0x218   :  { %v9452_v55 = vld [vmem:[#allocation5 + $0xdb4] sm:$0xf0]  ;;  %3532 = vmatmul.bf16.vlgmr.msrb.gmra.mxu2 %v10063_v37  ;;  %v6253_v32 = vor.u32 %v9056_v17, %v6250_v19  ;;  %10417 = vst [vmem:[#allocation27_spill] sm:$0xff] %v10185_v5  ;;  %v6186_v17 = vld [vmem:[#allocation5 + $0xf8] sm:$0xf0] }
 0x219   :  { %3552 = vmatpush.bf16.msra.mxu0 %v7849_v34  ;;  %v7817_v8 = vor.u32 %v9452_v55, %v7816_v53  ;;  %3580 = vmatpush.bf16.msra.mxu2 %v6573_v50  ;;  %v7784_v14 = vld [vmem:[#allocation5 + $0xd58] sm:$0xf]  ;;  %v9048_v50 = vld [vmem:[#allocation5 + $0x11c] sm:$0xf]  ;;  %v6765_v53 = vor.u32 %v9184_v25, %v6762_v26  ;;  %v10187_v26 = vpop.f32.mrf.mxu2 }
 0x21a   :  { %v9444_v15 = vld [vmem:[#allocation5 + $0xd74] sm:$0xf0]  ;;  %3546 = vmatmul.bf16.vlgmr.msrb.gmra.mxu3 %v10067_v42  ;;  %v6218_v55 = vld [vmem:[#allocation5 + $0x138] sm:$0xf0] }
 0x21b   :  { %3594 = vmatpush.bf16.msra.mxu3 %v6829_v58  ;;  %v7785_v28 = vor.u32 %v9444_v15, %v7784_v14  ;;  %3567 = vmatpush.bf16.msra.mxu1 %v6285_v10  ;;  %v7752_v34 = vld [vmem:[#allocation5 + $0xd18] sm:$0xf]  ;;  %v6474_v58 = vld [vmem:[#allocation5 + $0x338] sm:$0xf0]  ;;  %v6221_v6 = vor.u32 %v9048_v50, %v6218_v55  ;;  %v6733_v15 = vor.u32 %v9176_v60, %v6730_v62  ;;  %v10191_v60 = vpop.f32.mrf.mxu1 }
 0x21c   :  { %v9436_v49 = vld [vmem:[#allocation5 + $0xd34] sm:$0xf0]  ;;  %v9040_v14 = vld [vmem:[#allocation5 + $0xdc] sm:$0xf] }
 0x21d   :  { %3553 = vmatpush.bf16.msra.mxu0 %v7817_v8  ;;  %3581 = vmatpush.bf16.msra.mxu2 %v6541_v13  ;;  %v7753_v1 = vor.u32 %v9436_v49, %v7752_v34  ;;  %v6477_v8 = vor.u32 %v9112_v35, %v6474_v58  ;;  %v7720_v10 = vld [vmem:[#allocation5 + $0xcd8] sm:$0xf]  ;;  %v6442_v19 = vld [vmem:[#allocation5 + $0x2f8] sm:$0xf0]  ;;  %v10189_v58 = vpop.f32.mrf.mxu0 }
 0x21e   :  { %v9428_v13 = vld [vmem:[#allocation5 + $0xcf4] sm:$0xf0]  ;;  %v9168_v20 = vld [vmem:[#allocation5 + $0x4dc] sm:$0xf]  ;;  %10418 = vst [vmem:[#allocation28_spill] sm:$0xff] %v10189_v58 }
 0x21f   :  { %3595 = vmatpush.bf16.msra.mxu3 %v6797_v18  ;;  %3568 = vmatpush.bf16.msra.mxu1 %v6253_v32  ;;  %v9104_v18 = vld [vmem:[#allocation5 + $0x2dc] sm:$0xf]  ;;  %v7721_v25 = vor.u32 %v9428_v13, %v7720_v10  ;;  %v9420_v34 = vld [vmem:[#allocation5 + $0xcb4] sm:$0xf0] }
 0x220   :  { %v6698_v24 = vld [vmem:[#allocation5 + $0x4f8] sm:$0xf0]  ;;  %v6445_v32 = vor.u32 %v9104_v18, %v6442_v19 }
 0x221   :  { %3554 = vmatpush.bf16.msra.mxu0 %v7785_v28  ;;  %3582 = vmatpush.bf16.msra.mxu2 %v6509_v33  ;;  %v6189_v28 = vor.u32 %v9040_v14, %v6186_v17  ;;  %v7688_v33 = vld [vmem:[#allocation5 + $0xc98] sm:$0xf]  ;;  %v9032_v49 = vld [vmem:[#allocation5 + $0x9c] sm:$0xf]  ;;  %v6701_v50 = vor.u32 %v9168_v20, %v6698_v24 }
 0x222   :  { %v9096_v55 = vld [vmem:[#allocation5 + $0x29c] sm:$0xf]  ;;  %v7689_v10 = vor.u32 %v9420_v34, %v7688_v33  ;;  %v7656_v14 = vld [vmem:[#allocation5 + $0xc58] sm:$0xf] }
 0x223   :  { %3596 = vmatpush.bf16.msra.mxu3 %v6765_v53  ;;  %3569 = vmatpush.bf16.msra.mxu1 %v6221_v6  ;;  %v6154_v53 = vld [vmem:[#allocation5 + $0xb8] sm:$0xf0]  ;;  %v10193_v6 = vpop.f32.mrf.mxu3  ;;  %v9404_v33 = vld [vmem:[#allocation5 + $0xc34] sm:$0xf0] }
 0x224   :  { %v6410_v35 = vld [vmem:[#allocation5 + $0x2b8] sm:$0xf0] }
 0x225   :  { %3555 = vmatpush.bf16.msra.mxu0 %v7753_v1  ;;  %3583 = vmatpush.bf16.msra.mxu2 %v6477_v8  ;;  %v9160_v62 = vld [vmem:[#allocation5 + $0x49c] sm:$0xf]  ;;  %v6157_v8 = vor.u32 %v9032_v49, %v6154_v53  ;;  %v6413_v13 = vor.u32 %v9096_v55, %v6410_v35  ;;  %v6637_v55 = vor.u32 %v9152_v2, %v6634_v46  ;;  %v10197_v61 = vpop.f32.mrf.mxu0 }
 0x226   :  { %v6666_v1 = vld [vmem:[#allocation5 + $0x4b8] sm:$0xf0] }
 0x227   :  { %3597 = vmatpush.bf16.msra.mxu3 %v6733_v15  ;;  %3570 = vmatpush.bf16.msra.mxu1 %v6189_v28  ;;  %v9412_v15 = vld [vmem:[#allocation5 + $0xc74] sm:$0xf0]  ;;  %v9024_v17 = vld [vmem:[#allocation5 + $0x5c] sm:$0xf]  ;;  %v6669_v18 = vor.u32 %v9160_v62, %v6666_v1  ;;  %v10195_v1 = vpop.f32.mrf.mxu2 }
 0x228   :  { %v6122_v19 = vld [vmem:[#allocation5 + $0x78] sm:$0xf0]  ;;  %v7657_v63 = vor.u32 %v9412_v15, %v7656_v14 }
 0x229   :  { %3556 = vmatpush.bf16.msra.mxu0 %v7721_v25  ;;  %3584 = vmatpush.bf16.msra.mxu2 %v6445_v32  ;;  %v9088_v20 = vld [vmem:[#allocation5 + $0x25c] sm:$0xf]  ;;  %v7624_v25 = vld [vmem:[#allocation5 + $0xc18] sm:$0xf]  ;;  %v6125_v28 = vor.u32 %v9024_v17, %v6122_v19 }
 0x22a   :  { %v6378_v24 = vld [vmem:[#allocation5 + $0x278] sm:$0xf0] }
 0x22b   :  { %3598 = vmatpush.bf16.msra.mxu3 %v6701_v50  ;;  %3571 = vmatpush.bf16.msra.mxu1 %v6157_v8  ;;  %v6381_v32 = vor.u32 %v9088_v20, %v6378_v24  ;;  %v9016_v34 = vld [vmem:[#allocation5 + $0x1c] sm:$0xf]  ;;  %v7625_v8 = vor.u32 %v9404_v33, %v7624_v25  ;;  %v10199_v20 = vpop.f32.mrf.mxu1  ;;  %v10201_v58 = vpop.f32.mrf.mxu3 }
 0x22c   :  { %v6090_v49 = vld [vmem:[#allocation5 + $0x38] sm:$0xf0] }
 0x22d   :  { %3557 = vmatpush.bf16.msra.mxu0 %v7689_v10  ;;  %3585 = vmatpush.bf16.msra.mxu2 %v6413_v13  ;;  %v9080_v53 = vld [vmem:[#allocation5 + $0x21c] sm:$0xf]  ;;  %v6093_v46 = vor.u32 %v9016_v34, %v6090_v49 }
 0x22e   :  { %v6346_v50 = vld [vmem:[#allocation5 + $0x238] sm:$0xf0] }
 0x22f   :  { %3599 = vmatpush.bf16.msra.mxu3 %v6669_v18  ;;  %v9144_v35 = vld [vmem:[#allocation5 + $0x41c] sm:$0xf]  ;;  %3572 = vmatpush.bf16.msra.mxu1 %v6125_v28  ;;  %v6349_v2 = vor.u32 %v9080_v53, %v6346_v50 }
 0x230   :  { %v6602_v62 = vld [vmem:[#allocation5 + $0x438] sm:$0xf0] }
 0x231   :  { %v9264_v10 = vld [vmem:[#allocation5 + $0x7dc] sm:$0xf]  ;;  %3558 = vmatpush.bf16.msra.mxu0 %v7657_v63  ;;  %3586 = vmatpush.bf16.msra.mxu2 %v6381_v32  ;;  %v6605_v16 = vor.u32 %v9144_v35, %v6602_v62 }
 0x232   :  { %v7082_v14 = vld [vmem:[#allocation5 + $0x7f8] sm:$0xf0] }
 0x233   :  { %v9328_v15 = vld [vmem:[#allocation5 + $0x9dc] sm:$0xf]  ;;  %3600 = vmatpush.bf16.msra.mxu3 %v6637_v55  ;;  %v7085_v40 = vor.u32 %v9264_v10, %v7082_v14  ;;  %3573 = vmatpush.bf16.msra.mxu1 %v6093_v46 }
 0x234   :  { %v7338_v13 = vld [vmem:[#allocation5 + $0x9f8] sm:$0xf0] }
 0x235   :  { %v9392_v17 = vld [vmem:[#allocation5 + $0xbdc] sm:$0xf]  ;;  %v7341_v3 = vor.u32 %v9328_v15, %v7338_v13  ;;  %3559 = vmatpush.bf16.msra.mxu0 %v7625_v8  ;;  %3587 = vmatpush.bf16.msra.mxu2 %v6349_v2  ;;  %v10204_v13 = vpop.f32.mrf.mxu2 }
 0x236   :  { %v7594_v19 = vld [vmem:[#allocation5 + $0xbf8] sm:$0xf0]  ;;  %10419 = vst [vmem:[#allocation29_spill] sm:$0xff] %v10204_v13  ;;  %3574 = vmatmul.bf16.vlgmr.msra.gmra.mxu1 %v10051_v57 }
 0x237   :  { %v9456_v18 = vld [vmem:[#allocation5 + $0xddc] sm:$0xf]  ;;  %v7597_v51 = vor.u32 %v9392_v17, %v7594_v19  ;;  %3601 = vmatpush.bf16.msra.mxu3 %v6605_v16  ;;  %3622 = vmatpush.bf16.msrb.mxu1 %v7341_v3  ;;  %v10206_v17 = vpop.f32.mrf.mxu0 }
 0x238   :  { %v7850_v24 = vld [vmem:[#allocation5 + $0xdf8] sm:$0xf0]  ;;  %3560 = vmatmul.bf16.vlgmr.msra.gmra.mxu0 %v10065_v41  ;;  %3588 = vmatmul.bf16.vlgmr.msra.gmra.mxu2 %v10057_v11 }
 0x239   :  { %v9256_v63 = vld [vmem:[#allocation5 + $0x79c] sm:$0xf]  ;;  %v7853_v5 = vor.u32 %v9456_v18, %v7850_v24  ;;  %3608 = vmatpush.bf16.msrb.mxu0 %v7085_v40  ;;  %3636 = vmatpush.bf16.msrb.mxu2 %v7597_v51 }
 0x23a   :  { %v7050_v25 = vld [vmem:[#allocation5 + $0x7b8] sm:$0xf0]  ;;  %3602 = vmatmul.bf16.vlgmr.msra.gmra.mxu3 %v10053_v0 }
 0x23b   :  { %v9320_v33 = vld [vmem:[#allocation5 + $0x99c] sm:$0xf]  ;;  %v7053_v49 = vor.u32 %v9256_v63, %v7050_v25  ;;  %3650 = vmatpush.bf16.msrb.mxu3 %v7853_v5  ;;  %v10213_v63 = vpop.f32.mrf.mxu3 }
 0x23c   :  { %v7562_v28 = vld [vmem:[#allocation5 + $0xbb8] sm:$0xf0]  ;;  %v7309_v53 = vor.u32 %v9320_v33, %v7306_v9  ;;  %10420 = vst [vmem:[#allocation30_spill] sm:$0xff] %v10213_v63 }
 0x23d   :  { %v9448_v32 = vld [vmem:[#allocation5 + $0xd9c] sm:$0xf]  ;;  %v7565_v55 = vor.u32 %v9384_v21, %v7562_v28  ;;  %3609 = vmatpush.bf16.msrb.mxu0 %v7053_v49  ;;  %v10211_v21 = vpop.f32.mrf.mxu1 }
 0x23e   :  { %v7818_v34 = vld [vmem:[#allocation5 + $0xdb8] sm:$0xf0]  ;;  %3623 = vmatpush.bf16.msrb.mxu1 %v7309_v53 }
 0x23f   :  { %v9248_v50 = vld [vmem:[#allocation5 + $0x75c] sm:$0xf]  ;;  %v7821_v10 = vor.u32 %v9448_v32, %v7818_v34  ;;  %3637 = vmatpush.bf16.msrb.mxu2 %v7565_v55 }
 0x240   :  { %v7018_v35 = vld [vmem:[#allocation5 + $0x778] sm:$0xf0] }
 0x241   :  { %v9312_v62 = vld [vmem:[#allocation5 + $0x95c] sm:$0xf]  ;;  %v7021_v9 = vor.u32 %v9248_v50, %v7018_v35  ;;  %3651 = vmatpush.bf16.msrb.mxu3 %v7821_v10 }
 0x242   :  { %v7274_v14 = vld [vmem:[#allocation5 + $0x978] sm:$0xf0] }
 0x243   :  { %v9376_v15 = vld [vmem:[#allocation5 + $0xb5c] sm:$0xf]  ;;  %v7277_v3 = vor.u32 %v9312_v62, %v7274_v14  ;;  %3610 = vmatpush.bf16.msrb.mxu0 %v7021_v9  ;;  %v10215_v62 = vpop.f32.mrf.mxu0 }
 0x244   :  { %v7530_v8 = vld [vmem:[#allocation5 + $0xb78] sm:$0xf0]  ;;  %10421 = vst [vmem:[#allocation31_spill] sm:$0xff] %v10215_v62  ;;  %v8096_v62 = vld [vmem:[#allocation8 + $0x1e0] sm:$0xf] }
 0x245   :  { %v9440_v40 = vld [vmem:[#allocation5 + $0xd5c] sm:$0xf]  ;;  %v7533_v16 = vor.u32 %v9376_v15, %v7530_v8  ;;  %3624 = vmatpush.bf16.msrb.mxu1 %v7277_v3  ;;  %v10217_v8 = vpop.f32.mrf.mxu2 }
 0x246   :  { %v7786_v51 = vld [vmem:[#allocation5 + $0xd78] sm:$0xf0] }
 0x247   :  { %v9240_v5 = vld [vmem:[#allocation5 + $0x71c] sm:$0xf]  ;;  %v7789_v2 = vor.u32 %v9440_v40, %v7786_v51  ;;  %3638 = vmatpush.bf16.msrb.mxu2 %v7533_v16  ;;  %v10219_v40 = vpop.f32.mrf.mxu1 }
 0x248   :  { %v6986_v19 = vld [vmem:[#allocation5 + $0x738] sm:$0xf0]  ;;  %10422 = vst [vmem:[#allocation32_spill] sm:$0xff] %v10219_v40 }
 0x249   :  { %v9304_v46 = vld [vmem:[#allocation5 + $0x91c] sm:$0xf]  ;;  %v6989_v57 = vor.u32 %v9240_v5, %v6986_v19  ;;  %3652 = vmatpush.bf16.msrb.mxu3 %v7789_v2 }
 0x24a   :  { %v7242_v11 = vld [vmem:[#allocation5 + $0x938] sm:$0xf0] }
 0x24b   :  { %v9368_v18 = vld [vmem:[#allocation5 + $0xb1c] sm:$0xf]  ;;  %v7245_v33 = vor.u32 %v9304_v46, %v7242_v11  ;;  %3611 = vmatpush.bf16.msrb.mxu0 %v6989_v57 }
 0x24c   :  { %v7498_v24 = vld [vmem:[#allocation5 + $0xb38] sm:$0xf0] }
 0x24d   :  { %v9432_v0 = vld [vmem:[#allocation5 + $0xd1c] sm:$0xf]  ;;  %v7501_v28 = vor.u32 %v9368_v18, %v7498_v24  ;;  %3625 = vmatpush.bf16.msrb.mxu1 %v7245_v33 }
 0x24e   :  { %v7754_v25 = vld [vmem:[#allocation5 + $0xd38] sm:$0xf0] }
 0x24f   :  { %v9232_v32 = vld [vmem:[#allocation5 + $0x6dc] sm:$0xf]  ;;  %v7757_v53 = vor.u32 %v9432_v0, %v7754_v25  ;;  %3639 = vmatpush.bf16.msrb.mxu2 %v7501_v28  ;;  %v10221_v25 = vpop.f32.mrf.mxu3 }
 0x250   :  { %v6954_v34 = vld [vmem:[#allocation5 + $0x6f8] sm:$0xf0]  ;;  %10423 = vst [vmem:[#allocation33_spill] sm:$0xff] %v10221_v25 }
 0x251   :  { %v9296_v49 = vld [vmem:[#allocation5 + $0x8dc] sm:$0xf]  ;;  %v6957_v15 = vor.u32 %v9232_v32, %v6954_v34  ;;  %3653 = vmatpush.bf16.msrb.mxu3 %v7757_v53 }
 0x252   :  { %v7210_v55 = vld [vmem:[#allocation5 + $0x8f8] sm:$0xf0] }
 0x253   :  { %v9360_v50 = vld [vmem:[#allocation5 + $0xadc] sm:$0xf]  ;;  %v7213_v51 = vor.u32 %v9296_v49, %v7210_v55  ;;  %3612 = vmatpush.bf16.msrb.mxu0 %v6957_v15 }
 0x254   :  { %v7466_v35 = vld [vmem:[#allocation5 + $0xaf8] sm:$0xf0] }
 0x255   :  { %v9424_v10 = vld [vmem:[#allocation5 + $0xcdc] sm:$0xf]  ;;  %v7469_v9 = vor.u32 %v9360_v50, %v7466_v35  ;;  %3626 = vmatpush.bf16.msrb.mxu1 %v7213_v51  ;;  %v10225_v51 = vpop.f32.mrf.mxu0 }
 0x256   :  { %v7722_v14 = vld [vmem:[#allocation5 + $0xcf8] sm:$0xf0]  ;;  %10425 = vst [vmem:[#allocation35_spill] sm:$0xff] %v10225_v51  ;;  %v9523_v51 = vld [vmem:[#allocation8 + $0x1ec] sm:$0xf0] }
 0x257   :  { %v9224_v3 = vld [vmem:[#allocation5 + $0x69c] sm:$0xf]  ;;  %v7725_v19 = vor.u32 %v9424_v10, %v7722_v14  ;;  %3640 = vmatpush.bf16.msrb.mxu2 %v7469_v9  ;;  %v8097_v63 = vor.u32 %v9523_v51, %v8096_v62 }
 0x258   :  { %v6922_v16 = vld [vmem:[#allocation5 + $0x6b8] sm:$0xf0] }
 0x259   :  { %v9288_v5 = vld [vmem:[#allocation5 + $0x89c] sm:$0xf]  ;;  %v6925_v0 = vor.u32 %v9224_v3, %v6922_v16  ;;  %3654 = vmatpush.bf16.msrb.mxu3 %v7725_v19  ;;  %v10223_v16 = vpop.f32.mrf.mxu2 }
 0x25a   :  { %v7178_v46 = vld [vmem:[#allocation5 + $0x8b8] sm:$0xf0]  ;;  %10424 = vst [vmem:[#allocation34_spill] sm:$0xff] %v10223_v16 }
 0x25b   :  { %v9352_v2 = vld [vmem:[#allocation5 + $0xa9c] sm:$0xf]  ;;  %v7181_v57 = vor.u32 %v9288_v5, %v7178_v46  ;;  %3613 = vmatpush.bf16.msrb.mxu0 %v6925_v0  ;;  %v10227_v0 = vpop.f32.mrf.mxu1 }
 0x25c   :  { %v7434_v11 = vld [vmem:[#allocation5 + $0xab8] sm:$0xf0]  ;;  %10426 = vst [vmem:[#allocation36_spill] sm:$0xff] %v10227_v0  ;;  %v10234_v0 = vld [vmem:[#allocation7] sm:$0xff] }
 0x25d   :  { %v9416_v18 = vld [vmem:[#allocation5 + $0xc9c] sm:$0xf]  ;;  %v7437_v33 = vor.u32 %v9352_v2, %v7434_v11  ;;  %3627 = vmatpush.bf16.msrb.mxu1 %v7181_v57  ;;  %v8224_v57 = vld [vmem:[#allocation8 + $0x2e0] sm:$0xf] }
 0x25e   :  { %v7690_v24 = vld [vmem:[#allocation5 + $0xcb8] sm:$0xf0] }
 0x25f   :  { %v9216_v28 = vld [vmem:[#allocation5 + $0x65c] sm:$0xf]  ;;  %v7693_v49 = vor.u32 %v9416_v18, %v7690_v24  ;;  %3641 = vmatpush.bf16.msrb.mxu2 %v7437_v33  ;;  %v9555_v33 = vld [vmem:[#allocation8 + $0x2ec] sm:$0xf0] }
 0x260   :  { %v6890_v32 = vld [vmem:[#allocation5 + $0x678] sm:$0xf0]  ;;  %v8225_v25 = vor.u32 %v9555_v33, %v8224_v57  ;;  %v9483_v57 = vld [vmem:[#allocation8 + $0xac] sm:$0xf0]  ;;  %v8064_v33 = vld [vmem:[#allocation8 + $0x1a0] sm:$0xf] }
 0x261   :  { %v9280_v34 = vld [vmem:[#allocation5 + $0x85c] sm:$0xf]  ;;  %v6893_v14 = vor.u32 %v9216_v28, %v6890_v32  ;;  %3655 = vmatpush.bf16.msrb.mxu3 %v7693_v49  ;;  %v7968_v28 = vld [vmem:[#allocation8 + $0xe0] sm:$0xf]  ;;  %v9491_v32 = vld [vmem:[#allocation8 + $0xec] sm:$0xf0]  ;;  %v10240_v51 = vpop.f32.mrf.mxu2 }
 0x262   :  { %v7146_v53 = vld [vmem:[#allocation5 + $0x878] sm:$0xf0] }
 0x263   :  { %v9344_v55 = vld [vmem:[#allocation5 + $0xa5c] sm:$0xf]  ;;  %v7149_v9 = vor.u32 %v9280_v34, %v7146_v53  ;;  %3614 = vmatpush.bf16.msrb.mxu0 %v6893_v14  ;;  %v10229_v34 = vpop.f32.mrf.mxu3  ;;  %v591_v14 = vperm.slane %v10234_v0, 3 }
 0x264   :  { %v7402_v50 = vld [vmem:[#allocation5 + $0xa78] sm:$0xf0]  ;;  %10427 = vst [vmem:[#allocation37_spill] sm:$0xff] %v10229_v34  ;;  %v7952_v34 = vld [vmem:[#allocation8 + $0xc0] sm:$0xf] }
 0x265   :  { %v9408_v35 = vld [vmem:[#allocation5 + $0xc5c] sm:$0xf]  ;;  %v7405_v5 = vor.u32 %v9344_v55, %v7402_v50  ;;  %3628 = vmatpush.bf16.msrb.mxu1 %v7149_v9  ;;  %v8352_v55 = vld [vmem:[#allocation8 + $0x3e0] sm:$0xf]  ;;  %v9587_v50 = vld [vmem:[#allocation8 + $0x3ec] sm:$0xf0] }
 0x266   :  { %v7658_v10 = vld [vmem:[#allocation5 + $0xc78] sm:$0xf0]  ;;  %v9487_v9 = vld [vmem:[#allocation8 + $0xcc] sm:$0xf0] }
 0x267   :  { %v9208_v15 = vld [vmem:[#allocation5 + $0x61c] sm:$0xf]  ;;  %v7661_v11 = vor.u32 %v9408_v35, %v7658_v10  ;;  %3642 = vmatpush.bf16.msrb.mxu2 %v7405_v5  ;;  %v10428_v35 = vperm.slane %v10081_v54, 0  ;;  %v8080_v5 = vld [vmem:[#allocation8 + $0x1c0] sm:$0xf]  ;;  %v7953_v62 = vor.u32 %v9487_v9, %v7952_v34 }
 0x268   :  { %v6858_v3 = vld [vmem:[#allocation5 + $0x638] sm:$0xf0]  ;;  %v8048_v9 = vld [vmem:[#allocation8 + $0x180] sm:$0xf] }
 0x269   :  { %v9272_v46 = vld [vmem:[#allocation5 + $0x81c] sm:$0xf]  ;;  %v6861_v16 = vor.u32 %v9208_v15, %v6858_v3  ;;  %v2892_v10 = vadd.f32 %v10092_v30, %v10428_v35  ;;  %3656 = vmatpush.bf16.msrb.mxu3 %v7661_v11  ;;  %v7969_v3 = vor.u32 %v9491_v32, %v7968_v28  ;;  %v8336_v30 = vld [vmem:[#allocation8 + $0x3c0] sm:$0xf]  ;;  %v9583_v35 = vld [vmem:[#allocation8 + $0x3cc] sm:$0xf0]  ;;  %v3184_v11 = vadd.f32 %v10183_v29, %v591_v14 }
 0x26a   :  { %v7114_v19 = vld [vmem:[#allocation5 + $0x838] sm:$0xf0]  ;;  %v7936_v32 = vld [vmem:[#allocation8 + $0xa0] sm:$0xf] }
 0x26b   :  { %v9336_v2 = vld [vmem:[#allocation5 + $0xa1c] sm:$0xf]  ;;  %v7117_v53 = vor.u32 %v9272_v46, %v7114_v19  ;;  %3615 = vmatpush.bf16.msrb.mxu0 %v6861_v16  ;;  %v8353_v46 = vor.u32 %v9587_v50, %v8352_v55  ;;  %v9519_v19 = vld [vmem:[#allocation8 + $0x1cc] sm:$0xf0]  ;;  %v2906_v13 = vadd.f32 %v10094_v43, %v2892_v10  ;;  %v10242_v16 = vpop.f32.mrf.mxu0  ;;  %v10429_v43 = vperm.slane %v10081_v54, 1  ;;  %v10251_v55 = vpop.f32.mrf.mxu1 }
 0x26c   :  { %v7370_v18 = vld [vmem:[#allocation5 + $0xa38] sm:$0xf0]  ;;  %v8320_v50 = vld [vmem:[#allocation8 + $0x3a0] sm:$0xf]  ;;  %v9579_v10 = vld [vmem:[#allocation8 + $0x3ac] sm:$0xf0] }
 0x26d   :  { %v9400_v24 = vld [vmem:[#allocation5 + $0xc1c] sm:$0xf]  ;;  %v7373_v49 = vor.u32 %v9336_v2, %v7370_v18  ;;  %v8208_v2 = vld [vmem:[#allocation8 + $0x2c0] sm:$0xf]  ;;  %v9551_v18 = vld [vmem:[#allocation8 + $0x2cc] sm:$0xf0]  ;;  %3629 = vmatpush.bf16.msrb.mxu1 %v7117_v53  ;;  %v2990_v29 = vadd.f32 %v10120_v12, %v10429_v43  ;;  %v3198_v12 = vadd.f32 %v10187_v26, %v3184_v11  ;;  %v10268_v43 = vpop.f32.mrf.mxu2 }
 0x26e   :  { %v7626_v40 = vld [vmem:[#allocation5 + $0xc38] sm:$0xf0]  ;;  %v8209_v28 = vor.u32 %v9551_v18, %v8208_v2  ;;  %v10430_v53 = vperm.slane %v10081_v54, 2  ;;  %3616 = vmatmul.bf16.vlgmr.msrb.gmra.mxu0 %v10060_v23  ;;  %v7937_v54 = vor.u32 %v9483_v57, %v7936_v32  ;;  %v8304_v2 = vld [vmem:[#allocation8 + $0x380] sm:$0xf] }
 0x26f   :  { %v7629_v15 = vor.u32 %v9400_v24, %v7626_v40  ;;  %3643 = vmatpush.bf16.msrb.mxu2 %v7373_v49  ;;  %5234 = vmatpush.bf16.msra.mxu0 %v7969_v3  ;;  %v3186_v40 = vadd.f32 %v10191_v60, %v591_v14  ;;  %v8081_v24 = vor.u32 %v9519_v19, %v8080_v5  ;;  %v9515_v49 = vld [vmem:[#allocation8 + $0x1ac] sm:$0xf0]  ;;  %v7920_v3 = vld [vmem:[#allocation8 + $0x80] sm:$0xf] }
 0x270   :  { %v3088_v34 = vadd.f32 %v10163_v22, %v10430_v53  ;;  %v8337_v60 = vor.u32 %v9583_v35, %v8336_v30  ;;  %3630 = vmatmul.bf16.vlgmr.msrb.gmra.mxu1 %v10063_v37  ;;  %v10258_v22 = vpop.f32.mrf.mxu3  ;;  %v8065_v14 = vor.u32 %v9515_v49, %v8064_v33  ;;  %v9479_v37 = vld [vmem:[#allocation8 + $0x8c] sm:$0xf0]  ;;  %v3004_v5 = vadd.f32 %v10124_v4, %v2990_v29  ;;  %v8176_v19 = vld [vmem:[#allocation8 + $0x280] sm:$0xf] }
 0x271   :  { %3657 = vmatpush.bf16.msrb.mxu3 %v7629_v15  ;;  %5248 = vmatpush.bf16.msra.mxu1 %v8097_v63  ;;  %v8192_v63 = vld [vmem:[#allocation8 + $0x2a0] sm:$0xf]  ;;  %v3200_v23 = vadd.f32 %v10195_v1, %v3186_v40  ;;  %v9543_v1 = vld [vmem:[#allocation8 + $0x28c] sm:$0xf0]  ;;  %v3212_v30 = vadd.f32 %v10193_v6, %v3198_v12  ;;  %v7921_v35 = vor.u32 %v9479_v37, %v7920_v3 }
 0x272   :  { %3644 = vmatmul.bf16.vlgmr.msrb.gmra.mxu2 %v10067_v42  ;;  %v2920_v42 = vadd.f32 %v10099_v59, %v2906_v13  ;;  %v3102_v26 = vadd.f32 %v10165_v56, %v3088_v34  ;;  %v9575_v18 = vld [vmem:[#allocation8 + $0x38c] sm:$0xf0]  ;;  %v8177_v13 = vor.u32 %v9543_v1, %v8176_v19  ;;  %v7904_v4 = vld [vmem:[#allocation8 + $0x60] sm:$0xf] }
 0x273   :  { %5262 = vmatpush.bf16.msra.mxu2 %v8225_v25  ;;  %v9547_v25 = vld [vmem:[#allocation8 + $0x2ac] sm:$0xf0]  ;;  %5235 = vmatpush.bf16.msra.mxu0 %v7953_v62  ;;  %v3214_v11 = vadd.f32 %v10201_v58, %v3200_v23  ;;  %v8032_v56 = vld [vmem:[#allocation8 + $0x160] sm:$0xf]  ;;  %v8305_v32 = vor.u32 %v9575_v18, %v8304_v2  ;;  %v10270_v58 = vpop.f32.mrf.mxu0 }
 0x274   :  { %3658 = vmatmul.bf16.vlgmr.msrb.gmra.mxu3 %v10065_v41  ;;  %v8193_v15 = vor.u32 %v9547_v25, %v8192_v63  ;;  %v8321_v41 = vor.u32 %v9579_v10, %v8320_v50  ;;  %v9475_v62 = vld [vmem:[#allocation8 + $0x6c] sm:$0xf0]  ;;  %v2934_v40 = vadd.f32 %v10105_v52, %v2920_v42  ;;  %v8160_v57 = vld [vmem:[#allocation8 + $0x260] sm:$0xf] }
 0x275   :  { %5276 = vmatpush.bf16.msra.mxu3 %v8353_v46  ;;  %5249 = vmatpush.bf16.msra.mxu1 %v8081_v24  ;;  %v9511_v46 = vld [vmem:[#allocation8 + $0x18c] sm:$0xf0]  ;;  %v3018_v24 = vadd.f32 %v10126_v7, %v3004_v5  ;;  %v8288_v29 = vld [vmem:[#allocation8 + $0x360] sm:$0xf]  ;;  %v7905_v52 = vor.u32 %v9475_v62, %v7904_v4  ;;  %v3228_v7 = vadd.f32 %v10206_v17, %v3214_v11 }
 0x276   :  { %v8049_v59 = vor.u32 %v9511_v46, %v8048_v9  ;;  %v9507_v6 = vld [vmem:[#allocation8 + $0x16c] sm:$0xf0]  ;;  %v7888_v50 = vld [vmem:[#allocation8 + $0x40] sm:$0xf] }
 0x277   :  { %5263 = vmatpush.bf16.msra.mxu2 %v8209_v28  ;;  %5236 = vmatpush.bf16.msra.mxu0 %v7937_v54  ;;  %v3116_v28 = vadd.f32 %v10169_v36, %v3102_v26  ;;  %v9539_v33 = vld [vmem:[#allocation8 + $0x26c] sm:$0xf0]  ;;  %v3032_v34 = vadd.f32 %v10132_v31, %v3018_v24  ;;  %v10275_v36 = vpop.f32.mrf.mxu1  ;;  %v8033_v63 = vor.u32 %v9507_v6, %v8032_v56  ;;  %v8016_v12 = vld [vmem:[#allocation8 + $0x140] sm:$0xf] }
 0x278   :  { %v9571_v53 = vld [vmem:[#allocation8 + $0x36c] sm:$0xf0]  ;;  %v10277_v49 = vpop.f32.mrf.mxu3  ;;  %v8161_v25 = vor.u32 %v9539_v33, %v8160_v57  ;;  %v2948_v54 = vadd.f32 %v10107_v39, %v2934_v40  ;;  %v3242_v26 = vadd.f32 %v10211_v21, %v3228_v7  ;;  %v8000_v19 = vld [vmem:[#allocation8 + $0x120] sm:$0xf]  ;;  %v10437_v7 = vld [vmem:[#allocation28_spill] sm:$0xff] }
 0x279   :  { %5277 = vmatpush.bf16.msra.mxu3 %v8337_v60  ;;  %5250 = vmatpush.bf16.msra.mxu1 %v8065_v14  ;;  %v3226_v60 = vadd.f32 %v10197_v61, %v3212_v30  ;;  %v9471_v10 = vld [vmem:[#allocation8 + $0x4c] sm:$0xf0]  ;;  %v3130_v31 = vadd.f32 %v10171_v38, %v3116_v28  ;;  %v8289_v61 = vor.u32 %v9571_v53, %v8288_v29  ;;  %v8144_v14 = vld [vmem:[#allocation8 + $0x240] sm:$0xf]  ;;  %v10295_v28 = vpop.f32.mrf.mxu2 }
 0x27a   :  { %v9503_v23 = vld [vmem:[#allocation8 + $0x14c] sm:$0xf0]  ;;  %v3046_v37 = vadd.f32 %v10134_v45, %v3032_v34  ;;  %v7889_v5 = vor.u32 %v9471_v10, %v7888_v50  ;;  %v2962_v1 = vadd.f32 %v10110_v48, %v2948_v54  ;;  %v10431_v45 = vld [vmem:[#allocation24_spill] sm:$0xff]  ;;  %v8128_v30 = vld [vmem:[#allocation8 + $0x220] sm:$0xf]  ;;  %v3256_v21 = vadd.f32 %v10217_v8, %v3242_v26 }
 0x27b   :  { %5264 = vmatpush.bf16.msra.mxu2 %v8193_v15  ;;  %5237 = vmatpush.bf16.msra.mxu0 %v7921_v35  ;;  %v9535_v17 = vld [vmem:[#allocation8 + $0x24c] sm:$0xf0]  ;;  %v8272_v15 = vld [vmem:[#allocation8 + $0x340] sm:$0xf]  ;;  %v3144_v9 = vadd.f32 %v10178_v27, %v3130_v31  ;;  %v3240_v42 = vadd.f32 %v10199_v20, %v3226_v60  ;;  %v8017_v39 = vor.u32 %v9503_v23, %v8016_v12  ;;  %v10290_v11 = vpop.f32.mrf.mxu0 }
 0x27c   :  { %v9567_v3 = vld [vmem:[#allocation8 + $0x34c] sm:$0xf0]  ;;  %v8145_v38 = vor.u32 %v9535_v17, %v8144_v14  ;;  %v3060_v2 = vadd.f32 %v10144_v44, %v3046_v37  ;;  %v3142_v27 = vadd.f32 %v10431_v45, %v10153_v47  ;;  %v10432_v4 = vld [vmem:[#allocation21_spill] sm:$0xff] }
 0x27d   :  { %5278 = vmatpush.bf16.msra.mxu3 %v8321_v41  ;;  %5251 = vmatpush.bf16.msra.mxu1 %v8049_v59  ;;  %v7872_v41 = vld [vmem:[#allocation8 + $0x20] sm:$0xf]  ;;  %v9467_v46 = vld [vmem:[#allocation8 + $0x2c] sm:$0xf0]  ;;  %v8273_v20 = vor.u32 %v9567_v3, %v8272_v15  ;;  %v2976_v62 = vadd.f32 %v10432_v4, %v2962_v1  ;;  %v10439_v15 = vld [vmem:[#allocation20_spill] sm:$0xff] }
 0x27e   :  { %v9499_v18 = vld [vmem:[#allocation8 + $0x12c] sm:$0xf0]  ;;  %v8256_v59 = vld [vmem:[#allocation8 + $0x320] sm:$0xf]  ;;  %v7873_v44 = vor.u32 %v9467_v46, %v7872_v41  ;;  %v3664_v3 = vmax.f32 %v10439_v15, 0.0  ;;  %v592_v46 = vperm.slane %v10234_v0, 4 }
 0x27f   :  { %5265 = vmatpush.bf16.msra.mxu2 %v8177_v13  ;;  %5238 = vmatpush.bf16.msra.mxu0 %v7905_v52  ;;  %v9531_v35 = vld [vmem:[#allocation8 + $0x22c] sm:$0xf0]  ;;  %v7856_v40 = vld [vmem:[#allocation8] sm:$0xf]  ;;  %v8001_v8 = vor.u32 %v9499_v18, %v8000_v19  ;;  %v3672_v37 = vmax.f32 %v2976_v62, 0.0 }
 0x280   :  { %v9563_v13 = vld [vmem:[#allocation8 + $0x32c] sm:$0xf0]  ;;  %v10434_v24 = vld [vmem:[#allocation29_spill] sm:$0xff]  ;;  %v8129_v6 = vor.u32 %v9531_v35, %v8128_v30  ;;  %v10442_v35 = vld [vmem:[#allocation22_spill] sm:$0xff] }
 0x281   :  { %5279 = vmatpush.bf16.msra.mxu3 %v8305_v32  ;;  %5252 = vmatpush.bf16.msra.mxu1 %v8033_v63  ;;  %v10433_v56 = vld [vmem:[#allocation27_spill] sm:$0xff]  ;;  %v3254_v47 = vadd.f32 %v10434_v24, %v3240_v42  ;;  %v10297_v32 = vpop.f32.mrf.mxu1  ;;  %v7984_v33 = vld [vmem:[#allocation8 + $0x100] sm:$0xf] }
 0x282   :  { %v3158_v48 = vadd.f32 %v10433_v56, %v3144_v9  ;;  %v9463_v57 = vld [vmem:[#allocation8 + $0xc] sm:$0xf0]  ;;  %v10436_v60 = vld [vmem:[#allocation25_spill] sm:$0xff]  ;;  %v10440_v9 = vld [vmem:[#allocation26_spill] sm:$0xff]  ;;  %v10308_v56 = vpack.c.bf16 %v3672_v37, %v3664_v3 }
 0x283   :  { %5266 = vmatpush.bf16.msra.mxu2 %v8161_v25  ;;  %5239 = vmatpush.bf16.msra.mxu0 %v7889_v5  ;;  %v9495_v29 = vld [vmem:[#allocation8 + $0x10c] sm:$0xf0]  ;;  %v3156_v52 = vadd.f32 %v10436_v60, %v3142_v27  ;;  %v8257_v25 = vor.u32 %v9563_v13, %v8256_v59  ;;  %v8112_v50 = vld [vmem:[#allocation8 + $0x200] sm:$0xf]  ;;  %v7857_v5 = vor.u32 %v9463_v57, %v7856_v40  ;;  %v10445_v3 = vld [vmem:[#allocation32_spill] sm:$0xff] }
 0x284   :  { %v10435_v53 = vld [vmem:[#allocation23_spill] sm:$0xff]  ;;  %v3172_v63 = vadd.f32 %v10437_v7, %v3158_v48  ;;  %v8240_v12 = vld [vmem:[#allocation8 + $0x300] sm:$0xf]  ;;  %v7985_v19 = vor.u32 %v9495_v29, %v7984_v33  ;;  %v10313_v29 = vpop.f32.mrf.mxu2 }
 0x285   :  { %5280 = vmatpush.bf16.msra.mxu3 %v8289_v61  ;;  %5253 = vmatpush.bf16.msra.mxu1 %v8017_v39  ;;  %v3074_v34 = vadd.f32 %v10435_v53, %v3060_v2  ;;  %v9527_v10 = vld [vmem:[#allocation8 + $0x20c] sm:$0xf0]  ;;  %v10438_v54 = vld [vmem:[#allocation33_spill] sm:$0xff]  ;;  %v3381_v61 = vpop.f32.mrf.mxu3  ;;  %v3170_v42 = vadd.f32 %v10440_v9, %v3156_v52  ;;  %v3395_v53 = vpop.f32.mrf.mxu0  ;;  %v10446_v9 = vld [vmem:[#allocation36_spill] sm:$0xff] }
 0x286   :  { %v3270_v31 = vadd.f32 %v10438_v54, %v3256_v21  ;;  %v9559_v23 = vld [vmem:[#allocation8 + $0x30c] sm:$0xf0]  ;;  %v8480_v14 = vld [vmem:[#allocation8 + $0x4e0] sm:$0xf]  ;;  %v8113_v1 = vor.u32 %v9527_v10, %v8112_v50  ;;  %v3674_v45 = vmax.f32 %v3172_v63, 0.0  ;;  %v3665_v21 = vmax.f32 %v10442_v35, 0.0 }
 0x287   :  { %5267 = vmatpush.bf16.msra.mxu2 %v8145_v38  ;;  %v9619_v17 = vld [vmem:[#allocation8 + $0x4ec] sm:$0xf0]  ;;  %5240 = vmatpush.bf16.msra.mxu0 %v7873_v44  ;;  %v8608_v26 = vld [vmem:[#allocation8 + $0x5e0] sm:$0xf]  ;;  %v10441_v38 = vld [vmem:[#allocation30_spill] sm:$0xff]  ;;  %v3673_v2 = vmax.f32 %v3074_v34, 0.0  ;;  %v8241_v27 = vor.u32 %v9559_v23, %v8240_v12 }
 0x288   :  { %v9651_v39 = vld [vmem:[#allocation8 + $0x5ec] sm:$0xf0]  ;;  %v3268_v41 = vadd.f32 %v10441_v38, %v3254_v47  ;;  %v8736_v18 = vld [vmem:[#allocation8 + $0x6e0] sm:$0xf]  ;;  %v3675_v59 = vmax.f32 %v3270_v31, 0.0  ;;  %v3666_v48 = vmax.f32 %v3170_v42, 0.0 }
 0x289   :  { %5281 = vmatpush.bf16.msra.mxu3 %v8273_v20  ;;  %5254 = vmatpush.bf16.msra.mxu1 %v8001_v8  ;;  %v8481_v20 = vor.u32 %v9619_v17, %v8480_v14  ;;  %v9683_v30 = vld [vmem:[#allocation8 + $0x6ec] sm:$0xf0]  ;;  %v8609_v13 = vor.u32 %v9651_v39, %v8608_v26  ;;  %v8464_v4 = vld [vmem:[#allocation8 + $0x4c0] sm:$0xf]  ;;  %v593_v44 = vperm.slane %v10234_v0, 5  ;;  %v10315_v60 = vpack.c.bf16 %v3673_v2, %v3665_v21  ;;  %v3409_v10 = vpop.f32.mrf.mxu1 }
 0x28a   :  { %v9615_v62 = vld [vmem:[#allocation8 + $0x4cc] sm:$0xf0]  ;;  %v8592_v40 = vld [vmem:[#allocation8 + $0x5c0] sm:$0xf]  ;;  %v3667_v47 = vmax.f32 %v3268_v41, 0.0  ;;  %v8737_v34 = vor.u32 %v9683_v30, %v8736_v18  ;;  %v10317_v52 = vpack.c.bf16 %v3674_v45, %v3666_v48 }
 0x28b   :  { %5268 = vmatpush.bf16.msra.mxu2 %v8129_v6  ;;  %5241 = vmatpush.bf16.msra.mxu0 %v7857_v5  ;;  %v9647_v24 = vld [vmem:[#allocation8 + $0x5cc] sm:$0xf0]  ;;  %v8465_v7 = vor.u32 %v9615_v62, %v8464_v4  ;;  %v8720_v63 = vld [vmem:[#allocation8 + $0x6c0] sm:$0xf]  ;;  %v3380_v23 = vadd.f32 %v10277_v49, %v593_v44  ;;  %v3382_v14 = vadd.f32 %v3381_v61, %v593_v44 }
 0x28c   :  { %v10443_v8 = vld [vmem:[#allocation31_spill] sm:$0xff]  ;;  %v10319_v50 = vpack.c.bf16 %v3675_v59, %v3667_v47  ;;  %v8593_v12 = vor.u32 %v9647_v24, %v8592_v40  ;;  %v8448_v54 = vld [vmem:[#allocation8 + $0x4a0] sm:$0xf]  ;;  %v3423_v4 = vpop.f32.mrf.mxu2 }
 0x28d   :  { %5282 = vmatpush.bf16.msra.mxu3 %v8257_v25  ;;  %v3282_v6 = vadd.f32 %v10443_v8, %v592_v46  ;;  %v10444_v57 = vld [vmem:[#allocation35_spill] sm:$0xff]  ;;  %5255 = vmatpush.bf16.msra.mxu1 %v7985_v19  ;;  %v8576_v17 = vld [vmem:[#allocation8 + $0x5a0] sm:$0xf]  ;;  %v10327_v5 = vpop.f32.mrf.mxu3  ;;  %v3394_v19 = vadd.f32 %v10290_v11, %v3380_v23  ;;  %v3449_v30 = vpop.f32.mrf.mxu0 }
 0x28e   :  { %v3284_v33 = vadd.f32 %v10444_v57, %v592_v46  ;;  %v9679_v25 = vld [vmem:[#allocation8 + $0x6cc] sm:$0xf0]  ;;  %5242 = vmatmul.bf16.vlgmr.msra.gmra.mxu0 %v10308_v56  ;;  %v8704_v49 = vld [vmem:[#allocation8 + $0x6a0] sm:$0xf] }
 0x28f   :  { %5269 = vmatpush.bf16.msra.mxu2 %v8113_v1  ;;  %5290 = vmatpush.bf16.msrb.mxu0 %v8481_v20  ;;  %v9611_v31 = vld [vmem:[#allocation8 + $0x4ac] sm:$0xf0]  ;;  %v3296_v37 = vadd.f32 %v10445_v3, %v3282_v6  ;;  %v8721_v26 = vor.u32 %v9679_v25, %v8720_v63  ;;  %v8432_v41 = vld [vmem:[#allocation8 + $0x480] sm:$0xf]  ;;  %v3396_v1 = vadd.f32 %v3395_v53, %v3382_v14 }
 0x290   :  { %5256 = vmatmul.bf16.vlgmr.msra.gmra.mxu1 %v10315_v60  ;;  %v9643_v15 = vld [vmem:[#allocation8 + $0x5ac] sm:$0xf0]  ;;  %v3298_v42 = vadd.f32 %v10446_v9, %v3284_v33  ;;  %v8449_v39 = vor.u32 %v9611_v31, %v8448_v54  ;;  %v8560_v2 = vld [vmem:[#allocation8 + $0x580] sm:$0xf]  ;;  %v3408_v40 = vadd.f32 %v10297_v32, %v3394_v19 }
 0x291   :  { %5283 = vmatpush.bf16.msra.mxu3 %v8241_v27  ;;  %5304 = vmatpush.bf16.msrb.mxu1 %v8609_v13  ;;  %v9675_v61 = vld [vmem:[#allocation8 + $0x6ac] sm:$0xf0]  ;;  %v8577_v38 = vor.u32 %v9643_v15, %v8576_v17  ;;  %v10447_v27 = vld [vmem:[#allocation34_spill] sm:$0xff]  ;;  %v8688_v59 = vld [vmem:[#allocation8 + $0x680] sm:$0xf]  ;;  %v10333_v48 = vpop.f32.mrf.mxu1  ;;  %v3410_v24 = vadd.f32 %v3409_v10, %v3396_v1 }
 0x292   :  { %5270 = vmatmul.bf16.vlgmr.msra.gmra.mxu2 %v10317_v52  ;;  %v9607_v46 = vld [vmem:[#allocation8 + $0x48c] sm:$0xf0]  ;;  %v3310_v20 = vadd.f32 %v10447_v27, %v3296_v37  ;;  %v3312_v18 = vadd.f32 %v10240_v51, %v3298_v42  ;;  %v8705_v35 = vor.u32 %v9675_v61, %v8704_v49  ;;  %v8416_v11 = vld [vmem:[#allocation8 + $0x460] sm:$0xf]  ;;  %v3422_v32 = vadd.f32 %v10313_v29, %v3408_v40 }
 0x293   :  { %5318 = vmatpush.bf16.msrb.mxu2 %v8737_v34  ;;  %5291 = vmatpush.bf16.msrb.mxu0 %v8465_v7  ;;  %v9639_v45 = vld [vmem:[#allocation8 + $0x58c] sm:$0xf0]  ;;  %v8433_v21 = vor.u32 %v9607_v46, %v8432_v41  ;;  %v8544_v47 = vld [vmem:[#allocation8 + $0x560] sm:$0xf]  ;;  %v3424_v53 = vadd.f32 %v3423_v4, %v3410_v24  ;;  %v7970_v4 = vld [vmem:[#allocation8 + $0xf0] sm:$0xf0] }
 0x294   :  { %5284 = vmatmul.bf16.vlgmr.msra.gmra.mxu3 %v10319_v50  ;;  %v9671_v13 = vld [vmem:[#allocation8 + $0x68c] sm:$0xf0]  ;;  %v8561_v62 = vor.u32 %v9639_v45, %v8560_v2  ;;  %v10448_v51 = vld [vmem:[#allocation37_spill] sm:$0xff]  ;;  %v3326_v57 = vadd.f32 %v10258_v22, %v3312_v18  ;;  %v3436_v29 = vadd.f32 %v10327_v5, %v3422_v32 }
 0x295   :  { %5305 = vmatpush.bf16.msrb.mxu1 %v8593_v12  ;;  %v9603_v44 = vld [vmem:[#allocation8 + $0x46c] sm:$0xf0]  ;;  %v3324_v6 = vadd.f32 %v10448_v51, %v3310_v20  ;;  %v8689_v33 = vor.u32 %v9671_v13, %v8688_v59  ;;  %v8672_v7 = vld [vmem:[#allocation8 + $0x660] sm:$0xf]  ;;  %v3437_v25 = vpop.f32.mrf.mxu3  ;;  %v3451_v17 = vpop.f32.mrf.mxu0 }
 0x296   :  { %v9635_v8 = vld [vmem:[#allocation8 + $0x56c] sm:$0xf0]  ;;  %v8417_v34 = vor.u32 %v9603_v44, %v8416_v11  ;;  %v8400_v54 = vld [vmem:[#allocation8 + $0x440] sm:$0xf]  ;;  %v3340_v22 = vadd.f32 %v10270_v58, %v3326_v57  ;;  %v3438_v3 = vadd.f32 %v3437_v25, %v3424_v53  ;;  %v3450_v1 = vadd.f32 %v3449_v30, %v3436_v29  ;;  %v8098_v11 = vld [vmem:[#allocation8 + $0x1f0] sm:$0xf0] }
 0x297   :  { %5319 = vmatpush.bf16.msrb.mxu2 %v8721_v26  ;;  %5292 = vmatpush.bf16.msrb.mxu0 %v8449_v39  ;;  %v9667_v63 = vld [vmem:[#allocation8 + $0x66c] sm:$0xf0]  ;;  %v8545_v12 = vor.u32 %v9635_v8, %v8544_v47  ;;  %v8528_v10 = vld [vmem:[#allocation8 + $0x540] sm:$0xf]  ;;  %v3338_v14 = vadd.f32 %v10242_v16, %v3324_v6  ;;  %v9553_v6 = vld [vmem:[#allocation8 + $0x2e4] sm:$0xf] }
 0x298   :  { %v9599_v31 = vld [vmem:[#allocation8 + $0x44c] sm:$0xf0]  ;;  %v8673_v15 = vor.u32 %v9667_v63, %v8672_v7  ;;  %v8656_v9 = vld [vmem:[#allocation8 + $0x640] sm:$0xf]  ;;  %v3452_v61 = vadd.f32 %v3451_v17, %v3438_v3  ;;  %v3354_v58 = vadd.f32 %v10275_v36, %v3340_v22  ;;  %v3464_v44 = vadd.f32 %v10333_v48, %v3450_v1  ;;  %v8226_v57 = vld [vmem:[#allocation8 + $0x2f0] sm:$0xf0] }
 0x299   :  { %5306 = vmatpush.bf16.msrb.mxu1 %v8577_v38  ;;  %v9631_v23 = vld [vmem:[#allocation8 + $0x54c] sm:$0xf0]  ;;  %v8401_v37 = vor.u32 %v9599_v31, %v8400_v54  ;;  %v8384_v39 = vld [vmem:[#allocation8 + $0x420] sm:$0xf]  ;;  %v3352_v16 = vadd.f32 %v10251_v55, %v3338_v14  ;;  %v3465_v46 = vpop.f32.mrf.mxu1  ;;  %v9489_v55 = vld [vmem:[#allocation8 + $0xe4] sm:$0xf]  ;;  %v8229_v54 = vor.u32 %v9553_v6, %v8226_v57 }
 0x29a   :  { %v9663_v42 = vld [vmem:[#allocation8 + $0x64c] sm:$0xf0]  ;;  %v8529_v26 = vor.u32 %v9631_v23, %v8528_v10  ;;  %v8512_v38 = vld [vmem:[#allocation8 + $0x520] sm:$0xf]  ;;  %v3368_v20 = vadd.f32 %v10295_v28, %v3354_v58  ;;  %v3466_v59 = vadd.f32 %v3465_v46, %v3452_v61  ;;  %v7973_v51 = vor.u32 %v9489_v55, %v7970_v4  ;;  %v9517_v63 = vld [vmem:[#allocation8 + $0x1c4] sm:$0xf] }
 0x29b   :  { %5320 = vmatpush.bf16.msrb.mxu2 %v8705_v35  ;;  %5293 = vmatpush.bf16.msrb.mxu0 %v8433_v21  ;;  %v9595_v49 = vld [vmem:[#allocation8 + $0x42c] sm:$0xf0]  ;;  %v8657_v19 = vor.u32 %v9663_v42, %v8656_v9  ;;  %v8640_v45 = vld [vmem:[#allocation8 + $0x620] sm:$0xf]  ;;  %v3366_v36 = vadd.f32 %v10268_v43, %v3352_v16  ;;  %v7954_v43 = vld [vmem:[#allocation8 + $0xd0] sm:$0xf0] }
 0x29c   :  { %v9627_v41 = vld [vmem:[#allocation8 + $0x52c] sm:$0xf0]  ;;  %v8385_v2 = vor.u32 %v9595_v49, %v8384_v39  ;;  %v8368_v5 = vld [vmem:[#allocation8 + $0x400] sm:$0xf]  ;;  %v3676_v47 = vmax.f32 %v3368_v20, 0.0  ;;  %v3669_v48 = vmax.f32 %v3464_v44, 0.0  ;;  %v10353_v20 = vpop.f32.mrf.mxu2 }
 0x29d   :  { %5307 = vmatpush.bf16.msrb.mxu1 %v8561_v62  ;;  %v9659_v27 = vld [vmem:[#allocation8 + $0x62c] sm:$0xf0]  ;;  %v8513_v18 = vor.u32 %v9627_v41, %v8512_v38  ;;  %v8496_v21 = vld [vmem:[#allocation8 + $0x500] sm:$0xf]  ;;  %v9521_v62 = vld [vmem:[#allocation8 + $0x1e4] sm:$0xf]  ;;  %v10355_v44 = vpop.f32.mrf.mxu3 }
 0x29e   :  { %v9591_v35 = vld [vmem:[#allocation8 + $0x40c] sm:$0xf0]  ;;  %v8641_v30 = vor.u32 %v9659_v27, %v8640_v45  ;;  %v8624_v28 = vld [vmem:[#allocation8 + $0x600] sm:$0xf]  ;;  %v8101_v53 = vor.u32 %v9521_v62, %v8098_v11  ;;  %v3668_v7 = vmax.f32 %v3366_v36, 0.0 }
 0x29f   :  { %5321 = vmatpush.bf16.msrb.mxu2 %v8689_v33  ;;  %5294 = vmatpush.bf16.msrb.mxu0 %v8417_v34  ;;  %v9623_v13 = vld [vmem:[#allocation8 + $0x50c] sm:$0xf0]  ;;  %v8369_v40 = vor.u32 %v9591_v35, %v8368_v5  ;;  %v3677_v33 = vmax.f32 %v3466_v59, 0.0  ;;  %v9485_v34 = vld [vmem:[#allocation8 + $0xc4] sm:$0xf] }
 0x2a0   :  { %v9655_v24 = vld [vmem:[#allocation8 + $0x60c] sm:$0xf0]  ;;  %v8497_v8 = vor.u32 %v9623_v13, %v8496_v21  ;;  %v8082_v25 = vld [vmem:[#allocation8 + $0x1d0] sm:$0xf0]  ;;  %v9549_v31 = vld [vmem:[#allocation8 + $0x2c4] sm:$0xf]  ;;  %v10347_v32 = vpack.c.bf16 %v3676_v47, %v3668_v7  ;;  %v7957_v10 = vor.u32 %v9485_v34, %v7954_v43 }
 0x2a1   :  { %5308 = vmatpush.bf16.msrb.mxu1 %v8545_v12  ;;  %v8625_v12 = vor.u32 %v9655_v24, %v8624_v28  ;;  %v8210_v23 = vld [vmem:[#allocation8 + $0x2d0] sm:$0xf0]  ;;  %v8864_v14 = vld [vmem:[#allocation8 + $0x7e0] sm:$0xf]  ;;  %v9715_v22 = vld [vmem:[#allocation8 + $0x7ec] sm:$0xf0]  ;;  %v10349_v17 = vpack.c.bf16 %v3677_v33, %v3669_v48 }
 0x2a2   :  { %v9481_v3 = vld [vmem:[#allocation8 + $0xa4] sm:$0xf]  ;;  %v8865_v9 = vor.u32 %v9715_v22, %v8864_v14  ;;  %v8213_v39 = vor.u32 %v9549_v31, %v8210_v23  ;;  %v8194_v61 = vld [vmem:[#allocation8 + $0x2b0] sm:$0xf0]  ;;  %v8848_v38 = vld [vmem:[#allocation8 + $0x7c0] sm:$0xf] }
 0x2a3   :  { %5322 = vmatpush.bf16.msrb.mxu2 %v8673_v15  ;;  %5295 = vmatpush.bf16.msrb.mxu0 %v8401_v37  ;;  %v8085_v15 = vor.u32 %v9517_v63, %v8082_v25  ;;  %v7938_v37 = vld [vmem:[#allocation8 + $0xb0] sm:$0xf0]  ;;  %v9513_v42 = vld [vmem:[#allocation8 + $0x1a4] sm:$0xf]  ;;  %v9711_v41 = vld [vmem:[#allocation8 + $0x7cc] sm:$0xf0] }
 0x2a4   :  { %v9545_v49 = vld [vmem:[#allocation8 + $0x2a4] sm:$0xf]  ;;  %v7941_v29 = vor.u32 %v9481_v3, %v7938_v37  ;;  %5332 = vmatpush.bf16.msrb.mxu3 %v8865_v9  ;;  %v7922_v46 = vld [vmem:[#allocation8 + $0x90] sm:$0xf0]  ;;  %v8832_v35 = vld [vmem:[#allocation8 + $0x7a0] sm:$0xf]  ;;  %v3479_v23 = vpop.f32.mrf.mxu2  ;;  %v3505_v9 = vpop.f32.mrf.mxu0 }
 0x2a5   :  { %5309 = vmatpush.bf16.msrb.mxu1 %v8529_v26  ;;  %v8066_v26 = vld [vmem:[#allocation8 + $0x1b0] sm:$0xf0]  ;;  %v9477_v58 = vld [vmem:[#allocation8 + $0x84] sm:$0xf]  ;;  %v8197_v45 = vor.u32 %v9545_v49, %v8194_v61  ;;  %v9707_v21 = vld [vmem:[#allocation8 + $0x7ac] sm:$0xf0] }
 0x2a6   :  { %v8069_v16 = vor.u32 %v9513_v42, %v8066_v26  ;;  %v9509_v1 = vld [vmem:[#allocation8 + $0x184] sm:$0xf]  ;;  %v8178_v5 = vld [vmem:[#allocation8 + $0x290] sm:$0xf0]  ;;  %v8833_v4 = vor.u32 %v9707_v21, %v8832_v35  ;;  %v8816_v24 = vld [vmem:[#allocation8 + $0x780] sm:$0xf] }
 0x2a7   :  { %5323 = vmatpush.bf16.msrb.mxu2 %v8657_v19  ;;  %5296 = vmatpush.bf16.msrb.mxu0 %v8385_v2  ;;  %v8849_v19 = vor.u32 %v9711_v41, %v8848_v38  ;;  %v8050_v2 = vld [vmem:[#allocation8 + $0x190] sm:$0xf0]  ;;  %v9541_v27 = vld [vmem:[#allocation8 + $0x284] sm:$0xf]  ;;  %v9703_v47 = vld [vmem:[#allocation8 + $0x78c] sm:$0xf0] }
 0x2a8   :  { %v8053_v59 = vor.u32 %v9509_v1, %v8050_v2  ;;  %v9473_v13 = vld [vmem:[#allocation8 + $0x64] sm:$0xf]  ;;  %v7906_v55 = vld [vmem:[#allocation8 + $0x70] sm:$0xf0]  ;;  %v8181_v11 = vor.u32 %v9541_v27, %v8178_v5  ;;  %v8817_v57 = vor.u32 %v9703_v47, %v8816_v24  ;;  %v8800_v25 = vld [vmem:[#allocation8 + $0x760] sm:$0xf] }
 0x2a9   :  { %5310 = vmatpush.bf16.msrb.mxu1 %v8513_v18  ;;  %v7925_v18 = vor.u32 %v9477_v58, %v7922_v46  ;;  %5333 = vmatpush.bf16.msrb.mxu3 %v8849_v19  ;;  %v9505_v36 = vld [vmem:[#allocation8 + $0x164] sm:$0xf]  ;;  %v8034_v62 = vld [vmem:[#allocation8 + $0x170] sm:$0xf0]  ;;  %v8784_v49 = vld [vmem:[#allocation8 + $0x740] sm:$0xf] }
 0x2aa   :  { %v8162_v28 = vld [vmem:[#allocation8 + $0x270] sm:$0xf0]  ;;  %v9501_v33 = vld [vmem:[#allocation8 + $0x144] sm:$0xf]  ;;  %v9695_v41 = vld [vmem:[#allocation8 + $0x74c] sm:$0xf0] }
 0x2ab   :  { %5324 = vmatpush.bf16.msrb.mxu2 %v8641_v30  ;;  %5297 = vmatpush.bf16.msrb.mxu0 %v8369_v40  ;;  %v9537_v30 = vld [vmem:[#allocation8 + $0x264] sm:$0xf]  ;;  %v7909_v40 = vor.u32 %v9473_v13, %v7906_v55  ;;  %v7890_v6 = vld [vmem:[#allocation8 + $0x50] sm:$0xf0]  ;;  %v8768_v21 = vld [vmem:[#allocation8 + $0x720] sm:$0xf] }
 0x2ac   :  { %v8165_v34 = vor.u32 %v9537_v30, %v8162_v28  ;;  %v9533_v43 = vld [vmem:[#allocation8 + $0x244] sm:$0xf]  ;;  %v8146_v63 = vld [vmem:[#allocation8 + $0x250] sm:$0xf0] }
 0x2ad   :  { %5311 = vmatpush.bf16.msrb.mxu1 %v8497_v8  ;;  %5334 = vmatpush.bf16.msrb.mxu3 %v8833_v4  ;;  %v8037_v8 = vor.u32 %v9505_v36, %v8034_v62  ;;  %v7874_v31 = vld [vmem:[#allocation8 + $0x30] sm:$0xf0]  ;;  %v9497_v14 = vld [vmem:[#allocation8 + $0x124] sm:$0xf]  ;;  %v8149_v37 = vor.u32 %v9533_v43, %v8146_v63  ;;  %v3519_v36 = vpop.f32.mrf.mxu1 }
 0x2ae   :  { %5298 = vmatmul.bf16.vlgmr.msrb.gmra.mxu0 %v10347_v32  ;;  %v8002_v22 = vld [vmem:[#allocation8 + $0x130] sm:$0xf0]  ;;  %v9461_v3 = vld [vmem:[#allocation8 + $0x4] sm:$0xf] }
 0x2af   :  { %5346 = vmatpush.bf16.msra.mxu0 %v7973_v51  ;;  %5325 = vmatpush.bf16.msrb.mxu2 %v8625_v12  ;;  %v9469_v51 = vld [vmem:[#allocation8 + $0x44] sm:$0xf]  ;;  %v9699_v12 = vld [vmem:[#allocation8 + $0x76c] sm:$0xf0]  ;;  %v7858_v61 = vld [vmem:[#allocation8 + $0x10] sm:$0xf0] }
 0x2b0   :  { %5312 = vmatmul.bf16.vlgmr.msrb.gmra.mxu1 %v10349_v17  ;;  %v7893_v7 = vor.u32 %v9469_v51, %v7890_v6  ;;  %v9529_v26 = vld [vmem:[#allocation8 + $0x224] sm:$0xf]  ;;  %v7986_v58 = vld [vmem:[#allocation8 + $0x110] sm:$0xf0]  ;;  %v7861_v5 = vor.u32 %v9461_v3, %v7858_v61  ;;  %v8752_v51 = vld [vmem:[#allocation8 + $0x700] sm:$0xf] }
 0x2b1   :  { %5360 = vmatpush.bf16.msra.mxu1 %v8101_v53  ;;  %v8018_v53 = vld [vmem:[#allocation8 + $0x150] sm:$0xf0]  ;;  %5335 = vmatpush.bf16.msrb.mxu3 %v8817_v57  ;;  %v9493_v38 = vld [vmem:[#allocation8 + $0x104] sm:$0xf]  ;;  %v9687_v6 = vld [vmem:[#allocation8 + $0x70c] sm:$0xf0] }
 0x2b2   :  { %v8021_v48 = vor.u32 %v9501_v33, %v8018_v53  ;;  %v9617_v46 = vld [vmem:[#allocation8 + $0x4e4] sm:$0xf]  ;;  %v8482_v19 = vld [vmem:[#allocation8 + $0x4f0] sm:$0xf0]  ;;  %v7989_v13 = vor.u32 %v9493_v38, %v7986_v58  ;;  %v8753_v53 = vor.u32 %v9687_v6, %v8752_v51 }
 0x2b3   :  { %5374 = vmatpush.bf16.msra.mxu2 %v8229_v54  ;;  %5347 = vmatpush.bf16.msra.mxu0 %v7957_v10  ;;  %v9465_v54 = vld [vmem:[#allocation8 + $0x24] sm:$0xf]  ;;  %v8801_v10 = vor.u32 %v9699_v12, %v8800_v25  ;;  %v8114_v35 = vld [vmem:[#allocation8 + $0x210] sm:$0xf0]  ;;  %v8485_v55 = vor.u32 %v9617_v46, %v8482_v19 }
 0x2b4   :  { %v7877_v42 = vor.u32 %v9465_v54, %v7874_v31  ;;  %v9649_v2 = vld [vmem:[#allocation8 + $0x5e4] sm:$0xf]  ;;  %v8466_v30 = vld [vmem:[#allocation8 + $0x4d0] sm:$0xf0] }
 0x2b5   :  { %5361 = vmatpush.bf16.msra.mxu1 %v8085_v15  ;;  %v594_v15 = vperm.slane %v10234_v0, 6  ;;  %5336 = vmatpush.bf16.msrb.mxu3 %v8801_v10  ;;  %v8785_v0 = vor.u32 %v9695_v41, %v8784_v49  ;;  %v9645_v28 = vld [vmem:[#allocation8 + $0x5c4] sm:$0xf]  ;;  %v8594_v24 = vld [vmem:[#allocation8 + $0x5d0] sm:$0xf0] }
 0x2b6   :  { %v9609_v33 = vld [vmem:[#allocation8 + $0x4a4] sm:$0xf]  ;;  %v8597_v43 = vor.u32 %v9645_v28, %v8594_v24  ;;  %v8354_v63 = vld [vmem:[#allocation8 + $0x3f0] sm:$0xf0] }
 0x2b7   :  { %5375 = vmatpush.bf16.msra.mxu2 %v8213_v39  ;;  %5348 = vmatpush.bf16.msra.mxu0 %v7941_v29  ;;  %v8130_v39 = vld [vmem:[#allocation8 + $0x230] sm:$0xf0]  ;;  %v8005_v29 = vor.u32 %v9497_v14, %v8002_v22  ;;  %v3478_v1 = vadd.f32 %v10353_v20, %v594_v15  ;;  %v9581_v14 = vld [vmem:[#allocation8 + $0x3c4] sm:$0xf] }
 0x2b8   :  { %v8133_v27 = vor.u32 %v9529_v26, %v8130_v39  ;;  %v8578_v54 = vld [vmem:[#allocation8 + $0x5b0] sm:$0xf0]  ;;  %v9605_v3 = vld [vmem:[#allocation8 + $0x484] sm:$0xf] }
 0x2b9   :  { %5362 = vmatpush.bf16.msra.mxu1 %v8069_v16  ;;  %v3493_v16 = vpop.f32.mrf.mxu3  ;;  %5337 = vmatpush.bf16.msrb.mxu3 %v8785_v0  ;;  %v3492_v20 = vadd.f32 %v10355_v44, %v3478_v1  ;;  %v9585_v44 = vld [vmem:[#allocation8 + $0x3e4] sm:$0xf]  ;;  %v8338_v22 = vld [vmem:[#allocation8 + $0x3d0] sm:$0xf0] }
 0x2ba   :  { %v8357_v31 = vor.u32 %v9585_v44, %v8354_v63  ;;  %v9637_v39 = vld [vmem:[#allocation8 + $0x584] sm:$0xf]  ;;  %v8562_v49 = vld [vmem:[#allocation8 + $0x590] sm:$0xf0] }
 0x2bb   :  { %5376 = vmatpush.bf16.msra.mxu2 %v8197_v45  ;;  %5349 = vmatpush.bf16.msra.mxu0 %v7925_v18  ;;  %v8610_v45 = vld [vmem:[#allocation8 + $0x5f0] sm:$0xf0]  ;;  %v9525_v18 = vld [vmem:[#allocation8 + $0x204] sm:$0xf]  ;;  %v3506_v12 = vadd.f32 %v3505_v9, %v3492_v20  ;;  %v8341_v9 = vor.u32 %v9581_v14, %v8338_v22  ;;  %v8565_v46 = vor.u32 %v9637_v39, %v8562_v49  ;;  %v9524_v49 = vld [vmem:[#allocation8 + $0x1f4] sm:$0xf0] }
 0x2bc   :  { %v8613_v62 = vor.u32 %v9649_v2, %v8610_v45  ;;  %v8117_v47 = vor.u32 %v9525_v18, %v8114_v35  ;;  %v9577_v38 = vld [vmem:[#allocation8 + $0x3a4] sm:$0xf]  ;;  %v8322_v41 = vld [vmem:[#allocation8 + $0x3b0] sm:$0xf0] }
 0x2bd   :  { %5363 = vmatpush.bf16.msra.mxu1 %v8053_v59  ;;  %v9691_v59 = vld [vmem:[#allocation8 + $0x72c] sm:$0xf0]  ;;  %v9601_v19 = vld [vmem:[#allocation8 + $0x464] sm:$0xf]  ;;  %v8418_v0 = vld [vmem:[#allocation8 + $0x470] sm:$0xf0]  ;;  %v8325_v1 = vor.u32 %v9577_v38, %v8322_v41 }
 0x2be   :  { %v8769_v4 = vor.u32 %v9691_v59, %v8768_v21  ;;  %v8546_v18 = vld [vmem:[#allocation8 + $0x570] sm:$0xf0]  ;;  %v8421_v35 = vor.u32 %v9601_v19, %v8418_v0  ;;  %v9573_v21 = vld [vmem:[#allocation8 + $0x384] sm:$0xf] }
 0x2bf   :  { %5377 = vmatpush.bf16.msra.mxu2 %v8181_v11  ;;  %5350 = vmatpush.bf16.msra.mxu0 %v7909_v40  ;;  %v9613_v11 = vld [vmem:[#allocation8 + $0x4c4] sm:$0xf]  ;;  %v3480_v40 = vadd.f32 %v3479_v23, %v594_v15  ;;  %v8306_v59 = vld [vmem:[#allocation8 + $0x390] sm:$0xf0] }
 0x2c0   :  { %5338 = vmatpush.bf16.msrb.mxu3 %v8769_v4  ;;  %v8469_v57 = vor.u32 %v9613_v11, %v8466_v30  ;;  %v9597_v4 = vld [vmem:[#allocation8 + $0x444] sm:$0xf]  ;;  %v8530_v20 = vld [vmem:[#allocation8 + $0x550] sm:$0xf0] }
 0x2c1   :  { %5364 = vmatpush.bf16.msra.mxu1 %v8037_v8  ;;  %v3533_v8 = vpop.f32.mrf.mxu2  ;;  %v3494_v25 = vadd.f32 %v3493_v16, %v3480_v40  ;;  %v3547_v10 = vpop.f32.mrf.mxu3  ;;  %v9629_v30 = vld [vmem:[#allocation8 + $0x544] sm:$0xf]  ;;  %v8738_v63 = vld [vmem:[#allocation8 + $0x6f0] sm:$0xf0] }
 0x2c2   :  { %v8533_v6 = vor.u32 %v9629_v30, %v8530_v20  ;;  %v9681_v44 = vld [vmem:[#allocation8 + $0x6e4] sm:$0xf] }
 0x2c3   :  { %5378 = vmatpush.bf16.msra.mxu2 %v8165_v34  ;;  %5351 = vmatpush.bf16.msra.mxu0 %v7893_v7  ;;  %v3507_v34 = vpop.f32.mrf.mxu0  ;;  %v8450_v7 = vld [vmem:[#allocation8 + $0x4b0] sm:$0xf0]  ;;  %v8741_v14 = vor.u32 %v9681_v44, %v8738_v63  ;;  %v9621_v22 = vld [vmem:[#allocation8 + $0x504] sm:$0xf]  ;;  %v8056_v44 = vld [vmem:[#allocation8 + $0x188] sm:$0xf] }
 0x2c4   :  { %5339 = vmatpush.bf16.msrb.mxu3 %v8753_v53  ;;  %v8453_v23 = vor.u32 %v9609_v33, %v8450_v7  ;;  %v3508_v26 = vadd.f32 %v3507_v34, %v3494_v25  ;;  %v8386_v33 = vld [vmem:[#allocation8 + $0x430] sm:$0xf0]  ;;  %v9625_v53 = vld [vmem:[#allocation8 + $0x524] sm:$0xf] }
 0x2c5   :  { %5365 = vmatpush.bf16.msra.mxu1 %v8021_v48  ;;  %v9641_v48 = vld [vmem:[#allocation8 + $0x5a4] sm:$0xf]  ;;  %v8514_v7 = vld [vmem:[#allocation8 + $0x530] sm:$0xf0] }
 0x2c6   :  { %v8581_v15 = vor.u32 %v9641_v48, %v8578_v54  ;;  %v9589_v25 = vld [vmem:[#allocation8 + $0x404] sm:$0xf] }
 0x2c7   :  { %5379 = vmatpush.bf16.msra.mxu2 %v8149_v37  ;;  %5352 = vmatpush.bf16.msra.mxu0 %v7877_v42  ;;  %v8434_v37 = vld [vmem:[#allocation8 + $0x490] sm:$0xf0]  ;;  %v3520_v42 = vadd.f32 %v3519_v36, %v3506_v12 }
 0x2c8   :  { %5388 = vmatpush.bf16.msra.mxu3 %v8357_v31  ;;  %v8437_v61 = vor.u32 %v9605_v3, %v8434_v37  ;;  %v8402_v36 = vld [vmem:[#allocation8 + $0x450] sm:$0xf0] }
 0x2c9   :  { %5366 = vmatpush.bf16.msra.mxu1 %v8005_v29  ;;  %v3521_v29 = vpop.f32.mrf.mxu1  ;;  %v3535_v16 = vpop.f32.mrf.mxu2  ;;  %v3534_v2 = vadd.f32 %v3533_v8, %v3520_v42  ;;  %v8405_v24 = vor.u32 %v9597_v4, %v8402_v36  ;;  %v8290_v8 = vld [vmem:[#allocation8 + $0x370] sm:$0xf0]  ;;  %v9492_v42 = vld [vmem:[#allocation8 + $0xf4] sm:$0xf0] }
 0x2ca   :  { %v3522_v45 = vadd.f32 %v3521_v29, %v3508_v26  ;;  %v8370_v31 = vld [vmem:[#allocation8 + $0x410] sm:$0xf0]  ;;  %v8104_v26 = vld [vmem:[#allocation8 + $0x1e8] sm:$0xf]  ;;  %v9677_v29 = vld [vmem:[#allocation8 + $0x6c4] sm:$0xf] }
 0x2cb   :  { %5380 = vmatpush.bf16.msra.mxu2 %v8133_v27  ;;  %5353 = vmatpush.bf16.msra.mxu0 %v7861_v5  ;;  %v3561_v58 = vpop.f32.mrf.mxu0  ;;  %v9633_v27 = vld [vmem:[#allocation8 + $0x564] sm:$0xf]  ;;  %v3548_v11 = vadd.f32 %v3547_v10, %v3534_v2  ;;  %v8274_v3 = vld [vmem:[#allocation8 + $0x350] sm:$0xf0]  ;;  %v8373_v41 = vor.u32 %v9589_v25, %v8370_v31  ;;  %v8105_v0 = vor.u32 %v9524_v49, %v8104_v26  ;;  %v7960_v2 = vld [vmem:[#allocation8 + $0xc8] sm:$0xf] }
 0x2cc   :  { %5389 = vmatpush.bf16.msra.mxu3 %v8341_v9  ;;  %v3536_v5 = vadd.f32 %v3535_v16, %v3522_v45  ;;  %v9565_v10 = vld [vmem:[#allocation8 + $0x344] sm:$0xf]  ;;  %v7976_v9 = vld [vmem:[#allocation8 + $0xe8] sm:$0xf]  ;;  %v9488_v45 = vld [vmem:[#allocation8 + $0xd4] sm:$0xf0] }
 0x2cd   :  { %5367 = vmatpush.bf16.msra.mxu1 %v7989_v13  ;;  %v3549_v13 = vpop.f32.mrf.mxu3  ;;  %v3562_v28 = vadd.f32 %v3561_v58, %v3548_v11  ;;  %v8277_v39 = vor.u32 %v9565_v10, %v8274_v3  ;;  %v9561_v16 = vld [vmem:[#allocation8 + $0x324] sm:$0xf]  ;;  %v8258_v58 = vld [vmem:[#allocation8 + $0x330] sm:$0xf0]  ;;  %v7977_v19 = vor.u32 %v9492_v42, %v7976_v9  ;;  %v9769_v4 = vld [vmem:[#allocation7] sm:$0xff]  ;;  %v7961_v11 = vor.u32 %v9488_v45, %v7960_v2 }
 0x2ce   :  { %5354 = vmatmul.bf16.vlgmr.msra.gmra.mxu0 %v10308_v56  ;;  %v3550_v40 = vadd.f32 %v3549_v13, %v3536_v5  ;;  %v9673_v5 = vld [vmem:[#allocation8 + $0x6a4] sm:$0xf]  ;;  %v595_v36 = vperm.slane %v9769_v4, 7  ;;  %v9512_v25 = vld [vmem:[#allocation8 + $0x194] sm:$0xf0] }
 0x2cf   :  { %5402 = vmatpush.bf16.msrb.mxu0 %v8485_v55  ;;  %5381 = vmatpush.bf16.msra.mxu2 %v8117_v47  ;;  %v8549_v55 = vor.u32 %v9633_v27, %v8546_v18  ;;  %v9569_v47 = vld [vmem:[#allocation8 + $0x364] sm:$0xf]  ;;  %v3670_v12 = vmax.f32 %v3562_v28, 0.0  ;;  %v8088_v27 = vld [vmem:[#allocation8 + $0x1c8] sm:$0xf]  ;;  %v8057_v10 = vor.u32 %v9512_v25, %v8056_v44 }
 0x2d0   :  { %5368 = vmatmul.bf16.vlgmr.msra.gmra.mxu1 %v10315_v60  ;;  %5390 = vmatpush.bf16.msra.mxu3 %v8325_v1  ;;  %v8293_v34 = vor.u32 %v9569_v47, %v8290_v8  ;;  %v9520_v18 = vld [vmem:[#allocation8 + $0x1d4] sm:$0xf0]  ;;  %v9557_v13 = vld [vmem:[#allocation8 + $0x304] sm:$0xf]  ;;  %v8008_v4 = vld [vmem:[#allocation8 + $0x128] sm:$0xf] }
 0x2d1   :  { %5416 = vmatpush.bf16.msrb.mxu1 %v8613_v62  ;;  %v8309_v62 = vor.u32 %v9573_v21, %v8306_v59  ;;  %v3575_v38 = vpop.f32.mrf.mxu1  ;;  %v8261_v21 = vor.u32 %v9561_v16, %v8258_v58  ;;  %v3589_v59 = vpop.f32.mrf.mxu2  ;;  %v8089_v30 = vor.u32 %v9520_v18, %v8088_v27  ;;  %v9484_v28 = vld [vmem:[#allocation8 + $0xb4] sm:$0xf0]  ;;  %v9669_v8 = vld [vmem:[#allocation8 + $0x684] sm:$0xf]  ;;  %v7896_v58 = vld [vmem:[#allocation8 + $0x48] sm:$0xf] }
 0x2d2   :  { %v9516_v47 = vld [vmem:[#allocation8 + $0x1b4] sm:$0xf0]  ;;  %v3576_v63 = vadd.f32 %v3575_v38, %v595_v36  ;;  %v9661_v49 = vld [vmem:[#allocation8 + $0x644] sm:$0xf]  ;;  %v8642_v27 = vld [vmem:[#allocation8 + $0x630] sm:$0xf0] }
 0x2d3   :  { %5403 = vmatpush.bf16.msrb.mxu0 %v8469_v57  ;;  %v3563_v51 = vpop.f32.mrf.mxu0  ;;  %v9593_v57 = vld [vmem:[#allocation8 + $0x424] sm:$0xf]  ;;  %v9504_v2 = vld [vmem:[#allocation8 + $0x154] sm:$0xf0] }
 0x2d4   :  { %5391 = vmatpush.bf16.msra.mxu3 %v8309_v62  ;;  %v8389_v54 = vor.u32 %v9593_v57, %v8386_v33  ;;  %v3590_v3 = vadd.f32 %v3589_v59, %v3576_v63  ;;  %v9657_v45 = vld [vmem:[#allocation8 + $0x624] sm:$0xf]  ;;  %v8488_v63 = vld [vmem:[#allocation8 + $0x4e8] sm:$0xf]  ;;  %v9620_v25 = vld [vmem:[#allocation8 + $0x4f4] sm:$0xf0] }
 0x2d5   :  { %5417 = vmatpush.bf16.msrb.mxu1 %v8597_v43  ;;  %v3564_v43 = vadd.f32 %v3563_v51, %v3550_v40  ;;  %v3603_v62 = vpop.f32.mrf.mxu3  ;;  %v7944_v40 = vld [vmem:[#allocation8 + $0xa8] sm:$0xf]  ;;  %v8690_v51 = vld [vmem:[#allocation8 + $0x690] sm:$0xf0]  ;;  %v8645_v59 = vor.u32 %v9657_v45, %v8642_v27 }
 0x2d6   :  { %v7945_v57 = vor.u32 %v9484_v28, %v7944_v40  ;;  %v8626_v40 = vld [vmem:[#allocation8 + $0x610] sm:$0xf0]  ;;  %v8232_v28 = vld [vmem:[#allocation8 + $0x2e8] sm:$0xf] }
 0x2d7   :  { %5404 = vmatpush.bf16.msrb.mxu0 %v8453_v23  ;;  %v3678_v48 = vmax.f32 %v3564_v43, 0.0  ;;  %v8517_v23 = vor.u32 %v9625_v53, %v8514_v7  ;;  %v7928_v43 = vld [vmem:[#allocation8 + $0x88] sm:$0xf]  ;;  %v9480_v7 = vld [vmem:[#allocation8 + $0x94] sm:$0xf0] }
 0x2d8   :  { %5392 = vmatpush.bf16.msra.mxu3 %v8293_v34  ;;  %v8693_v34 = vor.u32 %v9669_v8, %v8690_v51 }
 0x2d9   :  { %5418 = vmatpush.bf16.msrb.mxu1 %v8581_v15  ;;  %v8498_v15 = vld [vmem:[#allocation8 + $0x510] sm:$0xf0]  ;;  %v10362_v37 = vpack.c.bf16 %v3678_v48, %v3670_v12  ;;  %v3577_v33 = vpop.f32.mrf.mxu1  ;;  %v9665_v12 = vld [vmem:[#allocation8 + $0x664] sm:$0xf]  ;;  %v3591_v31 = vpop.f32.mrf.mxu2 }
 0x2da   :  { %v8674_v48 = vld [vmem:[#allocation8 + $0x670] sm:$0xf0]  ;;  %v3578_v9 = vadd.f32 %v3577_v33, %v595_v36 }
 0x2db   :  { %5405 = vmatpush.bf16.msrb.mxu0 %v8437_v61  ;;  %v8722_v61 = vld [vmem:[#allocation8 + $0x6d0] sm:$0xf0]  ;;  %5326 = vmatmul.bf16.vlgmr.msrb.gmra.mxu2 %v10362_v37 }
 0x2dc   :  { %5430 = vmatpush.bf16.msrb.mxu2 %v8741_v14  ;;  %v8725_v1 = vor.u32 %v9677_v29, %v8722_v61  ;;  %5393 = vmatpush.bf16.msra.mxu3 %v8277_v39  ;;  %v7912_v14 = vld [vmem:[#allocation8 + $0x68] sm:$0xf]  ;;  %v9508_v39 = vld [vmem:[#allocation8 + $0x174] sm:$0xf0]  ;;  %v8658_v29 = vld [vmem:[#allocation8 + $0x650] sm:$0xf0] }
 0x2dd   :  { %5419 = vmatpush.bf16.msrb.mxu1 %v8565_v46  ;;  %v8501_v46 = vor.u32 %v9621_v22, %v8498_v15  ;;  %v9476_v22 = vld [vmem:[#allocation8 + $0x74] sm:$0xf0]  ;;  %v8040_v15 = vld [vmem:[#allocation8 + $0x168] sm:$0xf]  ;;  %v3605_v42 = vpop.f32.mrf.mxu3  ;;  %v8661_v16 = vor.u32 %v9661_v49, %v8658_v29 }
 0x2de   :  { %v7913_v61 = vor.u32 %v9476_v22, %v7912_v14  ;;  %v8472_v49 = vld [vmem:[#allocation8 + $0x4c8] sm:$0xf]  ;;  %v9616_v29 = vld [vmem:[#allocation8 + $0x4d4] sm:$0xf0] }
 0x2df   :  { %5406 = vmatpush.bf16.msrb.mxu0 %v8421_v35  ;;  %v8706_v35 = vld [vmem:[#allocation8 + $0x6b0] sm:$0xf0] }
 0x2e0   :  { %5431 = vmatpush.bf16.msrb.mxu2 %v8725_v1  ;;  %v8709_v20 = vor.u32 %v9673_v5, %v8706_v35  ;;  %5394 = vmatpush.bf16.msra.mxu3 %v8261_v21  ;;  %v3592_v1 = vadd.f32 %v3591_v31, %v3578_v9  ;;  %v8216_v31 = vld [vmem:[#allocation8 + $0x2c8] sm:$0xf] }
 0x2e1   :  { %5420 = vmatpush.bf16.msrb.mxu1 %v8549_v55  ;;  %v8242_v55 = vld [vmem:[#allocation8 + $0x310] sm:$0xf0] }
 0x2e2   :  { %v3606_v36 = vadd.f32 %v3605_v42, %v3592_v1  ;;  %v8473_v1 = vor.u32 %v9616_v29, %v8472_v49  ;;  %v9697_v49 = vld [vmem:[#allocation8 + $0x764] sm:$0xf]  ;;  %v8802_v29 = vld [vmem:[#allocation8 + $0x770] sm:$0xf0] }
 0x2e3   :  { %5407 = vmatpush.bf16.msrb.mxu0 %v8405_v24  ;;  %v8072_v24 = vld [vmem:[#allocation8 + $0x1a8] sm:$0xf] }
 0x2e4   :  { %5432 = vmatpush.bf16.msrb.mxu2 %v8709_v20  ;;  %v8073_v53 = vor.u32 %v9516_v47, %v8072_v24  ;;  %v9500_v20 = vld [vmem:[#allocation8 + $0x134] sm:$0xf0] }
 0x2e5   :  { %5421 = vmatpush.bf16.msrb.mxu1 %v8533_v6  ;;  %v8245_v6 = vor.u32 %v9557_v13, %v8242_v55  ;;  %v7880_v13 = vld [vmem:[#allocation8 + $0x28] sm:$0xf]  ;;  %v9468_v55 = vld [vmem:[#allocation8 + $0x34] sm:$0xf0] }
 0x2e6   :  { %v9556_v24 = vld [vmem:[#allocation8 + $0x2f4] sm:$0xf0]  ;;  %v7881_v51 = vor.u32 %v9468_v55, %v7880_v13  ;;  %v9709_v55 = vld [vmem:[#allocation8 + $0x7c4] sm:$0xf] }
 0x2e7   :  { %5408 = vmatpush.bf16.msrb.mxu0 %v8389_v54  ;;  %5395 = vmatpush.bf16.msra.mxu3 %v8245_v6  ;;  %v7929_v54 = vor.u32 %v9480_v7, %v7928_v43  ;;  %v7864_v6 = vld [vmem:[#allocation8 + $0x8] sm:$0xf]  ;;  %v9496_v43 = vld [vmem:[#allocation8 + $0x114] sm:$0xf0]  ;;  %v8233_v44 = vor.u32 %v9556_v24, %v8232_v28 }
 0x2e8   :  { %5433 = vmatpush.bf16.msrb.mxu2 %v8693_v34  ;;  %v7992_v34 = vld [vmem:[#allocation8 + $0x108] sm:$0xf]  ;;  %v9644_v13 = vld [vmem:[#allocation8 + $0x5b4] sm:$0xf0] }
 0x2e9   :  { %5422 = vmatpush.bf16.msrb.mxu1 %v8517_v23  ;;  %v8677_v23 = vor.u32 %v9665_v12, %v8674_v48  ;;  %v8616_v12 = vld [vmem:[#allocation8 + $0x5e8] sm:$0xf]  ;;  %v9608_v28 = vld [vmem:[#allocation8 + $0x494] sm:$0xf0] }
 0x2eb   :  { %5409 = vmatpush.bf16.msrb.mxu0 %v8373_v41  ;;  %v3617_v26 = vpop.f32.mrf.mxu0  ;;  %5382 = vmatmul.bf16.vlgmr.msra.gmra.mxu2 %v10317_v52  ;;  %v8041_v41 = vor.u32 %v9508_v39, %v8040_v15  ;;  %v7993_v15 = vor.u32 %v9496_v43, %v7992_v34 }
 0x2ec   :  { %5434 = vmatpush.bf16.msrb.mxu2 %v8677_v23 }
 0x2ed   :  { %5423 = vmatpush.bf16.msrb.mxu1 %v8501_v46  ;;  %v3631_v38 = vpop.f32.mrf.mxu1  ;;  %v9472_v46 = vld [vmem:[#allocation8 + $0x54] sm:$0xf0] }
 0x2ee   :  { %5410 = vmatmul.bf16.vlgmr.msrb.gmra.mxu0 %v10347_v32  ;;  %v7897_v5 = vor.u32 %v9472_v46, %v7896_v58  ;;  %v8866_v46 = vld [vmem:[#allocation8 + $0x7f0] sm:$0xf0] }
 0x2ef   :  { %5458 = vmatpush.bf16.msra.mxu0 %v7977_v19  ;;  %v8024_v19 = vld [vmem:[#allocation8 + $0x148] sm:$0xf] }
 0x2f0   :  { %5424 = vmatmul.bf16.vlgmr.msrb.gmra.mxu1 %v10349_v17  ;;  %5435 = vmatpush.bf16.msrb.mxu2 %v8661_v16  ;;  %v8025_v21 = vor.u32 %v9504_v2, %v8024_v19  ;;  %v9713_v16 = vld [vmem:[#allocation8 + $0x7e4] sm:$0xf]  ;;  %v8200_v19 = vld [vmem:[#allocation8 + $0x2a8] sm:$0xf] }
 0x2f1   :  { %5472 = vmatpush.bf16.msra.mxu1 %v8105_v0  ;;  %v3604_v0 = vadd.f32 %v3603_v62, %v3590_v3  ;;  %v9653_v62 = vld [vmem:[#allocation8 + $0x604] sm:$0xf]  ;;  %v8489_v3 = vor.u32 %v9620_v25, %v8488_v63 }
 0x2f2   :  { %v8629_v33 = vor.u32 %v9653_v62, %v8626_v40  ;;  %v8440_v40 = vld [vmem:[#allocation8 + $0x488] sm:$0xf] }
 0x2f3   :  { %5459 = vmatpush.bf16.msra.mxu0 %v7961_v11  ;;  %v3618_v18 = vadd.f32 %v3617_v26, %v3604_v0  ;;  %v9548_v0 = vld [vmem:[#allocation8 + $0x2b4] sm:$0xf0]  ;;  %v8441_v34 = vor.u32 %v9608_v28, %v8440_v40  ;;  %v9689_v40 = vld [vmem:[#allocation8 + $0x724] sm:$0xf]  ;;  %v8770_v28 = vld [vmem:[#allocation8 + $0x730] sm:$0xf0] }
 0x2f4   :  { %5436 = vmatpush.bf16.msrb.mxu2 %v8645_v59  ;;  %v8584_v59 = vld [vmem:[#allocation8 + $0x5a8] sm:$0xf] }
 0x2f5   :  { %5473 = vmatpush.bf16.msra.mxu1 %v8089_v30  ;;  %v3645_v35 = vpop.f32.mrf.mxu2  ;;  %v3619_v30 = vpop.f32.mrf.mxu0  ;;  %v3632_v47 = vadd.f32 %v3631_v38, %v3618_v18  ;;  %v8600_v38 = vld [vmem:[#allocation8 + $0x5c8] sm:$0xf]  ;;  %v8585_v62 = vor.u32 %v9644_v13, %v8584_v59  ;;  %v9684_v59 = vld [vmem:[#allocation8 + $0x6f4] sm:$0xf0] }
 0x2f6   :  { %v3620_v8 = vadd.f32 %v3619_v30, %v3606_v36  ;;  %v3633_v48 = vpop.f32.mrf.mxu1  ;;  %v8456_v18 = vld [vmem:[#allocation8 + $0x4a8] sm:$0xf]  ;;  %v8850_v36 = vld [vmem:[#allocation8 + $0x7d0] sm:$0xf0]  ;;  %v9544_v30 = vld [vmem:[#allocation8 + $0x294] sm:$0xf0] }
 0x2f7   :  { %5460 = vmatpush.bf16.msra.mxu0 %v7945_v57  ;;  %v3659_v11 = vpop.f32.mrf.mxu3  ;;  %v8009_v57 = vor.u32 %v9500_v20, %v8008_v4  ;;  %v3646_v7 = vadd.f32 %v3645_v35, %v3632_v47  ;;  %v8869_v35 = vor.u32 %v9713_v16, %v8866_v46  ;;  %v8853_v24 = vor.u32 %v9709_v55, %v8850_v36  ;;  %v9596_v46 = vld [vmem:[#allocation8 + $0x434] sm:$0xf0]  ;;  %v8376_v55 = vld [vmem:[#allocation8 + $0x408] sm:$0xf] }
 0x2f8   :  { %v3634_v23 = vadd.f32 %v3633_v48, %v3620_v8  ;;  %5437 = vmatpush.bf16.msrb.mxu2 %v8629_v33  ;;  %v8568_v8 = vld [vmem:[#allocation8 + $0x588] sm:$0xf]  ;;  %v9636_v48 = vld [vmem:[#allocation8 + $0x574] sm:$0xf0] }
 0x2f9   :  { %5474 = vmatpush.bf16.msra.mxu1 %v8073_v53  ;;  %v9464_v53 = vld [vmem:[#allocation8 + $0x14] sm:$0xf0]  ;;  %v3660_v9 = vadd.f32 %v3659_v11, %v3646_v7  ;;  %v8184_v11 = vld [vmem:[#allocation8 + $0x288] sm:$0xf] }
 0x2fa   :  { %v7865_v14 = vor.u32 %v9464_v53, %v7864_v6  ;;  %v8185_v47 = vor.u32 %v9544_v30, %v8184_v11  ;;  %v9705_v6 = vld [vmem:[#allocation8 + $0x7a4] sm:$0xf]  ;;  %v8168_v33 = vld [vmem:[#allocation8 + $0x268] sm:$0xf]  ;;  %v9540_v53 = vld [vmem:[#allocation8 + $0x274] sm:$0xf0] }
 0x2fb   :  { %5461 = vmatpush.bf16.msra.mxu0 %v7929_v54  ;;  %v9652_v54 = vld [vmem:[#allocation8 + $0x5f4] sm:$0xf0]  ;;  %5438 = vmatmul.bf16.vlgmr.msrb.gmra.mxu2 %v10362_v37  ;;  %v3671_v2 = vmax.f32 %v3660_v9, 0.0  ;;  %v8424_v7 = vld [vmem:[#allocation8 + $0x468] sm:$0xf]  ;;  %v8169_v25 = vor.u32 %v9540_v53, %v8168_v33 }
 0x2fc   :  { %5486 = vmatpush.bf16.msra.mxu2 %v8233_v44  ;;  %v8617_v26 = vor.u32 %v9652_v54, %v8616_v12  ;;  %v9604_v44 = vld [vmem:[#allocation8 + $0x474] sm:$0xf0]  ;;  %v8552_v12 = vld [vmem:[#allocation8 + $0x568] sm:$0xf]  ;;  %v9701_v54 = vld [vmem:[#allocation8 + $0x784] sm:$0xf] }
 0x2fd   :  { %5475 = vmatpush.bf16.msra.mxu1 %v8057_v10  ;;  %v9552_v10 = vld [vmem:[#allocation8 + $0x2d4] sm:$0xf0]  ;;  %v3647_v22 = vpop.f32.mrf.mxu2  ;;  %v8504_v11 = vld [vmem:[#allocation8 + $0x508] sm:$0xf] }
 0x2fe   :  { %v3648_v42 = vadd.f32 %v3647_v22, %v3634_v23  ;;  %v8217_v39 = vor.u32 %v9552_v10, %v8216_v31  ;;  %v8818_v31 = vld [vmem:[#allocation8 + $0x790] sm:$0xf0]  ;;  %v8152_v10 = vld [vmem:[#allocation8 + $0x248] sm:$0xf]  ;;  %v9536_v23 = vld [vmem:[#allocation8 + $0x254] sm:$0xf0]  ;;  %v8553_v22 = vor.u32 %v9636_v48, %v8552_v12 }
 0x2ff   :  { %5462 = vmatpush.bf16.msra.mxu0 %v7913_v61  ;;  %v3661_v61 = vpop.f32.mrf.mxu3  ;;  %v8821_v9 = vor.u32 %v9701_v54, %v8818_v31  ;;  %v9592_v36 = vld [vmem:[#allocation8 + $0x414] sm:$0xf0]  ;;  %v8728_v33 = vld [vmem:[#allocation8 + $0x6c8] sm:$0xf]  ;;  %v9486_v48 = vld [vmem:[#allocation8 + $0xcc] sm:$0xf] }
 0x300   :  { %v3662_v58 = vadd.f32 %v3661_v61, %v3648_v42  ;;  %5487 = vmatpush.bf16.msra.mxu2 %v8217_v39  ;;  %v8153_v42 = vor.u32 %v9536_v23, %v8152_v10  ;;  %v9632_v39 = vld [vmem:[#allocation8 + $0x554] sm:$0xf0]  ;;  %v8136_v61 = vld [vmem:[#allocation8 + $0x228] sm:$0xf]  ;;  %v7962_v54 = vld [vmem:[#allocation8 + $0xd8] sm:$0xf0] }
 0x301   :  { %5476 = vmatpush.bf16.msra.mxu1 %v8041_v41  ;;  %v9648_v41 = vld [vmem:[#allocation8 + $0x5d4] sm:$0xf0]  ;;  %v9518_v31 = vld [vmem:[#allocation8 + $0x1cc] sm:$0xf]  ;;  %v8090_v10 = vld [vmem:[#allocation8 + $0x1d8] sm:$0xf0] }
 0x302   :  { %v3679_v45 = vmax.f32 %v3662_v58, 0.0  ;;  %v8601_v27 = vor.u32 %v9648_v41, %v8600_v38  ;;  %v9532_v38 = vld [vmem:[#allocation8 + $0x234] sm:$0xf0]  ;;  %v8392_v58 = vld [vmem:[#allocation8 + $0x428] sm:$0xf] }
 0x303   :  { %5463 = vmatpush.bf16.msra.mxu0 %v7897_v5  ;;  %v9612_v5 = vld [vmem:[#allocation8 + $0x4b4] sm:$0xf0]  ;;  %v8360_v23 = vld [vmem:[#allocation8 + $0x3e8] sm:$0xf] }
 0x304   :  { %v10370_v4 = vpack.c.bf16 %v3679_v45, %v3671_v2  ;;  %v8457_v20 = vor.u32 %v9612_v5, %v8456_v18  ;;  %v9628_v2 = vld [vmem:[#allocation8 + $0x534] sm:$0xf0]  ;;  %v9693_v45 = vld [vmem:[#allocation8 + $0x744] sm:$0xf]  ;;  %v8120_v18 = vld [vmem:[#allocation8 + $0x208] sm:$0xf] }
 0x305   :  { %5477 = vmatpush.bf16.msra.mxu1 %v8025_v21  ;;  %v8201_v21 = vor.u32 %v9548_v0, %v8200_v19  ;;  %v8805_v19 = vor.u32 %v9697_v49, %v8802_v29  ;;  %v8137_v0 = vor.u32 %v9532_v38, %v8136_v61  ;;  %v9528_v5 = vld [vmem:[#allocation8 + $0x214] sm:$0xf0]  ;;  %v7946_v49 = vld [vmem:[#allocation8 + $0xb8] sm:$0xf0]  ;;  %v9514_v29 = vld [vmem:[#allocation8 + $0x1ac] sm:$0xf] }
 0x306   :  { %5340 = vmatmul.bf16.vlgmr.msrb.gmra.mxu3 %v10370_v4  ;;  %v9680_v53 = vld [vmem:[#allocation8 + $0x6d4] sm:$0xf0]  ;;  %v8074_v38 = vld [vmem:[#allocation8 + $0x1b8] sm:$0xf0] }
 0x307   :  { %5464 = vmatpush.bf16.msra.mxu0 %v7881_v51  ;;  %5444 = vmatpush.bf16.msrb.mxu3 %v8869_v35  ;;  %v9640_v51 = vld [vmem:[#allocation8 + $0x594] sm:$0xf0]  ;;  %v8393_v35 = vor.u32 %v9596_v46, %v8392_v58  ;;  %v8729_v12 = vor.u32 %v9680_v53, %v8728_v33  ;;  %v8696_v58 = vld [vmem:[#allocation8 + $0x688] sm:$0xf]  ;;  %v9470_v53 = vld [vmem:[#allocation8 + $0x4c] sm:$0xf] }
 0x308   :  { %5488 = vmatpush.bf16.msra.mxu2 %v8201_v21  ;;  %v8569_v43 = vor.u32 %v9640_v51, %v8568_v8  ;;  %v8744_v21 = vld [vmem:[#allocation8 + $0x6e8] sm:$0xf]  ;;  %v7978_v8 = vld [vmem:[#allocation8 + $0xf8] sm:$0xf0]  ;;  %v9522_v51 = vld [vmem:[#allocation8 + $0x1ec] sm:$0xf] }
 0x309   :  { %5478 = vmatpush.bf16.msra.mxu1 %v8009_v57  ;;  %v8834_v57 = vld [vmem:[#allocation8 + $0x7b0] sm:$0xf0]  ;;  %v9672_v46 = vld [vmem:[#allocation8 + $0x694] sm:$0xf0] }
 0x30a   :  { %v8837_v63 = vor.u32 %v9705_v6, %v8834_v57  ;;  %v8377_v6 = vor.u32 %v9592_v36, %v8376_v55  ;;  %v8106_v57 = vld [vmem:[#allocation8 + $0x1f8] sm:$0xf0] }
 0x30b   :  { %5465 = vmatpush.bf16.msra.mxu0 %v7865_v14  ;;  %5445 = vmatpush.bf16.msrb.mxu3 %v8853_v24  ;;  %v8425_v14 = vor.u32 %v9604_v44, %v8424_v7  ;;  %v8745_v24 = vor.u32 %v9684_v59, %v8744_v21  ;;  %v9685_v44 = vld [vmem:[#allocation8 + $0x704] sm:$0xf]  ;;  %v9580_v21 = vld [vmem:[#allocation8 + $0x3b4] sm:$0xf0]  ;;  %v8680_v59 = vld [vmem:[#allocation8 + $0x668] sm:$0xf] }
 0x30c   :  { %5489 = vmatpush.bf16.msra.mxu2 %v8185_v47  ;;  %v9490_v47 = vld [vmem:[#allocation8 + $0xec] sm:$0xf] }
 0x30d   :  { %5479 = vmatpush.bf16.msra.mxu1 %v7993_v15  ;;  %v8408_v15 = vld [vmem:[#allocation8 + $0x448] sm:$0xf]  ;;  %v7981_v7 = vor.u32 %v9490_v47, %v7978_v8  ;;  %v9576_v47 = vld [vmem:[#allocation8 + $0x394] sm:$0xf0] }
 0x30e   :  { %5466 = vmatmul.bf16.vlgmr.msra.gmra.mxu0 %v10308_v56  ;;  %v8664_v8 = vld [vmem:[#allocation8 + $0x648] sm:$0xf] }
 0x30f   :  { %5514 = vmatpush.bf16.msrb.mxu0 %v8489_v3  ;;  %v9600_v3 = vld [vmem:[#allocation8 + $0x454] sm:$0xf0]  ;;  %5446 = vmatpush.bf16.msrb.mxu3 %v8837_v63  ;;  %v8754_v63 = vld [vmem:[#allocation8 + $0x710] sm:$0xf0] }
 0x310   :  { %5480 = vmatmul.bf16.vlgmr.msra.gmra.mxu1 %v10315_v60  ;;  %5490 = vmatpush.bf16.msra.mxu2 %v8169_v25  ;;  %v8409_v41 = vor.u32 %v9600_v3, %v8408_v15  ;;  %v8109_v25 = vor.u32 %v9522_v51, %v8106_v57  ;;  %v9676_v15 = vld [vmem:[#allocation8 + $0x6b4] sm:$0xf0]  ;;  %v8757_v3 = vor.u32 %v9685_v44, %v8754_v63  ;;  %v8026_v44 = vld [vmem:[#allocation8 + $0x158] sm:$0xf0]  ;;  %v8296_v63 = vld [vmem:[#allocation8 + $0x368] sm:$0xf] }
 0x311   :  { %5528 = vmatpush.bf16.msrb.mxu1 %v8617_v26  ;;  %v8536_v26 = vld [vmem:[#allocation8 + $0x548] sm:$0xf]  ;;  %v9664_v51 = vld [vmem:[#allocation8 + $0x654] sm:$0xf0] }
 0x312   :  { %v8537_v16 = vor.u32 %v9632_v39, %v8536_v26  ;;  %v9482_v39 = vld [vmem:[#allocation8 + $0xac] sm:$0xf] }
 0x313   :  { %5515 = vmatpush.bf16.msrb.mxu0 %v8473_v1  ;;  %5447 = vmatpush.bf16.msrb.mxu3 %v8821_v9  ;;  %v8520_v1 = vld [vmem:[#allocation8 + $0x528] sm:$0xf]  ;;  %v7965_v9 = vor.u32 %v9486_v48, %v7962_v54  ;;  %v9660_v48 = vld [vmem:[#allocation8 + $0x634] sm:$0xf0] }
 0x314   :  { %5491 = vmatpush.bf16.msra.mxu2 %v8153_v42  ;;  %v8521_v13 = vor.u32 %v9628_v2, %v8520_v1  ;;  %v8093_v42 = vor.u32 %v9518_v31, %v8090_v10  ;;  %v9478_v2 = vld [vmem:[#allocation8 + $0x8c] sm:$0xf] }
 0x315   :  { %5529 = vmatpush.bf16.msrb.mxu1 %v8601_v27  ;;  %v8786_v27 = vld [vmem:[#allocation8 + $0x750] sm:$0xf0] }
 0x316   :  { %5396 = vmatmul.bf16.vlgmr.msra.gmra.mxu3 %v10319_v50  ;;  %v8789_v30 = vor.u32 %v9693_v45, %v8786_v27  ;;  %v7930_v45 = vld [vmem:[#allocation8 + $0x98] sm:$0xf0]  ;;  %v9510_v27 = vld [vmem:[#allocation8 + $0x18c] sm:$0xf] }
 0x317   :  { %5516 = vmatpush.bf16.msrb.mxu0 %v8457_v20  ;;  %5448 = vmatpush.bf16.msrb.mxu3 %v8805_v19  ;;  %v8121_v20 = vor.u32 %v9528_v5, %v8120_v18  ;;  %v7949_v19 = vor.u32 %v9482_v39, %v7946_v49  ;;  %v8697_v18 = vor.u32 %v9672_v46, %v8696_v58  ;;  %v8058_v5 = vld [vmem:[#allocation8 + $0x198] sm:$0xf0]  ;;  %v9656_v39 = vld [vmem:[#allocation8 + $0x614] sm:$0xf0]  ;;  %v9494_v46 = vld [vmem:[#allocation8 + $0x10c] sm:$0xf] }
 0x318   :  { %5492 = vmatpush.bf16.msra.mxu2 %v8137_v0  ;;  %v8077_v0 = vor.u32 %v9514_v29, %v8074_v38  ;;  %v7933_v55 = vor.u32 %v9478_v2, %v7930_v45  ;;  %v8061_v36 = vor.u32 %v9510_v27, %v8058_v5  ;;  %v9554_v29 = vld [vmem:[#allocation8 + $0x2ec] sm:$0xf]  ;;  %v7866_v58 = vld [vmem:[#allocation8 + $0x18] sm:$0xf0]  ;;  %v9564_v2 = vld [vmem:[#allocation8 + $0x334] sm:$0xf0] }
 0x319   :  { %5530 = vmatpush.bf16.msrb.mxu1 %v8585_v62  ;;  %v9624_v62 = vld [vmem:[#allocation8 + $0x514] sm:$0xf0]  ;;  %v9618_v27 = vld [vmem:[#allocation8 + $0x4ec] sm:$0xf] }
 0x31a   :  { %v9650_v5 = vld [vmem:[#allocation8 + $0x5ec] sm:$0xf] }
 0x31b   :  { %5517 = vmatpush.bf16.msrb.mxu0 %v8441_v34  ;;  %v8505_v34 = vor.u32 %v9624_v62, %v8504_v11  ;;  %5449 = vmatpush.bf16.msrb.mxu3 %v8789_v30  ;;  %v9474_v30 = vld [vmem:[#allocation8 + $0x6c] sm:$0xf] }
 0x31c   :  { %5493 = vmatpush.bf16.msra.mxu2 %v8121_v20  ;;  %v7914_v20 = vld [vmem:[#allocation8 + $0x78] sm:$0xf0]  ;;  %v9506_v62 = vld [vmem:[#allocation8 + $0x16c] sm:$0xf] }
 0x31d   :  { %5531 = vmatpush.bf16.msrb.mxu1 %v8569_v43  ;;  %v8773_v43 = vor.u32 %v9689_v40, %v8770_v28  ;;  %v8042_v28 = vld [vmem:[#allocation8 + $0x178] sm:$0xf0] }
 0x31e   :  { %v8045_v57 = vor.u32 %v9506_v62, %v8042_v28  ;;  %v9614_v28 = vld [vmem:[#allocation8 + $0x4cc] sm:$0xf] }
 0x31f   :  { %5518 = vmatpush.bf16.msrb.mxu0 %v8425_v14  ;;  %v9588_v14 = vld [vmem:[#allocation8 + $0x3f4] sm:$0xf0]  ;;  %5494 = vmatmul.bf16.vlgmr.msra.gmra.mxu2 %v10317_v52 }
 0x320   :  { %5542 = vmatpush.bf16.msrb.mxu2 %v8745_v24  ;;  %5450 = vmatpush.bf16.msrb.mxu3 %v8773_v43  ;;  %v8361_v26 = vor.u32 %v9588_v14, %v8360_v23  ;;  %v8312_v24 = vld [vmem:[#allocation8 + $0x388] sm:$0xf]  ;;  %v9502_v43 = vld [vmem:[#allocation8 + $0x14c] sm:$0xf]  ;;  %v7882_v14 = vld [vmem:[#allocation8 + $0x38] sm:$0xf0] }
 0x321   :  { %5532 = vmatpush.bf16.msrb.mxu1 %v8553_v22  ;;  %v8712_v22 = vld [vmem:[#allocation8 + $0x6a8] sm:$0xf]  ;;  %v8313_v33 = vor.u32 %v9576_v47, %v8312_v24  ;;  %v8029_v31 = vor.u32 %v9502_v43, %v8026_v44  ;;  %v9466_v23 = vld [vmem:[#allocation8 + $0x2c] sm:$0xf]  ;;  %v8474_v24 = vld [vmem:[#allocation8 + $0x4d8] sm:$0xf0] }
 0x322   :  { %v8713_v61 = vor.u32 %v9676_v15, %v8712_v22  ;;  %v9498_v22 = vld [vmem:[#allocation8 + $0x12c] sm:$0xf]  ;;  %v7885_v49 = vor.u32 %v9466_v23, %v7882_v14  ;;  %v8186_v23 = vld [vmem:[#allocation8 + $0x298] sm:$0xf0] }
 0x323   :  { %5519 = vmatpush.bf16.msrb.mxu0 %v8409_v41  ;;  %v8344_v41 = vld [vmem:[#allocation8 + $0x3c8] sm:$0xf]  ;;  %v9646_v47 = vld [vmem:[#allocation8 + $0x5cc] sm:$0xf] }
 0x324   :  { %5543 = vmatpush.bf16.msrb.mxu2 %v8729_v12  ;;  %5451 = vmatpush.bf16.msrb.mxu3 %v8757_v3  ;;  %v8648_v12 = vld [vmem:[#allocation8 + $0x628] sm:$0xf]  ;;  %v8010_v3 = vld [vmem:[#allocation8 + $0x138] sm:$0xf0]  ;;  %v9610_v44 = vld [vmem:[#allocation8 + $0x4ac] sm:$0xf] }
 0x325   :  { %5533 = vmatpush.bf16.msrb.mxu1 %v8537_v16  ;;  %v9584_v16 = vld [vmem:[#allocation8 + $0x3d4] sm:$0xf0]  ;;  %v8649_v15 = vor.u32 %v9660_v48, %v8648_v12  ;;  %v8013_v38 = vor.u32 %v9498_v22, %v8010_v3  ;;  %v8586_v48 = vld [vmem:[#allocation8 + $0x5b8] sm:$0xf0]  ;;  %v9606_v3 = vld [vmem:[#allocation8 + $0x48c] sm:$0xf] }
 0x326   :  { %v8345_v1 = vor.u32 %v9584_v16, %v8344_v41  ;;  %v9462_v16 = vld [vmem:[#allocation8 + $0xc] sm:$0xf] }
 0x327   :  { %5520 = vmatpush.bf16.msrb.mxu0 %v8393_v35  ;;  %v8328_v35 = vld [vmem:[#allocation8 + $0x3a8] sm:$0xf]  ;;  %5452 = vmatmul.bf16.vlgmr.msrb.gmra.mxu3 %v10370_v4 }
 0x328   :  { %5500 = vmatpush.bf16.msra.mxu3 %v8361_v26  ;;  %5544 = vmatpush.bf16.msrb.mxu2 %v8713_v61  ;;  %v8329_v11 = vor.u32 %v9580_v21, %v8328_v35  ;;  %v8632_v26 = vld [vmem:[#allocation8 + $0x608] sm:$0xf]  ;;  %v8234_v61 = vld [vmem:[#allocation8 + $0x2f8] sm:$0xf0]  ;;  %v7869_v35 = vor.u32 %v9462_v16, %v7866_v58  ;;  %v9602_v16 = vld [vmem:[#allocation8 + $0x46c] sm:$0xf] }
 0x329   :  { %5534 = vmatpush.bf16.msrb.mxu1 %v8521_v13  ;;  %v9668_v13 = vld [vmem:[#allocation8 + $0x674] sm:$0xf0]  ;;  %v8237_v45 = vor.u32 %v9554_v29, %v8234_v61  ;;  %v8618_v21 = vld [vmem:[#allocation8 + $0x5f8] sm:$0xf0] }
 0x32a   :  { %v8681_v40 = vor.u32 %v9668_v13, %v8680_v59  ;;  %v9550_v59 = vld [vmem:[#allocation8 + $0x2cc] sm:$0xf]  ;;  %v8218_v13 = vld [vmem:[#allocation8 + $0x2d8] sm:$0xf0]  ;;  %v8621_v62 = vor.u32 %v9650_v5, %v8618_v21 }
 0x32b   :  { %5521 = vmatpush.bf16.msrb.mxu0 %v8377_v6  ;;  %v7917_v6 = vor.u32 %v9474_v30, %v7914_v20  ;;  %v8248_v30 = vld [vmem:[#allocation8 + $0x308] sm:$0xf]  ;;  %v9560_v20 = vld [vmem:[#allocation8 + $0x314] sm:$0xf0]  ;;  %v8170_v29 = vld [vmem:[#allocation8 + $0x278] sm:$0xf0] }
 0x32c   :  { %5501 = vmatpush.bf16.msra.mxu3 %v8345_v1  ;;  %5545 = vmatpush.bf16.msrb.mxu2 %v8697_v18  ;;  %v8264_v1 = vld [vmem:[#allocation8 + $0x328] sm:$0xf]  ;;  %v8490_v18 = vld [vmem:[#allocation8 + $0x4f8] sm:$0xf0]  ;;  %v9598_v21 = vld [vmem:[#allocation8 + $0x44c] sm:$0xf] }
 0x32d   :  { %5535 = vmatpush.bf16.msrb.mxu1 %v8505_v34  ;;  %v7898_v34 = vld [vmem:[#allocation8 + $0x58] sm:$0xf0] }
 0x32e   :  { %5522 = vmatmul.bf16.vlgmr.msrb.gmra.mxu0 %v10347_v32  ;;  %v7901_v54 = vor.u32 %v9470_v53, %v7898_v34  ;;  %v8249_v53 = vor.u32 %v9560_v20, %v8248_v30  ;;  %v8477_v34 = vor.u32 %v9614_v28, %v8474_v24  ;;  %v8426_v58 = vld [vmem:[#allocation8 + $0x478] sm:$0xf0]  ;;  %v9700_v30 = vld [vmem:[#allocation8 + $0x774] sm:$0xf0]  ;;  %v9530_v20 = vld [vmem:[#allocation8 + $0x22c] sm:$0xf] }
 0x32f   :  { %5570 = vmatpush.bf16.msra.mxu0 %v7981_v7  ;;  %v8665_v7 = vor.u32 %v9664_v51, %v8664_v8  ;;  %v8602_v8 = vld [vmem:[#allocation8 + $0x5d8] sm:$0xf0]  ;;  %v8872_v51 = vld [vmem:[#allocation8 + $0x7e8] sm:$0xf] }
 0x330   :  { %5536 = vmatmul.bf16.vlgmr.msrb.gmra.mxu1 %v10349_v17  ;;  %5502 = vmatpush.bf16.msra.mxu3 %v8329_v11  ;;  %v8493_v11 = vor.u32 %v9618_v27, %v8490_v18  ;;  %v8605_v43 = vor.u32 %v9646_v47, %v8602_v8  ;;  %v8154_v27 = vld [vmem:[#allocation8 + $0x258] sm:$0xf0]  ;;  %v8429_v18 = vor.u32 %v9602_v16, %v8426_v58  ;;  %v9594_v47 = vld [vmem:[#allocation8 + $0x42c] sm:$0xf] }
 0x331   :  { %5584 = vmatpush.bf16.msra.mxu1 %v8109_v25  ;;  %5546 = vmatpush.bf16.msrb.mxu2 %v8681_v40  ;;  %v9572_v25 = vld [vmem:[#allocation8 + $0x374] sm:$0xf0]  ;;  %v8221_v40 = vor.u32 %v9550_v59, %v8218_v13  ;;  %v8410_v59 = vld [vmem:[#allocation8 + $0x458] sm:$0xf0]  ;;  %v9630_v13 = vld [vmem:[#allocation8 + $0x54c] sm:$0xf] }
 0x332   :  { %v8297_v10 = vor.u32 %v9572_v25, %v8296_v63  ;;  %v8458_v63 = vld [vmem:[#allocation8 + $0x4b8] sm:$0xf0]  ;;  %v9642_v25 = vld [vmem:[#allocation8 + $0x5ac] sm:$0xf] }
 0x333   :  { %5571 = vmatpush.bf16.msra.mxu0 %v7965_v9  ;;  %v8280_v9 = vld [vmem:[#allocation8 + $0x348] sm:$0xf]  ;;  %v8461_v14 = vor.u32 %v9610_v44, %v8458_v63  ;;  %v8589_v22 = vor.u32 %v9642_v25, %v8586_v48  ;;  %v8394_v8 = vld [vmem:[#allocation8 + $0x438] sm:$0xf0]  ;;  %v9682_v44 = vld [vmem:[#allocation8 + $0x6ec] sm:$0xf] }
 0x334   :  { %5503 = vmatpush.bf16.msra.mxu3 %v8313_v33  ;;  %v8202_v33 = vld [vmem:[#allocation8 + $0x2b8] sm:$0xf0]  ;;  %v9590_v48 = vld [vmem:[#allocation8 + $0x40c] sm:$0xf] }
 0x335   :  { %5585 = vmatpush.bf16.msra.mxu1 %v8093_v42  ;;  %5547 = vmatpush.bf16.msrb.mxu2 %v8665_v7  ;;  %v9568_v42 = vld [vmem:[#allocation8 + $0x354] sm:$0xf0]  ;;  %v8746_v63 = vld [vmem:[#allocation8 + $0x6f8] sm:$0xf0] }
 0x336   :  { %v8281_v41 = vor.u32 %v9568_v42, %v8280_v9  ;;  %v8442_v9 = vld [vmem:[#allocation8 + $0x498] sm:$0xf0]  ;;  %v9638_v42 = vld [vmem:[#allocation8 + $0x58c] sm:$0xf] }
 0x337   :  { %5572 = vmatpush.bf16.msra.mxu0 %v7949_v19  ;;  %v8633_v19 = vor.u32 %v9656_v39, %v8632_v26  ;;  %v8570_v26 = vld [vmem:[#allocation8 + $0x598] sm:$0xf0]  ;;  %v9708_v39 = vld [vmem:[#allocation8 + $0x7b4] sm:$0xf0]  ;;  %v8445_v61 = vor.u32 %v9606_v3, %v8442_v9  ;;  %v9678_v9 = vld [vmem:[#allocation8 + $0x6cc] sm:$0xf] }
 0x338   :  { %5504 = vmatpush.bf16.msra.mxu3 %v8297_v10  ;;  %v9542_v10 = vld [vmem:[#allocation8 + $0x28c] sm:$0xf]  ;;  %v9724_v16 = vld [vmem:[#allocation11 + $0x38] sm:$0xff] }
 0x339   :  { %5586 = vmatpush.bf16.msra.mxu1 %v8077_v0  ;;  %5548 = vmatpush.bf16.msrb.mxu2 %v8649_v15  ;;  %v7994_v0 = vld [vmem:[#allocation8 + $0x118] sm:$0xf0] }
 0x33b   :  { %5573 = vmatpush.bf16.msra.mxu0 %v7933_v55  ;;  %v7997_v55 = vor.u32 %v9494_v46, %v7994_v0  ;;  %v9634_v46 = vld [vmem:[#allocation8 + $0x56c] sm:$0xf]  ;;  %v8554_v0 = vld [vmem:[#allocation8 + $0x578] sm:$0xf0] }
 0x33c   :  { %5505 = vmatpush.bf16.msra.mxu3 %v8281_v41  ;;  %v8557_v5 = vor.u32 %v9634_v46, %v8554_v0  ;;  %v9582_v0 = vld [vmem:[#allocation8 + $0x3cc] sm:$0xf] }
 0x33d   :  { %5587 = vmatpush.bf16.msra.mxu1 %v8061_v36  ;;  %5549 = vmatpush.bf16.msrb.mxu2 %v8633_v19  ;;  %v8265_v36 = vor.u32 %v9564_v2, %v8264_v1  ;;  %v8824_v1 = vld [vmem:[#allocation8 + $0x788] sm:$0xf]  ;;  %v9704_v2 = vld [vmem:[#allocation8 + $0x794] sm:$0xf0] }
 0x33f   :  { %5574 = vmatpush.bf16.msra.mxu0 %v7917_v6  ;;  %v9716_v6 = vld [vmem:[#allocation8 + $0x7f4] sm:$0xf0] }
 0x340   :  { %5550 = vmatmul.bf16.vlgmr.msrb.gmra.mxu2 %v10362_v37  ;;  %5506 = vmatpush.bf16.msra.mxu3 %v8265_v36  ;;  %v8873_v7 = vor.u32 %v9716_v6, %v8872_v51  ;;  %v8538_v36 = vld [vmem:[#allocation8 + $0x558] sm:$0xf0]  ;;  %v9626_v51 = vld [vmem:[#allocation8 + $0x52c] sm:$0xf] }
 0x341   :  { %5588 = vmatpush.bf16.msra.mxu1 %v8045_v57  ;;  %5598 = vmatpush.bf16.msra.mxu2 %v8237_v45  ;;  %v9546_v57 = vld [vmem:[#allocation8 + $0x2ac] sm:$0xf]  ;;  %v8541_v28 = vor.u32 %v9630_v13, %v8538_v36  ;;  %v8314_v36 = vld [vmem:[#allocation8 + $0x398] sm:$0xf0] }
 0x342   :  { %v8205_v12 = vor.u32 %v9546_v57, %v8202_v33  ;;  %v9534_v45 = vld [vmem:[#allocation8 + $0x24c] sm:$0xf]  ;;  %v8522_v57 = vld [vmem:[#allocation8 + $0x538] sm:$0xf0]  ;;  %v8792_v33 = vld [vmem:[#allocation8 + $0x748] sm:$0xf] }
 0x343   :  { %5575 = vmatpush.bf16.msra.mxu0 %v7901_v54  ;;  %v8856_v54 = vld [vmem:[#allocation8 + $0x7c8] sm:$0xf]  ;;  %v8525_v25 = vor.u32 %v9626_v51, %v8522_v57  ;;  %v8650_v51 = vld [vmem:[#allocation8 + $0x638] sm:$0xf0]  ;;  %v5257_v57 = vpop.f32.mrf.mxu1 }
 0x344   :  { %5507 = vmatpush.bf16.msra.mxu3 %v8249_v53  ;;  %v9696_v53 = vld [vmem:[#allocation8 + $0x754] sm:$0xf0] }
 0x345   :  { %5589 = vmatpush.bf16.msra.mxu1 %v8029_v31  ;;  %5599 = vmatpush.bf16.msra.mxu2 %v8221_v40  ;;  %v9712_v31 = vld [vmem:[#allocation8 + $0x7d4] sm:$0xf0]  ;;  %v8413_v40 = vor.u32 %v9598_v21, %v8410_v59  ;;  %v9666_v21 = vld [vmem:[#allocation8 + $0x66c] sm:$0xf]  ;;  %v8682_v59 = vld [vmem:[#allocation8 + $0x678] sm:$0xf0] }
 0x346   :  { %v8857_v15 = vor.u32 %v9712_v31, %v8856_v54  ;;  %v8378_v54 = vld [vmem:[#allocation8 + $0x418] sm:$0xf0]  ;;  %v8685_v13 = vor.u32 %v9666_v21, %v8682_v59  ;;  %v9702_v59 = vld [vmem:[#allocation8 + $0x78c] sm:$0xf] }
 0x347   :  { %5576 = vmatpush.bf16.msra.mxu0 %v7885_v49  ;;  %5508 = vmatmul.bf16.vlgmr.msra.gmra.mxu3 %v10319_v50  ;;  %v9538_v49 = vld [vmem:[#allocation8 + $0x26c] sm:$0xf]  ;;  %v8381_v3 = vor.u32 %v9590_v48, %v8378_v54 }
 0x348   :  { %5556 = vmatpush.bf16.msrb.mxu3 %v8873_v7  ;;  %v8173_v19 = vor.u32 %v9538_v49, %v8170_v29  ;;  %v8397_v7 = vor.u32 %v9594_v47, %v8394_v8  ;;  %v9688_v49 = vld [vmem:[#allocation8 + $0x714] sm:$0xf0]  ;;  %v9586_v29 = vld [vmem:[#allocation8 + $0x3ec] sm:$0xf]  ;;  %v8298_v47 = vld [vmem:[#allocation8 + $0x378] sm:$0xf0] }
 0x349   :  { %5590 = vmatpush.bf16.msra.mxu1 %v8013_v38  ;;  %5600 = vmatpush.bf16.msra.mxu2 %v8205_v12  ;;  %v8573_v38 = vor.u32 %v9638_v42, %v8570_v26  ;;  %v8793_v12 = vor.u32 %v9696_v53, %v8792_v33  ;;  %v8730_v42 = vld [vmem:[#allocation8 + $0x6d8] sm:$0xf0]  ;;  %v9658_v8 = vld [vmem:[#allocation8 + $0x62c] sm:$0xf]  ;;  %v5271_v33 = vpop.f32.mrf.mxu2 }
 0x34b   :  { %5577 = vmatpush.bf16.msra.mxu0 %v7869_v35  ;;  %v8825_v35 = vor.u32 %v9704_v2, %v8824_v1  ;;  %v8346_v1 = vld [vmem:[#allocation8 + $0x3d8] sm:$0xf0]  ;;  %v9670_v2 = vld [vmem:[#allocation8 + $0x68c] sm:$0xf] }
 0x34c   :  { %5557 = vmatpush.bf16.msrb.mxu3 %v8857_v15  ;;  %v9692_v15 = vld [vmem:[#allocation8 + $0x734] sm:$0xf0] }
 0x34d   :  { %5591 = vmatpush.bf16.msra.mxu1 %v7997_v55  ;;  %v8157_v55 = vor.u32 %v9534_v45, %v8154_v27  ;;  %v8698_v45 = vld [vmem:[#allocation8 + $0x698] sm:$0xf0]  ;;  %v9723_v27 = vld [vmem:[#allocation11 + $0x30] sm:$0xff] }
 0x34e   :  { %5578 = vmatmul.bf16.vlgmr.msra.gmra.mxu0 %v10308_v56  ;;  %v8189_v56 = vor.u32 %v9542_v10, %v8186_v23  ;;  %v9622_v10 = vld [vmem:[#allocation8 + $0x50c] sm:$0xf]  ;;  %v8506_v23 = vld [vmem:[#allocation8 + $0x518] sm:$0xf0] }
 0x34f   :  { %5626 = vmatpush.bf16.msrb.mxu0 %v8493_v11  ;;  %v8808_v11 = vld [vmem:[#allocation8 + $0x768] sm:$0xf] }
 0x350   :  { %5592 = vmatmul.bf16.vlgmr.msra.gmra.mxu1 %v10315_v60  ;;  %v8840_v60 = vld [vmem:[#allocation8 + $0x7a8] sm:$0xf]  ;;  %5601 = vmatpush.bf16.msra.mxu2 %v8189_v56  ;;  %v8809_v24 = vor.u32 %v9700_v30, %v8808_v11  ;;  %v8509_v56 = vor.u32 %v9622_v10, %v8506_v23  ;;  %v9662_v11 = vld [vmem:[#allocation8 + $0x64c] sm:$0xf]  ;;  %v8666_v30 = vld [vmem:[#allocation8 + $0x658] sm:$0xf0] }
 0x351   :  { %5640 = vmatpush.bf16.msrb.mxu1 %v8621_v62  ;;  %v8841_v41 = vor.u32 %v9708_v39, %v8840_v60  ;;  %v8138_v62 = vld [vmem:[#allocation8 + $0x238] sm:$0xf0]  ;;  %v8733_v60 = vor.u32 %v9678_v9, %v8730_v42  ;;  %v8760_v39 = vld [vmem:[#allocation8 + $0x708] sm:$0xf]  ;;  %v9718_v23 = vld [vmem:[#allocation11 + $0x8] sm:$0xff] }
 0x352   :  { %v8141_v6 = vor.u32 %v9530_v20, %v8138_v62  ;;  %v8761_v58 = vor.u32 %v9688_v49, %v8760_v39  ;;  %v9721_v20 = vld [vmem:[#allocation11 + $0x20] sm:$0xff]  ;;  %v5243_v62 = vpop.f32.mrf.mxu0  ;;  %v8266_v10 = vld [vmem:[#allocation8 + $0x338] sm:$0xf0]  ;;  %v9558_v9 = vld [vmem:[#allocation8 + $0x30c] sm:$0xf]  ;;  %v5285_v39 = vpop.f32.mrf.mxu3 }
 0x353   :  { %5627 = vmatpush.bf16.msrb.mxu0 %v8477_v34  ;;  %5558 = vmatpush.bf16.msrb.mxu3 %v8841_v41  ;;  %v9526_v34 = vld [vmem:[#allocation8 + $0x20c] sm:$0xf]  ;;  %v8714_v41 = vld [vmem:[#allocation8 + $0x6b8] sm:$0xf0] }
 0x354   :  { %5602 = vmatpush.bf16.msra.mxu2 %v8173_v19  ;;  %v8250_v42 = vld [vmem:[#allocation8 + $0x318] sm:$0xf0] }
 0x355   :  { %5641 = vmatpush.bf16.msrb.mxu1 %v8605_v43  ;;  %v8122_v43 = vld [vmem:[#allocation8 + $0x218] sm:$0xf0] }
 0x356   :  { %v8125_v31 = vor.u32 %v9526_v34, %v8122_v43  ;;  %v8653_v34 = vor.u32 %v9658_v8, %v8650_v51  ;;  %v9566_v43 = vld [vmem:[#allocation8 + $0x34c] sm:$0xf] }
 0x357   :  { %5628 = vmatpush.bf16.msrb.mxu0 %v8461_v14  ;;  %5559 = vmatpush.bf16.msrb.mxu3 %v8825_v35  ;;  %v8749_v14 = vor.u32 %v9682_v44, %v8746_v63  ;;  %v8330_v35 = vld [vmem:[#allocation8 + $0x3b8] sm:$0xf0]  ;;  %v9654_v44 = vld [vmem:[#allocation8 + $0x60c] sm:$0xf] }
 0x358   :  { %5603 = vmatpush.bf16.msra.mxu2 %v8157_v55  ;;  %v9574_v55 = vld [vmem:[#allocation8 + $0x38c] sm:$0xf]  ;;  %v8634_v63 = vld [vmem:[#allocation8 + $0x618] sm:$0xf0] }
 0x359   :  { %5642 = vmatpush.bf16.msrb.mxu1 %v8589_v22  ;;  %v8776_v22 = vld [vmem:[#allocation8 + $0x728] sm:$0xf]  ;;  %v8637_v48 = vor.u32 %v9654_v44, %v8634_v63 }
 0x35a   :  { %v8777_v26 = vor.u32 %v9692_v15, %v8776_v22  ;;  %v5245_v54 = vpop.f32.mrf.mxu0  ;;  %v10387_v22 = vld [vmem:[#allocation10] sm:$0xf]  ;;  %v5259_v15 = vpop.f32.mrf.mxu1 }
 0x35b   :  { %5629 = vmatpush.bf16.msrb.mxu0 %v8445_v61  ;;  %5560 = vmatpush.bf16.msrb.mxu3 %v8809_v24  ;;  %v8362_v61 = vld [vmem:[#allocation8 + $0x3f8] sm:$0xf0]  ;;  %v9570_v24 = vld [vmem:[#allocation8 + $0x36c] sm:$0xf]  ;;  %v3946_v49 = vperm.slane %v10387_v22, 0 }
 0x35c   :  { %5604 = vmatpush.bf16.msra.mxu2 %v8141_v6  ;;  %v8365_v46 = vor.u32 %v9586_v29, %v8362_v61  ;;  %v9720_v6 = vld [vmem:[#allocation11 + $0x18] sm:$0xff]  ;;  %v8301_v53 = vor.u32 %v9570_v24, %v8298_v47  ;;  %v8253_v29 = vor.u32 %v9558_v9, %v8250_v42  ;;  %v9726_v42 = vld [vmem:[#allocation11 + $0x48] sm:$0xff] }
 0x35d   :  { %5643 = vmatpush.bf16.msrb.mxu1 %v8573_v38  ;;  %v9674_v38 = vld [vmem:[#allocation8 + $0x6ac] sm:$0xf]  ;;  %v8762_v9 = vld [vmem:[#allocation8 + $0x718] sm:$0xf0] }
 0x35e   :  { %v8717_v19 = vor.u32 %v9674_v38, %v8714_v41  ;;  %v9710_v41 = vld [vmem:[#allocation8 + $0x7cc] sm:$0xf] }
 0x35f   :  { %5630 = vmatpush.bf16.msrb.mxu0 %v8429_v18  ;;  %5561 = vmatpush.bf16.msrb.mxu3 %v8793_v12  ;;  %v8701_v18 = vor.u32 %v9670_v2, %v8698_v45  ;;  %v5246_v2 = vadd.f32 %v5245_v54, %v3946_v49  ;;  %v9706_v45 = vld [vmem:[#allocation8 + $0x7ac] sm:$0xf] }
 0x360   :  { %5605 = vmatpush.bf16.msra.mxu2 %v8125_v31  ;;  %v9562_v31 = vld [vmem:[#allocation8 + $0x32c] sm:$0xf] }
 0x361   :  { %5644 = vmatpush.bf16.msrb.mxu1 %v8557_v5  ;;  %v9578_v5 = vld [vmem:[#allocation8 + $0x3ac] sm:$0xf]  ;;  %v5260_v21 = vadd.f32 %v5259_v15, %v5246_v2 }
 0x362   :  { %v5299_v61 = vpop.f32.mrf.mxu0 }
 0x363   :  { %5631 = vmatpush.bf16.msrb.mxu0 %v8413_v40  ;;  %5606 = vmatmul.bf16.vlgmr.msra.gmra.mxu2 %v10317_v52  ;;  %v8349_v52 = vor.u32 %v9582_v0, %v8346_v1  ;;  %v8317_v40 = vor.u32 %v9574_v55, %v8314_v36 }
 0x364   :  { %5654 = vmatpush.bf16.msrb.mxu2 %v8749_v14  ;;  %5562 = vmatpush.bf16.msrb.mxu3 %v8777_v26  ;;  %v8269_v14 = vor.u32 %v9562_v31, %v8266_v10  ;;  %v8874_v26 = vld [vmem:[#allocation8 + $0x7f8] sm:$0xf0] }
 0x365   :  { %5645 = vmatpush.bf16.msrb.mxu1 %v8541_v28  ;;  %v8669_v28 = vor.u32 %v9662_v11, %v8666_v30  ;;  %v9698_v30 = vld [vmem:[#allocation8 + $0x76c] sm:$0xf] }
 0x367   :  { %5632 = vmatpush.bf16.msrb.mxu0 %v8397_v7  ;;  %v8282_v7 = vld [vmem:[#allocation8 + $0x358] sm:$0xf0] }
 0x368   :  { %5655 = vmatpush.bf16.msrb.mxu2 %v8733_v60  ;;  %5563 = vmatpush.bf16.msrb.mxu3 %v8761_v58  ;;  %v8285_v12 = vor.u32 %v9566_v43, %v8282_v7  ;;  %v9717_v60 = vld [vmem:[#allocation11] sm:$0xff]  ;;  %v9732_v58 = vld [vmem:[#allocation11 + $0x78] sm:$0xff]  ;;  %v9727_v43 = vld [vmem:[#allocation11 + $0x50] sm:$0xff] }
 0x369   :  { %5646 = vmatpush.bf16.msrb.mxu1 %v8525_v25  ;;  %v9719_v25 = vld [vmem:[#allocation11 + $0x10] sm:$0xff] }
 0x36b   :  { %5633 = vmatpush.bf16.msrb.mxu0 %v8381_v3  ;;  %5564 = vmatmul.bf16.vlgmr.msrb.gmra.mxu3 %v10370_v4  ;;  %v5273_v3 = vpop.f32.mrf.mxu2 }
 0x36c   :  { %5612 = vmatpush.bf16.msra.mxu3 %v8365_v46  ;;  %5656 = vmatpush.bf16.msrb.mxu2 %v8717_v19  ;;  %v5244_v46 = vadd.f32 %v5243_v62, %v3946_v49  ;;  %v5313_v19 = vpop.f32.mrf.mxu1  ;;  %v5274_v55 = vadd.f32 %v5273_v3, %v5260_v21  ;;  %v9729_v62 = vld [vmem:[#allocation11 + $0x60] sm:$0xff]  ;;  %v9686_v3 = vld [vmem:[#allocation8 + $0x70c] sm:$0xf]  ;;  %v3947_v49 = vperm.slane %v10387_v22, 1 }
 0x36d   :  { %5647 = vmatpush.bf16.msrb.mxu1 %v8509_v56  ;;  %v9714_v56 = vld [vmem:[#allocation8 + $0x7ec] sm:$0xf] }
 0x36e   :  { %5634 = vmatmul.bf16.vlgmr.msrb.gmra.mxu0 %v10347_v32  ;;  %v9722_v32 = vld [vmem:[#allocation11 + $0x28] sm:$0xff]  ;;  %v8877_v38 = vor.u32 %v9714_v56, %v8874_v26 }
 0x36f   :  { %5954 = vmatpush.bf16.msra.mxu0 %v9724_v16  ;;  %v8858_v16 = vld [vmem:[#allocation8 + $0x7d8] sm:$0xf0] }
 0x370   :  { %5648 = vmatmul.bf16.vlgmr.msrb.gmra.mxu1 %v10349_v17  ;;  %5613 = vmatpush.bf16.msra.mxu3 %v8349_v52  ;;  %v8333_v17 = vor.u32 %v9578_v5, %v8330_v35  ;;  %v8861_v1 = vor.u32 %v9710_v41, %v8858_v16  ;;  %v5258_v52 = vadd.f32 %v5257_v57, %v5244_v46  ;;  %v8794_v57 = vld [vmem:[#allocation8 + $0x758] sm:$0xf0] }
 0x371   :  { %5657 = vmatpush.bf16.msrb.mxu2 %v8701_v18  ;;  %5968 = vmatpush.bf16.msra.mxu1 %v9732_v58  ;;  %v5287_v18 = vpop.f32.mrf.mxu3 }
 0x372   :  { %v5272_v35 = vadd.f32 %v5271_v33, %v5258_v52  ;;  %v9728_v33 = vld [vmem:[#allocation11 + $0x58] sm:$0xff] }
 0x373   :  { %5955 = vmatpush.bf16.msra.mxu0 %v9723_v27  ;;  %v5327_v0 = vpop.f32.mrf.mxu2  ;;  %v9731_v27 = vld [vmem:[#allocation11 + $0x70] sm:$0xff] }
 0x374   :  { %5614 = vmatpush.bf16.msra.mxu3 %v8333_v17  ;;  %v9730_v17 = vld [vmem:[#allocation11 + $0x68] sm:$0xff]  ;;  %v5286_v11 = vadd.f32 %v5285_v39, %v5272_v35  ;;  %v8765_v39 = vor.u32 %v9686_v3, %v8762_v9 }
 0x375   :  { %5658 = vmatpush.bf16.msrb.mxu2 %v8685_v13  ;;  %5969 = vmatpush.bf16.msra.mxu1 %v9731_v27  ;;  %v5301_v13 = vpop.f32.mrf.mxu0 }
 0x376   :  { %v5300_v24 = vadd.f32 %v5299_v61, %v5286_v11  ;;  %v9725_v61 = vld [vmem:[#allocation11 + $0x40] sm:$0xff] }
 0x377   :  { %5956 = vmatpush.bf16.msra.mxu0 %v9722_v32  ;;  %v8826_v32 = vld [vmem:[#allocation8 + $0x798] sm:$0xf0] }
 0x378   :  { %5615 = vmatpush.bf16.msra.mxu3 %v8317_v40  ;;  %v8829_v36 = vor.u32 %v9702_v59, %v8826_v32 }
 0x379   :  { %5659 = vmatpush.bf16.msrb.mxu2 %v8669_v28  ;;  %5970 = vmatpush.bf16.msra.mxu1 %v9730_v17  ;;  %v5288_v28 = vadd.f32 %v5287_v18, %v5274_v55 }
 0x37b   :  { %5957 = vmatpush.bf16.msra.mxu0 %v9721_v20  ;;  %v8810_v20 = vld [vmem:[#allocation8 + $0x778] sm:$0xf0]  ;;  %v5329_v40 = vpop.f32.mrf.mxu2  ;;  %v5302_v51 = vadd.f32 %v5301_v13, %v5288_v28 }
 0x37c   :  { %5616 = vmatpush.bf16.msra.mxu3 %v8301_v53  ;;  %v8813_v8 = vor.u32 %v9698_v30, %v8810_v20 }
 0x37d   :  { %5660 = vmatpush.bf16.msrb.mxu2 %v8653_v34  ;;  %5971 = vmatpush.bf16.msra.mxu1 %v9729_v62  ;;  %v5355_v53 = vpop.f32.mrf.mxu0  ;;  %v5314_v34 = vadd.f32 %v5313_v19, %v5300_v24  ;;  %v9739_v24 = vld [vmem:[#allocation11 + $0xb0] sm:$0xff] }
 0x37e   :  { %v5356_v16 = vadd.f32 %v5355_v53, %v3947_v49 }
 0x37f   :  { %5958 = vmatpush.bf16.msra.mxu0 %v9720_v6  ;;  %v9694_v6 = vld [vmem:[#allocation8 + $0x74c] sm:$0xf]  ;;  %v5328_v63 = vadd.f32 %v5327_v0, %v5314_v34 }
 0x380   :  { %5617 = vmatpush.bf16.msra.mxu3 %v8285_v12  ;;  %v8797_v7 = vor.u32 %v9694_v6, %v8794_v57  ;;  %v8778_v12 = vld [vmem:[#allocation8 + $0x738] sm:$0xf0]  ;;  %v9734_v34 = vld [vmem:[#allocation11 + $0x88] sm:$0xff] }
 0x381   :  { %5661 = vmatpush.bf16.msrb.mxu2 %v8637_v48  ;;  %5972 = vmatpush.bf16.msra.mxu1 %v9728_v33  ;;  %v9736_v6 = vld [vmem:[#allocation11 + $0x98] sm:$0xff]  ;;  %v9735_v33 = vld [vmem:[#allocation11 + $0x90] sm:$0xff] }
 0x383   :  { %5959 = vmatpush.bf16.msra.mxu0 %v9719_v25  ;;  %v9690_v25 = vld [vmem:[#allocation8 + $0x72c] sm:$0xf]  ;;  %v5383_v10 = vpop.f32.mrf.mxu2 }
 0x384   :  { %5662 = vmatmul.bf16.vlgmr.msrb.gmra.mxu2 %v10362_v37  ;;  %5618 = vmatpush.bf16.msra.mxu3 %v8269_v14  ;;  %v8842_v37 = vld [vmem:[#allocation8 + $0x7b8] sm:$0xf0]  ;;  %v8781_v14 = vor.u32 %v9690_v25, %v8778_v12 }
 0x385   :  { %v8845_v5 = vor.u32 %v9706_v45, %v8842_v37  ;;  %5973 = vmatpush.bf16.msra.mxu1 %v9727_v43 }
 0x387   :  { %5960 = vmatpush.bf16.msra.mxu0 %v9718_v23 }
 0x388   :  { %5619 = vmatpush.bf16.msra.mxu3 %v8253_v29 }
 0x389   :  { %v5341_v47 = vpop.f32.mrf.mxu3  ;;  %5974 = vmatpush.bf16.msra.mxu1 %v9726_v42 }
 0x38a   :  { %v5342_v31 = vadd.f32 %v5341_v47, %v5328_v63  ;;  %v3948_v63 = vperm.slane %v10387_v22, 2 }
 0x38b   :  { %5961 = vmatpush.bf16.msra.mxu0 %v9717_v60  ;;  %5620 = vmatmul.bf16.vlgmr.msra.gmra.mxu3 %v10319_v50  ;;  %v5315_v50 = vpop.f32.mrf.mxu1  ;;  %v5357_v60 = vpop.f32.mrf.mxu0 }
 0x38c   :  { %5668 = vmatpush.bf16.msrb.mxu3 %v8877_v38  ;;  %v5316_v44 = vadd.f32 %v5315_v50, %v5302_v51  ;;  %v5682_v56 = vmax.f32 %v5342_v31, 0.0  ;;  %v5385_v58 = vpop.f32.mrf.mxu2  ;;  %v5358_v46 = vadd.f32 %v5357_v60, %v3947_v49  ;;  %v9740_v50 = vld [vmem:[#allocation11 + $0xb8] sm:$0xff]  ;;  %v9737_v51 = vld [vmem:[#allocation11 + $0xa0] sm:$0xff] }
 0x38d   :  { %5975 = vmatpush.bf16.msra.mxu1 %v9725_v61  ;;  %5982 = vmatpush.bf16.msra.mxu2 %v9740_v50 }
 0x38e   :  { %v5330_v54 = vadd.f32 %v5329_v40, %v5316_v44 }
 0x390   :  { %5669 = vmatpush.bf16.msrb.mxu3 %v8861_v1 }
 0x391   :  { %v5343_v23 = vpop.f32.mrf.mxu3  ;;  %5983 = vmatpush.bf16.msra.mxu2 %v9739_v24 }
 0x392   :  { %v5344_v15 = vadd.f32 %v5343_v23, %v5330_v54 }
 0x393   :  { %v5369_v48 = vpop.f32.mrf.mxu1  ;;  %v5411_v19 = vpop.f32.mrf.mxu0 }
 0x394   :  { %5670 = vmatpush.bf16.msrb.mxu3 %v8845_v5  ;;  %v5686_v26 = vmax.f32 %v5344_v15, 0.0  ;;  %v5370_v0 = vadd.f32 %v5369_v48, %v5356_v16  ;;  %v5439_v5 = vpop.f32.mrf.mxu2 }
 0x396   :  { %v5690_v29 = vpack.c.bf16 %v5686_v26, %v5682_v56  ;;  %v5384_v2 = vadd.f32 %v5383_v10, %v5370_v0 }
 0x398   :  { %5671 = vmatpush.bf16.msrb.mxu3 %v8829_v36  ;;  %5962 = vmatmul.bf16.vlgmr.msra.gmra.mxu0 %v5690_v29 }
 0x399   :  { %v5397_v41 = vpop.f32.mrf.mxu3 }
 0x39a   :  { %v5398_v52 = vadd.f32 %v5397_v41, %v5384_v2  ;;  %v9748_v2 = vld [vmem:[#allocation11 + $0xf8] sm:$0xff] }
 0x39b   :  { %v5371_v38 = vpop.f32.mrf.mxu1  ;;  %v5413_v21 = vpop.f32.mrf.mxu0 }
 0x39c   :  { %5672 = vmatpush.bf16.msrb.mxu3 %v8813_v8  ;;  %v5372_v1 = vadd.f32 %v5371_v38, %v5358_v46  ;;  %v5412_v35 = vadd.f32 %v5411_v19, %v5398_v52  ;;  %v5441_v11 = vpop.f32.mrf.mxu2  ;;  %v9738_v8 = vld [vmem:[#allocation11 + $0xa8] sm:$0xff] }
 0x39d   :  { %5984 = vmatpush.bf16.msra.mxu2 %v9738_v8 }
 0x39e   :  { %v5386_v27 = vadd.f32 %v5385_v58, %v5372_v1 }
 0x3a0   :  { %5673 = vmatpush.bf16.msrb.mxu3 %v8797_v7  ;;  %v9733_v7 = vld [vmem:[#allocation11 + $0x80] sm:$0xff] }
 0x3a1   :  { %v5399_v37 = vpop.f32.mrf.mxu3  ;;  %5985 = vmatpush.bf16.msra.mxu2 %v9737_v51 }
 0x3a2   :  { %v5400_v18 = vadd.f32 %v5399_v37, %v5386_v27  ;;  %v9747_v37 = vld [vmem:[#allocation11 + $0xf0] sm:$0xff] }
 0x3a3   :  { %v5425_v45 = vpop.f32.mrf.mxu1  ;;  %v5467_v57 = vpop.f32.mrf.mxu0 }
 0x3a4   :  { %5674 = vmatpush.bf16.msrb.mxu3 %v8781_v14  ;;  %v5414_v59 = vadd.f32 %v5413_v21, %v5400_v18  ;;  %v5426_v17 = vadd.f32 %v5425_v45, %v5412_v35  ;;  %v5495_v43 = vpop.f32.mrf.mxu2  ;;  %v5468_v48 = vadd.f32 %v5467_v57, %v3948_v63  ;;  %v9745_v35 = vld [vmem:[#allocation11 + $0xe0] sm:$0xff]  ;;  %v9744_v21 = vld [vmem:[#allocation11 + $0xd8] sm:$0xff] }
 0x3a5   :  { %5986 = vmatpush.bf16.msra.mxu2 %v9736_v6 }
 0x3a6   :  { %v5440_v36 = vadd.f32 %v5439_v5, %v5426_v17  ;;  %v9746_v5 = vld [vmem:[#allocation11 + $0xe8] sm:$0xff] }
 0x3a8   :  { %5675 = vmatpush.bf16.msrb.mxu3 %v8765_v39 }
 0x3a9   :  { %5987 = vmatpush.bf16.msra.mxu2 %v9735_v33 }
 0x3aa   :  { %v5453_v32 = vpop.f32.mrf.mxu3 }
 0x3ab   :  { %5676 = vmatmul.bf16.vlgmr.msrb.gmra.mxu3 %v10370_v4  ;;  %v5427_v13 = vpop.f32.mrf.mxu1  ;;  %v5454_v4 = vadd.f32 %v5453_v32, %v5440_v36  ;;  %v5469_v44 = vpop.f32.mrf.mxu0  ;;  %v9743_v32 = vld [vmem:[#allocation11 + $0xd0] sm:$0xff]  ;;  %v9741_v36 = vld [vmem:[#allocation11 + $0xc0] sm:$0xff] }
 0x3ac   :  { %v5428_v55 = vadd.f32 %v5427_v13, %v5414_v59  ;;  %v5470_v54 = vadd.f32 %v5469_v44, %v3948_v63  ;;  %v5497_v10 = vpop.f32.mrf.mxu2  ;;  %5996 = vmatpush.bf16.msra.mxu3 %v9748_v2  ;;  %v9742_v13 = vld [vmem:[#allocation11 + $0xc8] sm:$0xff] }
 0x3ad   :  { %v5683_v40 = vmax.f32 %v5454_v4, 0.0  ;;  %5988 = vmatpush.bf16.msra.mxu2 %v9734_v34  ;;  %v3949_v4 = vperm.slane %v10387_v22, 3 }
 0x3ae   :  { %v5442_v30 = vadd.f32 %v5441_v11, %v5428_v55 }
 0x3b0   :  { %5997 = vmatpush.bf16.msra.mxu3 %v9747_v37 }
 0x3b1   :  { %5989 = vmatpush.bf16.msra.mxu2 %v9733_v7 }
 0x3b2   :  { %v5455_v20 = vpop.f32.mrf.mxu3 }
 0x3b3   :  { %v5456_v62 = vadd.f32 %v5455_v20, %v5442_v30  ;;  %v5481_v53 = vpop.f32.mrf.mxu1  ;;  %v5523_v31 = vpop.f32.mrf.mxu0 }
 0x3b4   :  { %v5482_v23 = vadd.f32 %v5481_v53, %v5468_v48  ;;  %5998 = vmatpush.bf16.msra.mxu3 %v9746_v5 }
 0x3b5   :  { %v5687_v28 = vmax.f32 %v5456_v62, 0.0 }
 0x3b6   :  { %v5496_v15 = vadd.f32 %v5495_v43, %v5482_v23 }
 0x3b7   :  { %v5691_v47 = vpack.c.bf16 %v5687_v28, %v5683_v40 }
 0x3b8   :  { %5999 = vmatpush.bf16.msra.mxu3 %v9745_v35 }
 0x3b9   :  { %5976 = vmatmul.bf16.vlgmr.msra.gmra.mxu1 %v5691_v47 }
 0x3bb   :  { %v5483_v12 = vpop.f32.mrf.mxu1  ;;  %v5525_v49 = vpop.f32.mrf.mxu0 }
 0x3bc   :  { %v5484_v14 = vadd.f32 %v5483_v12, %v5470_v54  ;;  %6000 = vmatpush.bf16.msra.mxu3 %v9744_v21 }
 0x3be   :  { %v5498_v42 = vadd.f32 %v5497_v10, %v5484_v14 }
 0x3c0   :  { %6001 = vmatpush.bf16.msra.mxu3 %v9743_v32 }
 0x3c3   :  { %v5537_v3 = vpop.f32.mrf.mxu1  ;;  %v5551_v60 = vpop.f32.mrf.mxu2 }
 0x3c4   :  { %6002 = vmatpush.bf16.msra.mxu3 %v9742_v13 }
 0x3c8   :  { %6003 = vmatpush.bf16.msra.mxu3 %v9741_v36 }
 0x3ca   :  { %v5509_v25 = vpop.f32.mrf.mxu3 }
 0x3cb   :  { %v5510_v56 = vadd.f32 %v5509_v25, %v5496_v15  ;;  %v5539_v41 = vpop.f32.mrf.mxu1  ;;  %v5553_v46 = vpop.f32.mrf.mxu2 }
 0x3cc   :  { %v5579_v59 = vpop.f32.mrf.mxu0 }
 0x3cd   :  { %v5524_v39 = vadd.f32 %v5523_v31, %v5510_v56  ;;  %v5580_v62 = vadd.f32 %v5579_v59, %v3949_v4  ;;  %v9767_v56 = vld [vmem:[#allocation13] ss:$0 sm:$0xff] }
 0x3cf   :  { %v5538_v38 = vadd.f32 %v5537_v3, %v5524_v39 }
 0x3d1   :  { %v5552_v58 = vadd.f32 %v5551_v60, %v5538_v38 }
 0x3d2   :  { %v5511_v9 = vpop.f32.mrf.mxu3 }
 0x3d3   :  { %v5512_v26 = vadd.f32 %v5511_v9, %v5498_v42  ;;  %v5593_v17 = vpop.f32.mrf.mxu1 }
 0x3d4   :  { %v5581_v11 = vpop.f32.mrf.mxu0  ;;  %v5594_v24 = vadd.f32 %v5593_v17, %v5580_v62 }
 0x3d5   :  { %v5526_v29 = vadd.f32 %v5525_v49, %v5512_v26  ;;  %v5582_v50 = vadd.f32 %v5581_v11, %v3949_v4 }
 0x3d7   :  { %v5540_v16 = vadd.f32 %v5539_v41, %v5526_v29 }
 0x3d9   :  { %v5554_v0 = vadd.f32 %v5553_v46, %v5540_v16 }
 0x3db   :  { %v5595_v20 = vpop.f32.mrf.mxu1 }
 0x3dc   :  { %v5596_v47 = vadd.f32 %v5595_v20, %v5582_v50 }
 0x3e6   :  { %v5607_v55 = vpop.f32.mrf.mxu2 }
 0x3e7   :  { %v5608_v8 = vadd.f32 %v5607_v55, %v5594_v24 }
 0x3eb   :  { %v5635_v40 = vpop.f32.mrf.mxu0 }
 0x3ed   :  { %v5649_v51 = vpop.f32.mrf.mxu1 }
 0x3ee   :  { %v5565_v61 = vpop.f32.mrf.mxu3  ;;  %v5609_v28 = vpop.f32.mrf.mxu2 }
 0x3ef   :  { %v5566_v19 = vadd.f32 %v5565_v61, %v5552_v58  ;;  %v5610_v57 = vadd.f32 %v5609_v28, %v5596_v47 }
 0x3f1   :  { %v5684_v27 = vmax.f32 %v5566_v19, 0.0 }
 0x3f3   :  { %v5637_v7 = vpop.f32.mrf.mxu0 }
 0x3f5   :  { %v5651_v25 = vpop.f32.mrf.mxu1 }
 0x3f6   :  { %v5567_v1 = vpop.f32.mrf.mxu3 }
 0x3f7   :  { %v5568_v45 = vadd.f32 %v5567_v1, %v5554_v0 }
 0x3f9   :  { %v5688_v52 = vmax.f32 %v5568_v45, 0.0 }
 0x3fb   :  { %v5692_v18 = vpack.c.bf16 %v5688_v52, %v5684_v27 }
 0x3fd   :  { %5990 = vmatmul.bf16.vlgmr.msra.gmra.mxu2 %v5692_v18 }
 0x407   :  { %v5663_v34 = vpop.f32.mrf.mxu2 }
 0x40e   :  { %v5621_v30 = vpop.f32.mrf.mxu3 }
 0x40f   :  { %v5622_v33 = vadd.f32 %v5621_v30, %v5608_v8  ;;  %v5665_v54 = vpop.f32.mrf.mxu2 }
 0x411   :  { %v5636_v43 = vadd.f32 %v5635_v40, %v5622_v33 }
 0x413   :  { %v5650_v22 = vadd.f32 %v5649_v51, %v5636_v43 }
 0x415   :  { %v5664_v48 = vadd.f32 %v5663_v34, %v5650_v22  ;;  %v5963_v42 = vpop.f32.mrf.mxu0 }
 0x416   :  { %v5623_v6 = vpop.f32.mrf.mxu3  ;;  %v5964_v39 = vadd.f32 %v9767_v56, %v5963_v42 }
 0x417   :  { %v5624_v53 = vadd.f32 %v5623_v6, %v5610_v57 }
 0x419   :  { %v5638_v44 = vadd.f32 %v5637_v7, %v5624_v53 }
 0x41b   :  { %v5652_v12 = vadd.f32 %v5651_v25, %v5638_v44 }
 0x41d   :  { %v5666_v10 = vadd.f32 %v5665_v54, %v5652_v12  ;;  %v5965_v61 = vpop.f32.mrf.mxu0 }
 0x41e   :  { %v5966_v58 = vadd.f32 %v9767_v56, %v5965_v61 }
 0x42e   :  { %v5677_v63 = vpop.f32.mrf.mxu3 }
 0x42f   :  { %v5678_v31 = vadd.f32 %v5677_v63, %v5664_v48 }
 0x431   :  { %v5685_v15 = vmax.f32 %v5678_v31, 0.0 }
 0x436   :  { %v5679_v23 = vpop.f32.mrf.mxu3  ;;  %v5977_v26 = vpop.f32.mrf.mxu1 }
 0x437   :  { %v5680_v14 = vadd.f32 %v5679_v23, %v5666_v10  ;;  %v5978_v49 = vadd.f32 %v5977_v26, %v5964_v39 }
 0x439   :  { %v5689_v3 = vmax.f32 %v5680_v14, 0.0 }
 0x43b   :  { %v5693_v9 = vpack.c.bf16 %v5689_v3, %v5685_v15 }
 0x43d   :  { %6004 = vmatmul.bf16.vlgmr.msra.gmra.mxu3 %v5693_v9 }
 0x43e   :  { %v5979_v16 = vpop.f32.mrf.mxu1 }
 0x43f   :  { %v5980_v19 = vadd.f32 %v5979_v16, %v5966_v58 }
 0x480   :  { %v5991_v60 = vpop.f32.mrf.mxu2 }
 0x481   :  { %v5992_v29 = vadd.f32 %v5991_v60, %v5978_v49 }
 0x488   :  { %v5993_v46 = vpop.f32.mrf.mxu2 }
 0x489   :  { %v5994_v0 = vadd.f32 %v5993_v46, %v5980_v19 }
 0x4c0   :  { %v6005_v38 = vpop.f32.mrf.mxu3 }
 0x4c1   :  { %v6006_v41 = vadd.f32 %v6005_v38, %v5992_v29 }
 0x4c3   :  { %6010 = vst [vmem:[#allocation14] sm:$0xff] %v6006_v41 }
 0x4c8   :  { %v6007_v1 = vpop.f32.mrf.mxu3 }
 0x4c9   :  { %v6008_v2 = vadd.f32 %v6007_v1, %v5994_v0 }
 0x4cb   :  { %6011 = vst [vmem:[#allocation14 + $0x8] sm:$0xff] %v6008_v2 }
 0x4cc   :  { %6024 = dma.vmem_to_hbm [thread:$0]  %s6017_s6, 256, %s6019_s17, [#allocation4], %s9988_s18, %s9988_s18, %s9989_s19  }
 0x4cd   :  { %9970 = dma.done.wait [#allocation4], 256  }
 0x4ce   :  { %9971 = vsyncadd [#allocation4], 4294967040 }
 0x4cf   :  { %6029 = vsyncpa [#allocation3], 1 }
 0x4d0   :  { %6030 = vsyncpa [#allocation6], 1 }
 0x4d1   :  { %6031 = vsyncpa [#allocation9], 1 }
 0x4d2   :  { %6032 = vsyncpa [#allocation12], 1 }
 0x4d3   :  { %6033 = vsyncpa [#allocation4], 1 }

</bundles_post_ra>
